<compile_context>
chip_gen: v7x
topology: tpu7x:2x2x1
jax: 0.10.0
libtpu: 0.0.40
codegen_flags: <defaults>
</compile_context>

<pallas_src>
import functools

import numpy as np
import jax
import jax.numpy as jnp
from jax.experimental import pallas as pl
from jax.experimental.pallas import tpu as pltpu


# Matmul-operand dtype (accumulation is always f32). bf16 for MXU throughput.
MXU_DTYPE = jnp.bfloat16


# -----------------------------------------------------------------------------
# Trace-time geometry helpers
# -----------------------------------------------------------------------------
def _surviving_taps(H, W, dil):
    """3x3 taps whose shifted window overlaps real (non-padding) data."""
    taps = []
    for ky in range(3):
        for kx in range(3):
            dy, dx = (ky - 1) * dil, (kx - 1) * dil
            if abs(dy) < H and abs(dx) < W:
                taps.append((ky * 3 + kx, dy, dx))
    return taps


def _conv_geometry(H, W, dil1, dil2):
    taps1 = _surviving_taps(H, W, dil1)
    taps2 = _surviving_taps(H, W, dil2)
    offsets = tuple(sorted({(dy, dx) for _, dy, dx in taps1} |
                           {(dy, dx) for _, dy, dx in taps2}))
    pad_y = max([abs(dy) for dy, _ in offsets] + [0])
    pad_x = max([abs(dx) for _, dx in offsets] + [0])
    return taps1, taps2, offsets, pad_y, pad_x


def pos_emb_sin_2d(H, W, C, temperature=10000.0):
    # TODO(synk): PositionEmbSin2D not in snippet; DETR-style 2D sine embedding.
    npf = C // 2
    yy, xx = np.meshgrid(np.arange(H, dtype=np.float32),
                         np.arange(W, dtype=np.float32), indexing="ij")
    idx = np.arange(npf)
    dim_t = temperature ** (2.0 * (idx // 2).astype(np.float32) / npf)
    pos_x = xx[..., None] / dim_t
    pos_y = yy[..., None] / dim_t
    even = idx % 2 == 0
    pos_x = np.where(even, np.sin(pos_x), np.cos(pos_x))
    pos_y = np.where(even, np.sin(pos_y), np.cos(pos_y))
    pos = np.concatenate([pos_y, pos_x], axis=-1)      # (H, W, C) channels-last
    return jnp.asarray(pos.reshape(H * W, C), jnp.float32)


# -----------------------------------------------------------------------------
# One-time parameter preparation (hoisted out of the forward)
# -----------------------------------------------------------------------------
def _bn_fold(gamma, beta, mean, var, conv_bias, eps=1e-5):
    scale = gamma / jnp.sqrt(var + eps)
    shift = beta + (conv_bias - mean) * scale
    return scale, shift


def prepare_params(p, H, W, dil1=6, dil2=12):
    taps1, taps2, offsets, _, _ = _conv_geometry(H, W, dil1, dil2)
    oidx = {o: i for i, o in enumerate(offsets)}
    hid = p["a1_w"].shape[-1]
    Cin = p["a1_w"].shape[1]
    f32 = jnp.float32

    # --- atrous conv weights: pack both branches per offset, fold BN scale ---
    s1, sh1 = _bn_fold(p["a1_g"], p["a1_be"], p["a1_rm"], p["a1_rv"], p["a1_b"])
    s2, sh2 = _bn_fold(p["a2_g"], p["a2_be"], p["a2_rm"], p["a2_rv"], p["a2_b"])
    wc = jnp.zeros((len(offsets), Cin, 2 * hid), f32)
    for t, dy, dx in taps1:
        wc = wc.at[oidx[(dy, dx)], :, :hid].set(p["a1_w"][t] * s1)
    for t, dy, dx in taps2:
        wc = wc.at[oidx[(dy, dx)], :, hid:].set(p["a2_w"][t] * s2)
    conv_shift = jnp.concatenate([sh1, sh2])[None, :]            # (1, 2*hid)

    # --- merge(1x1) + merge_bn + affine collapsed into one matmul ------------
    sm, shm = _bn_fold(p["m_g"], p["m_be"], p["m_rm"], p["m_rv"], p["m_b"])
    wma = (p["m_w"] * sm) @ p["aff_w"]                           # (2*hid, C)
    bma = shm @ p["aff_w"] + p["aff_b"]                          # (C,)
    pos = pos_emb_sin_2d(H, W, 2 * hid)                          # (N, 2*hid)
    posbias = pos @ wma + bma                                    # (N, C) exact fold

    # --- LayerNorm gamma/beta folded into the following linear layers --------
    wqkv = jnp.concatenate([p["wq"], p["wk"], p["wv"]], axis=1)  # (C, 3C)
    bqkv = jnp.concatenate([p["bq"], p["bk"], p["bv"]])          # (3C,)
    wqkv_f = p["ln1_g"][:, None] * wqkv
    bqkv_f = (p["ln1_b"] @ wqkv + bqkv)[None, :]                 # (1, 3C)
    w1_f = p["ln2_g"][:, None] * p["mlp_w1"]
    b1_f = p["ln2_b"] @ p["mlp_w1"] + p["mlp_b1"]
    bias3 = jnp.stack([p["bo"], b1_f, p["mlp_b2"]], axis=0)      # (3, C)

    return dict(
        wc=wc.astype(MXU_DTYPE),
        csh=conv_shift.astype(f32),
        posbias=posbias.astype(f32),
        wma=wma.astype(MXU_DTYPE),
        wqkv=wqkv_f.astype(MXU_DTYPE),
        bqkv=bqkv_f.astype(f32),
        wo=p["wo"].astype(MXU_DTYPE),
        w1=w1_f.astype(MXU_DTYPE),
        w2=p["mlp_w2"].astype(MXU_DTYPE),
        bias3=bias3.astype(f32),
    )


# -----------------------------------------------------------------------------
# Fused kernel: dilated convs + BN + ReLU + full token chain
# -----------------------------------------------------------------------------
def struct_branch_kernel(x_ref, wc_ref, csh_ref, posb_ref, wma_ref,
                         wqkv_ref, bqkv_ref, wo_ref, w1_ref, w2_ref, b3_ref,
                         o_ref, xpad_sc, *,
                         H, W, Cin, C, hid2, offsets, pad_y, pad_x):
    f32 = jnp.float32
    N = H * W

    # ---- build padded image in VMEM (halo zeros), no XLA-side pad ----------
    xpad_sc[...] = jnp.zeros_like(xpad_sc)
    xpad_sc[pad_y:pad_y + H, pad_x:pad_x + W, :] = x_ref[0]

    # ---- dual dilated 3x3 conv: per-offset accumulate matmuls --------------
    feats = jnp.zeros((N, hid2), f32)
    for i, (dy, dx) in enumerate(offsets):
        y0, x0 = pad_y + dy, pad_x + dx
        patch = xpad_sc[y0:y0 + H, x0:x0 + W, :].reshape(N, Cin).astype(MXU_DTYPE)
        feats = feats + jnp.dot(patch, wc_ref[i], preferred_element_type=f32)
    feats = jnp.maximum(feats + csh_ref[...], 0.0)   # BN (scale in wc) + ReLU

    # ---- +pos, merge(1x1)+merge_bn, affine: one collapsed matmul -----------
    a = jnp.dot(feats.astype(MXU_DTYPE), wma_ref[...],
                preferred_element_type=f32) + posb_ref[...]

    # ---- transformer unit: pre-norm, fused QKV, elu+1 linear attention -----
    # TODO(synk): LinearTransformerUnit / LinearAttention not in snippet;
    # standard single-head pre-norm block with mlp_ratio=1 assumed.
    mu = jnp.mean(a, axis=-1, keepdims=True)
    var = jnp.mean((a - mu) ** 2, axis=-1, keepdims=True)
    an = (a - mu) * jax.lax.rsqrt(var + 1e-5)        # LN1 gamma/beta folded in wqkv
    qkv = jnp.dot(an.astype(MXU_DTYPE), wqkv_ref[...],
                  preferred_element_type=f32) + bqkv_ref[...]          # (N, 3C)
    q, k, v = qkv[:, :C], qkv[:, C:2 * C], qkv[:, 2 * C:]
    qp = jnp.where(q > 0, q + 1.0, jnp.exp(q))                         # elu(q)+1
    kp = jnp.where(k > 0, k + 1.0, jnp.exp(k))                         # elu(k)+1
    kv = jax.lax.dot_general(kp.astype(MXU_DTYPE), v.astype(MXU_DTYPE),
                             (((0,), (0,)), ((), ())),
                             preferred_element_type=f32)               # (C, C)
    z = jnp.sum(kp, axis=0, keepdims=True)                             # (1, C)
    num = jnp.dot(qp.astype(MXU_DTYPE), kv.astype(MXU_DTYPE),
                  preferred_element_type=f32)                          # (N, C)
    den = jnp.sum(qp * z, axis=-1, keepdims=True) + 1e-6
    attn = num * pl.reciprocal(den, approx=True)
    h = a + jnp.dot(attn.astype(MXU_DTYPE), wo_ref[...],
                    preferred_element_type=f32) + b3_ref[0:1, :]       # residual

    # ---- pre-norm MLP (mlp_ratio=1) + residual ------------------------------
    mu2 = jnp.mean(h, axis=-1, keepdims=True)
    var2 = jnp.mean((h - mu2) ** 2, axis=-1, keepdims=True)
    hn = (h - mu2) * jax.lax.rsqrt(var2 + 1e-5)      # LN2 gamma/beta folded in w1
    hh = jnp.dot(hn.astype(MXU_DTYPE), w1_ref[...],
                 preferred_element_type=f32) + b3_ref[1:2, :]
    # TODO(synk): PyTorch nn.GELU default is exact erf; tanh approximation used.
    hh = jax.nn.gelu(hh, approximate=True)
    mlp = jnp.dot(hh.astype(MXU_DTYPE), w2_ref[...],
                  preferred_element_type=f32) + b3_ref[2:3, :]
    o_ref[0] = (h + mlp).astype(o_ref.dtype)


def _const_spec(a):
    idx = (0,) * a.ndim
    return pl.BlockSpec(a.shape, lambda b, _i=idx: _i)


def _fused_forward(x_nhwc, pp, offsets, pad_y, pad_x):
    B, H, W, Cin = x_nhwc.shape
    n_off, _, hid2 = pp["wc"].shape
    C = pp["wma"].shape[-1]
    N = H * W
    Hp, Wp = H + 2 * pad_y, W + 2 * pad_x

    kern = functools.partial(struct_branch_kernel, H=H, W=W, Cin=Cin, C=C,
                             hid2=hid2, offsets=tuple(offsets),
                             pad_y=pad_y, pad_x=pad_x)
    weights = (pp["wc"], pp["csh"], pp["posbias"], pp["wma"], pp["wqkv"],
               pp["bqkv"], pp["wo"], pp["w1"], pp["w2"], pp["bias3"])
    in_specs = [pl.BlockSpec((1, H, W, Cin), lambda b: (b, 0, 0, 0))] + \
               [_const_spec(a) for a in weights]
    return pl.pallas_call(
        kern,
        out_shape=jax.ShapeDtypeStruct((B, N, C), jnp.float32),
        grid=(B,),
        in_specs=in_specs,
        out_specs=pl.BlockSpec((1, N, C), lambda b: (b, 0, 0)),
        scratch_shapes=[pltpu.VMEM((Hp, Wp, Cin), jnp.float32)],
        compiler_params=pltpu.CompilerParams(
            dimension_semantics=("parallel",)),
    )(x_nhwc, *weights)


def struct_branch_forward(feat_nchw, prepared, dil1=6, dil2=12):
    B, C, H, W = feat_nchw.shape
    x = jnp.transpose(feat_nchw, (0, 2, 3, 1)).astype(jnp.float32)     # NHWC
    _, _, offsets, pad_y, pad_x = _conv_geometry(H, W, dil1, dil2)
    out = _fused_forward(x, prepared, offsets, pad_y, pad_x)           # (B, N, C)
    out = out.reshape(B, H, W, C)
    return jnp.transpose(out, (0, 3, 1, 2))                            # NCHW


# -----------------------------------------------------------------------------
# Synthetic parameters (raw, PyTorch-layout-ish); folded once by prepare_params
# -----------------------------------------------------------------------------
def init_params(key, in_planes, hid_planes):
    ks = iter(jax.random.split(key, 64))
    nrm = lambda shape, s=0.05: s * jax.random.normal(next(ks), shape, jnp.float32)
    unit = lambda n: 1.0 + 0.01 * jax.random.normal(next(ks), (n,), jnp.float32)

    p = {}
    for name in ("a1", "a2"):
        p[f"{name}_w"] = nrm((9, in_planes, hid_planes))      # taps (ky,kx) row-major
        p[f"{name}_b"] = nrm((hid_planes,))
        p[f"{name}_g"] = unit(hid_planes)
        p[f"{name}_be"] = nrm((hid_planes,))
        p[f"{name}_rm"] = nrm((hid_planes,))
        p[f"{name}_rv"] = jnp.abs(unit(hid_planes))
    p["m_w"] = nrm((2 * hid_planes, in_planes))
    p["m_b"] = nrm((in_planes,))
    p["m_g"] = unit(in_planes)
    p["m_be"] = nrm((in_planes,))
    p["m_rm"] = nrm((in_planes,))
    p["m_rv"] = jnp.abs(unit(in_planes))
    # affine transform (per-position linear)
    # TODO(synk): AffineTransform definition not in snippet; standard linear.
    p["aff_w"] = nrm((in_planes, in_planes))
    p["aff_b"] = nrm((in_planes,))
    # transformer unit (pre-norm, single-head elu+1 linear attention, mlp_ratio=1)
    p["ln1_g"] = unit(in_planes); p["ln1_b"] = nrm((in_planes,))
    for n in ("wq", "wk", "wv", "wo"):
        p[n] = nrm((in_planes, in_planes))
        p[n.replace("w", "b")] = nrm((in_planes,))
    p["ln2_g"] = unit(in_planes); p["ln2_b"] = nrm((in_planes,))
    p["mlp_w1"] = nrm((in_planes, in_planes)); p["mlp_b1"] = nrm((in_planes,))
    p["mlp_w2"] = nrm((in_planes, in_planes)); p["mlp_b2"] = nrm((in_planes,))
    return p


if __name__ == "__main__":
    B, IN_PLANES, HID_PLANES, H, W = 2, 128, 64, 8, 8
    key = jax.random.PRNGKey(0)
    k_feat, k_par = jax.random.split(key)
    feat = jax.random.normal(k_feat, (B, IN_PLANES, H, W), jnp.float32)
    params = init_params(k_par, IN_PLANES, HID_PLANES)

    # Hoisted one-time weight packing / BN folding / algebraic collapse.
    prepared = prepare_params(params, H, W)
    prepared = jax.tree_util.tree_map(jax.block_until_ready, prepared)

    fwd = jax.jit(struct_branch_forward)
    out = jax.block_until_ready(fwd(feat, prepared))
    assert out.shape == (B, IN_PLANES, H, W)
    assert bool(jnp.all(jnp.isfinite(out)))
    print("KERNEL_OK")
</pallas_src>

<mosaic_0001>
module attributes {stable_mosaic.version = 11 : i64} {
  func.func @struct_branch_kernel(%arg0: i32, %arg1: memref<1x8x8x128xf32, #tpu.memory_space<vmem>>, %arg2: memref<9x128x128xbf16, #tpu.memory_space<vmem>>, %arg3: memref<1x128xf32, #tpu.memory_space<vmem>>, %arg4: memref<64x128xf32, #tpu.memory_space<vmem>>, %arg5: memref<128x128xbf16, #tpu.memory_space<vmem>>, %arg6: memref<128x384xbf16, #tpu.memory_space<vmem>>, %arg7: memref<1x384xf32, #tpu.memory_space<vmem>>, %arg8: memref<128x128xbf16, #tpu.memory_space<vmem>>, %arg9: memref<128x128xbf16, #tpu.memory_space<vmem>>, %arg10: memref<128x128xbf16, #tpu.memory_space<vmem>>, %arg11: memref<3x128xf32, #tpu.memory_space<vmem>>, %arg12: memref<1x64x128xf32, #tpu.memory_space<vmem>>, %arg13: memref<20x20x128xf32, #tpu.memory_space<vmem>>) attributes {dimension_semantics = [#tpu.dimension_semantics<parallel>], iteration_bounds = array<i64: 2>, scalar_prefetch = 0 : i64, scratch_operands = 1 : i64, tpu.core_type = #tpu.core_type<tc>, window_params = [{transform_indices = @transform_0, window_bounds = array<i64: 1, 8, 8, 128>}, {pipeline_mode = #tpu.pipeline_mode<synchronous>, transform_indices = @transform_1, window_bounds = array<i64: 9, 128, 128>}, {pipeline_mode = #tpu.pipeline_mode<synchronous>, transform_indices = @transform_2, window_bounds = array<i64: 1, 128>}, {pipeline_mode = #tpu.pipeline_mode<synchronous>, transform_indices = @transform_3, window_bounds = array<i64: 64, 128>}, {pipeline_mode = #tpu.pipeline_mode<synchronous>, transform_indices = @transform_4, window_bounds = array<i64: 128, 128>}, {pipeline_mode = #tpu.pipeline_mode<synchronous>, transform_indices = @transform_5, window_bounds = array<i64: 128, 384>}, {pipeline_mode = #tpu.pipeline_mode<synchronous>, transform_indices = @transform_6, window_bounds = array<i64: 1, 384>}, {pipeline_mode = #tpu.pipeline_mode<synchronous>, transform_indices = @transform_7, window_bounds = array<i64: 128, 128>}, {pipeline_mode = #tpu.pipeline_mode<synchronous>, transform_indices = @transform_8, window_bounds = array<i64: 128, 128>}, {pipeline_mode = #tpu.pipeline_mode<synchronous>, transform_indices = @transform_9, window_bounds = array<i64: 128, 128>}, {pipeline_mode = #tpu.pipeline_mode<synchronous>, transform_indices = @transform_10, window_bounds = array<i64: 3, 128>}, {transform_indices = @transform_11, window_bounds = array<i64: 1, 64, 128>}]} {
    %cst = arith.constant 0.000000e+00 : f32
    %0 = vector.broadcast %cst : f32 to vector<20x20x128xf32>
    %c0 = arith.constant 0 : index
    %c0_0 = arith.constant 0 : index
    %c0_1 = arith.constant 0 : index
    %1 = vector.load %arg13[%c0, %c0_0, %c0_1] : memref<20x20x128xf32, #tpu.memory_space<vmem>>, vector<20x20x128xf32>
    tpu.vector_store %arg13[%c0, %c0_0, %c0_1], %0 {strides = array<i32>} : memref<20x20x128xf32, #tpu.memory_space<vmem>>, vector<20x20x128xf32>,
    %c0_2 = arith.constant 0 : index
    %c0_3 = arith.constant 0 : index
    %c0_4 = arith.constant 0 : index
    %c0_5 = arith.constant 0 : index
    %2 = vector.load %arg1[%c0_2, %c0_3, %c0_4, %c0_5] : memref<1x8x8x128xf32, #tpu.memory_space<vmem>>, vector<1x8x8x128xf32>
    %3 = vector.shape_cast %2 : vector<1x8x8x128xf32> to vector<8x8x128xf32>
    %c6 = arith.constant 6 : index
    %c6_6 = arith.constant 6 : index
    %c0_7 = arith.constant 0 : index
    %4 = vector.load %arg13[%c6, %c6_6, %c0_7] : memref<20x20x128xf32, #tpu.memory_space<vmem>>, vector<8x8x128xf32>
    tpu.vector_store %arg13[%c6, %c6_6, %c0_7], %3 {strides = array<i32>} : memref<20x20x128xf32, #tpu.memory_space<vmem>>, vector<8x8x128xf32>,
    %cst_8 = arith.constant 0.000000e+00 : f32
    %5 = vector.broadcast %cst_8 : f32 to vector<64x128xf32>
    %c0_9 = arith.constant 0 : index
    %c0_10 = arith.constant 0 : index
    %c0_11 = arith.constant 0 : index
    %6 = vector.load %arg13[%c0_9, %c0_10, %c0_11] : memref<20x20x128xf32, #tpu.memory_space<vmem>>, vector<8x8x128xf32>
    %7 = vector.shape_cast %6 : vector<8x8x128xf32> to vector<64x128xf32>
    %8 = arith.truncf %7 : vector<64x128xf32> to vector<64x128xbf16>
    %c0_12 = arith.constant 0 : index
    %c0_13 = arith.constant 0 : index
    %c0_14 = arith.constant 0 : index
    %9 = vector.load %arg2[%c0_12, %c0_13, %c0_14] : memref<9x128x128xbf16, #tpu.memory_space<vmem>>, vector<1x128x128xbf16>
    %10 = vector.shape_cast %9 : vector<1x128x128xbf16> to vector<128x128xbf16>
    %cst_15 = arith.constant dense<0.000000e+00> : vector<64x128xf32>
    %11 = tpu.matmul %8, %10, %cst_15 {dimension_numbers = #tpu.dot_dimension_numbers<[1], [0], [0], [1], [0, 0, 1, 1], [], []>} : vector<64x128xbf16>, vector<128x128xbf16>, vector<64x128xf32> -> vector<64x128xf32>
    %12 = arith.addf %5, %11 : vector<64x128xf32>
    %c0_16 = arith.constant 0 : index
    %c6_17 = arith.constant 6 : index
    %c0_18 = arith.constant 0 : index
    %13 = vector.load %arg13[%c0_16, %c6_17, %c0_18] : memref<20x20x128xf32, #tpu.memory_space<vmem>>, vector<8x8x128xf32>
    %14 = vector.shape_cast %13 : vector<8x8x128xf32> to vector<64x128xf32>
    %15 = arith.truncf %14 : vector<64x128xf32> to vector<64x128xbf16>
    %c1 = arith.constant 1 : index
    %c0_19 = arith.constant 0 : index
    %c0_20 = arith.constant 0 : index
    %16 = vector.load %arg2[%c1, %c0_19, %c0_20] : memref<9x128x128xbf16, #tpu.memory_space<vmem>>, vector<1x128x128xbf16>
    %17 = vector.shape_cast %16 : vector<1x128x128xbf16> to vector<128x128xbf16>
    %cst_21 = arith.constant dense<0.000000e+00> : vector<64x128xf32>
    %18 = tpu.matmul %15, %17, %cst_21 {dimension_numbers = #tpu.dot_dimension_numbers<[1], [0], [0], [1], [0, 0, 1, 1], [], []>} : vector<64x128xbf16>, vector<128x128xbf16>, vector<64x128xf32> -> vector<64x128xf32>
    %19 = arith.addf %12, %18 : vector<64x128xf32>
    %c0_22 = arith.constant 0 : index
    %c12 = arith.constant 12 : index
    %c0_23 = arith.constant 0 : index
    %20 = vector.load %arg13[%c0_22, %c12, %c0_23] : memref<20x20x128xf32, #tpu.memory_space<vmem>>, vector<8x8x128xf32>
    %21 = vector.shape_cast %20 : vector<8x8x128xf32> to vector<64x128xf32>
    %22 = arith.truncf %21 : vector<64x128xf32> to vector<64x128xbf16>
    %c2 = arith.constant 2 : index
    %c0_24 = arith.constant 0 : index
    %c0_25 = arith.constant 0 : index
    %23 = vector.load %arg2[%c2, %c0_24, %c0_25] : memref<9x128x128xbf16, #tpu.memory_space<vmem>>, vector<1x128x128xbf16>
    %24 = vector.shape_cast %23 : vector<1x128x128xbf16> to vector<128x128xbf16>
    %cst_26 = arith.constant dense<0.000000e+00> : vector<64x128xf32>
    %25 = tpu.matmul %22, %24, %cst_26 {dimension_numbers = #tpu.dot_dimension_numbers<[1], [0], [0], [1], [0, 0, 1, 1], [], []>} : vector<64x128xbf16>, vector<128x128xbf16>, vector<64x128xf32> -> vector<64x128xf32>
    %26 = arith.addf %19, %25 : vector<64x128xf32>
    %c6_27 = arith.constant 6 : index
    %c0_28 = arith.constant 0 : index
    %c0_29 = arith.constant 0 : index
    %27 = vector.load %arg13[%c6_27, %c0_28, %c0_29] : memref<20x20x128xf32, #tpu.memory_space<vmem>>, vector<8x8x128xf32>
    %28 = vector.shape_cast %27 : vector<8x8x128xf32> to vector<64x128xf32>
    %29 = arith.truncf %28 : vector<64x128xf32> to vector<64x128xbf16>
    %c3 = arith.constant 3 : index
    %c0_30 = arith.constant 0 : index
    %c0_31 = arith.constant 0 : index
    %30 = vector.load %arg2[%c3, %c0_30, %c0_31] : memref<9x128x128xbf16, #tpu.memory_space<vmem>>, vector<1x128x128xbf16>
    %31 = vector.shape_cast %30 : vector<1x128x128xbf16> to vector<128x128xbf16>
    %cst_32 = arith.constant dense<0.000000e+00> : vector<64x128xf32>
    %32 = tpu.matmul %29, %31, %cst_32 {dimension_numbers = #tpu.dot_dimension_numbers<[1], [0], [0], [1], [0, 0, 1, 1], [], []>} : vector<64x128xbf16>, vector<128x128xbf16>, vector<64x128xf32> -> vector<64x128xf32>
    %33 = arith.addf %26, %32 : vector<64x128xf32>
    %c6_33 = arith.constant 6 : index
    %c6_34 = arith.constant 6 : index
    %c0_35 = arith.constant 0 : index
    %34 = vector.load %arg13[%c6_33, %c6_34, %c0_35] : memref<20x20x128xf32, #tpu.memory_space<vmem>>, vector<8x8x128xf32>
    %35 = vector.shape_cast %34 : vector<8x8x128xf32> to vector<64x128xf32>
    %36 = arith.truncf %35 : vector<64x128xf32> to vector<64x128xbf16>
    %c4 = arith.constant 4 : index
    %c0_36 = arith.constant 0 : index
    %c0_37 = arith.constant 0 : index
    %37 = vector.load %arg2[%c4, %c0_36, %c0_37] : memref<9x128x128xbf16, #tpu.memory_space<vmem>>, vector<1x128x128xbf16>
    %38 = vector.shape_cast %37 : vector<1x128x128xbf16> to vector<128x128xbf16>
    %cst_38 = arith.constant dense<0.000000e+00> : vector<64x128xf32>
    %39 = tpu.matmul %36, %38, %cst_38 {dimension_numbers = #tpu.dot_dimension_numbers<[1], [0], [0], [1], [0, 0, 1, 1], [], []>} : vector<64x128xbf16>, vector<128x128xbf16>, vector<64x128xf32> -> vector<64x128xf32>
    %40 = arith.addf %33, %39 : vector<64x128xf32>
    %c6_39 = arith.constant 6 : index
    %c12_40 = arith.constant 12 : index
    %c0_41 = arith.constant 0 : index
    %41 = vector.load %arg13[%c6_39, %c12_40, %c0_41] : memref<20x20x128xf32, #tpu.memory_space<vmem>>, vector<8x8x128xf32>
    %42 = vector.shape_cast %41 : vector<8x8x128xf32> to vector<64x128xf32>
    %43 = arith.truncf %42 : vector<64x128xf32> to vector<64x128xbf16>
    %c5 = arith.constant 5 : index
    %c0_42 = arith.constant 0 : index
    %c0_43 = arith.constant 0 : index
    %44 = vector.load %arg2[%c5, %c0_42, %c0_43] : memref<9x128x128xbf16, #tpu.memory_space<vmem>>, vector<1x128x128xbf16>
    %45 = vector.shape_cast %44 : vector<1x128x128xbf16> to vector<128x128xbf16>
    %cst_44 = arith.constant dense<0.000000e+00> : vector<64x128xf32>
    %46 = tpu.matmul %43, %45, %cst_44 {dimension_numbers = #tpu.dot_dimension_numbers<[1], [0], [0], [1], [0, 0, 1, 1], [], []>} : vector<64x128xbf16>, vector<128x128xbf16>, vector<64x128xf32> -> vector<64x128xf32>
    %47 = arith.addf %40, %46 : vector<64x128xf32>
    %c12_45 = arith.constant 12 : index
    %c0_46 = arith.constant 0 : index
    %c0_47 = arith.constant 0 : index
    %48 = vector.load %arg13[%c12_45, %c0_46, %c0_47] : memref<20x20x128xf32, #tpu.memory_space<vmem>>, vector<8x8x128xf32>
    %49 = vector.shape_cast %48 : vector<8x8x128xf32> to vector<64x128xf32>
    %50 = arith.truncf %49 : vector<64x128xf32> to vector<64x128xbf16>
    %c6_48 = arith.constant 6 : index
    %c0_49 = arith.constant 0 : index
    %c0_50 = arith.constant 0 : index
    %51 = vector.load %arg2[%c6_48, %c0_49, %c0_50] : memref<9x128x128xbf16, #tpu.memory_space<vmem>>, vector<1x128x128xbf16>
    %52 = vector.shape_cast %51 : vector<1x128x128xbf16> to vector<128x128xbf16>
    %cst_51 = arith.constant dense<0.000000e+00> : vector<64x128xf32>
    %53 = tpu.matmul %50, %52, %cst_51 {dimension_numbers = #tpu.dot_dimension_numbers<[1], [0], [0], [1], [0, 0, 1, 1], [], []>} : vector<64x128xbf16>, vector<128x128xbf16>, vector<64x128xf32> -> vector<64x128xf32>
    %54 = arith.addf %47, %53 : vector<64x128xf32>
    %c12_52 = arith.constant 12 : index
    %c6_53 = arith.constant 6 : index
    %c0_54 = arith.constant 0 : index
    %55 = vector.load %arg13[%c12_52, %c6_53, %c0_54] : memref<20x20x128xf32, #tpu.memory_space<vmem>>, vector<8x8x128xf32>
    %56 = vector.shape_cast %55 : vector<8x8x128xf32> to vector<64x128xf32>
    %57 = arith.truncf %56 : vector<64x128xf32> to vector<64x128xbf16>
    %c7 = arith.constant 7 : index
    %c0_55 = arith.constant 0 : index
    %c0_56 = arith.constant 0 : index
    %58 = vector.load %arg2[%c7, %c0_55, %c0_56] : memref<9x128x128xbf16, #tpu.memory_space<vmem>>, vector<1x128x128xbf16>
    %59 = vector.shape_cast %58 : vector<1x128x128xbf16> to vector<128x128xbf16>
    %cst_57 = arith.constant dense<0.000000e+00> : vector<64x128xf32>
    %60 = tpu.matmul %57, %59, %cst_57 {dimension_numbers = #tpu.dot_dimension_numbers<[1], [0], [0], [1], [0, 0, 1, 1], [], []>} : vector<64x128xbf16>, vector<128x128xbf16>, vector<64x128xf32> -> vector<64x128xf32>
    %61 = arith.addf %54, %60 : vector<64x128xf32>
    %c12_58 = arith.constant 12 : index
    %c12_59 = arith.constant 12 : index
    %c0_60 = arith.constant 0 : index
    %62 = vector.load %arg13[%c12_58, %c12_59, %c0_60] : memref<20x20x128xf32, #tpu.memory_space<vmem>>, vector<8x8x128xf32>
    %63 = vector.shape_cast %62 : vector<8x8x128xf32> to vector<64x128xf32>
    %64 = arith.truncf %63 : vector<64x128xf32> to vector<64x128xbf16>
    %c8 = arith.constant 8 : index
    %c0_61 = arith.constant 0 : index
    %c0_62 = arith.constant 0 : index
    %65 = vector.load %arg2[%c8, %c0_61, %c0_62] : memref<9x128x128xbf16, #tpu.memory_space<vmem>>, vector<1x128x128xbf16>
    %66 = vector.shape_cast %65 : vector<1x128x128xbf16> to vector<128x128xbf16>
    %cst_63 = arith.constant dense<0.000000e+00> : vector<64x128xf32>
    %67 = tpu.matmul %64, %66, %cst_63 {dimension_numbers = #tpu.dot_dimension_numbers<[1], [0], [0], [1], [0, 0, 1, 1], [], []>} : vector<64x128xbf16>, vector<128x128xbf16>, vector<64x128xf32> -> vector<64x128xf32>
    %68 = arith.addf %61, %67 : vector<64x128xf32>
    %c0_64 = arith.constant 0 : index
    %c0_65 = arith.constant 0 : index
    %69 = vector.load %arg3[%c0_64, %c0_65] : memref<1x128xf32, #tpu.memory_space<vmem>>, vector<1x128xf32>
    %70 = vector.broadcast %69 : vector<1x128xf32> to vector<64x128xf32>
    %71 = arith.addf %68, %70 : vector<64x128xf32>
    %cst_66 = arith.constant 0.000000e+00 : f32
    %72 = vector.broadcast %cst_66 : f32 to vector<64x128xf32>
    %73 = arith.maximumf %71, %72 : vector<64x128xf32>
    %74 = arith.truncf %73 : vector<64x128xf32> to vector<64x128xbf16>
    %c0_67 = arith.constant 0 : index
    %c0_68 = arith.constant 0 : index
    %75 = vector.load %arg5[%c0_67, %c0_68] : memref<128x128xbf16, #tpu.memory_space<vmem>>, vector<128x128xbf16>
    %cst_69 = arith.constant dense<0.000000e+00> : vector<64x128xf32>
    %76 = tpu.matmul %74, %75, %cst_69 {dimension_numbers = #tpu.dot_dimension_numbers<[1], [0], [0], [1], [0, 0, 1, 1], [], []>} : vector<64x128xbf16>, vector<128x128xbf16>, vector<64x128xf32> -> vector<64x128xf32>
    %c0_70 = arith.constant 0 : index
    %c0_71 = arith.constant 0 : index
    %77 = vector.load %arg4[%c0_70, %c0_71] : memref<64x128xf32, #tpu.memory_space<vmem>>, vector<64x128xf32>
    %78 = arith.addf %76, %77 : vector<64x128xf32>
    %cst_72 = arith.constant dense<0.000000e+00> : vector<64xf32>
    %79 = vector.multi_reduction <add>, %78, %cst_72 [1] : vector<64x128xf32> to vector<64xf32>
    %80 = vector.shape_cast %79 : vector<64xf32> to vector<64x1xf32>
    %cst_73 = arith.constant 1.280000e+02 : f32
    %81 = vector.broadcast %cst_73 : f32 to vector<64x1xf32>
    %82 = arith.divf %80, %81 : vector<64x1xf32>
    %83 = vector.broadcast %82 : vector<64x1xf32> to vector<64x128xf32>
    %84 = arith.subf %78, %83 : vector<64x128xf32>
    %85 = arith.mulf %84, %84 : vector<64x128xf32>
    %cst_74 = arith.constant dense<0.000000e+00> : vector<64xf32>
    %86 = vector.multi_reduction <add>, %85, %cst_74 [1] : vector<64x128xf32> to vector<64xf32>
    %87 = vector.shape_cast %86 : vector<64xf32> to vector<64x1xf32>
    %cst_75 = arith.constant 1.280000e+02 : f32
    %88 = vector.broadcast %cst_75 : f32 to vector<64x1xf32>
    %89 = arith.divf %87, %88 : vector<64x1xf32>
    %90 = vector.broadcast %82 : vector<64x1xf32> to vector<64x128xf32>
    %91 = arith.subf %78, %90 : vector<64x128xf32>
    %cst_76 = arith.constant 9.99999974E-6 : f32
    %92 = vector.broadcast %cst_76 : f32 to vector<64x1xf32>
    %93 = arith.addf %89, %92 : vector<64x1xf32>
    %94 = math.rsqrt %93 : vector<64x1xf32>
    %95 = vector.broadcast %94 : vector<64x1xf32> to vector<64x128xf32>
    %96 = arith.mulf %91, %95 : vector<64x128xf32>
    %97 = arith.truncf %96 : vector<64x128xf32> to vector<64x128xbf16>
    %c0_77 = arith.constant 0 : index
    %c0_78 = arith.constant 0 : index
    %98 = vector.load %arg6[%c0_77, %c0_78] : memref<128x384xbf16, #tpu.memory_space<vmem>>, vector<128x384xbf16>
    %cst_79 = arith.constant dense<0.000000e+00> : vector<64x384xf32>
    %99 = tpu.matmul %97, %98, %cst_79 {dimension_numbers = #tpu.dot_dimension_numbers<[1], [0], [0], [1], [0, 0, 1, 1], [], []>} : vector<64x128xbf16>, vector<128x384xbf16>, vector<64x384xf32> -> vector<64x384xf32>
    %c0_80 = arith.constant 0 : index
    %c0_81 = arith.constant 0 : index
    %100 = vector.load %arg7[%c0_80, %c0_81] : memref<1x384xf32, #tpu.memory_space<vmem>>, vector<1x384xf32>
    %101 = vector.broadcast %100 : vector<1x384xf32> to vector<64x384xf32>
    %102 = arith.addf %99, %101 : vector<64x384xf32>
    %103 = vector.extract_strided_slice %102 {offsets = [0, 0], sizes = [64, 128], strides = [1, 1]} : vector<64x384xf32> to vector<64x128xf32>
    %104 = vector.extract_strided_slice %102 {offsets = [0, 128], sizes = [64, 128], strides = [1, 1]} : vector<64x384xf32> to vector<64x128xf32>
    %105 = vector.extract_strided_slice %102 {offsets = [0, 256], sizes = [64, 128], strides = [1, 1]} : vector<64x384xf32> to vector<64x128xf32>
    %cst_82 = arith.constant 0.000000e+00 : f32
    %106 = vector.broadcast %cst_82 : f32 to vector<64x128xf32>
    %107 = arith.cmpf ogt, %103, %106 : vector<64x128xf32>
    %cst_83 = arith.constant 1.000000e+00 : f32
    %108 = vector.broadcast %cst_83 : f32 to vector<64x128xf32>
    %109 = arith.addf %103, %108 : vector<64x128xf32>
    %110 = math.exp %103 : vector<64x128xf32>
    %111 = arith.select %107, %109, %110 : vector<64x128xi1>, vector<64x128xf32>
    %cst_84 = arith.constant 0.000000e+00 : f32
    %112 = vector.broadcast %cst_84 : f32 to vector<64x128xf32>
    %113 = arith.cmpf ogt, %104, %112 : vector<64x128xf32>
    %cst_85 = arith.constant 1.000000e+00 : f32
    %114 = vector.broadcast %cst_85 : f32 to vector<64x128xf32>
    %115 = arith.addf %104, %114 : vector<64x128xf32>
    %116 = math.exp %104 : vector<64x128xf32>
    %117 = arith.select %113, %115, %116 : vector<64x128xi1>, vector<64x128xf32>
    %118 = arith.truncf %117 : vector<64x128xf32> to vector<64x128xbf16>
    %119 = arith.truncf %105 : vector<64x128xf32> to vector<64x128xbf16>
    %cst_86 = arith.constant dense<0.000000e+00> : vector<128x128xf32>
    %120 = tpu.matmul %118, %119, %cst_86 {dimension_numbers = #tpu.dot_dimension_numbers<[0], [0], [1], [1], [0, 1, 1, 1], [], []>} : vector<64x128xbf16>, vector<64x128xbf16>, vector<128x128xf32> -> vector<128x128xf32>
    %cst_87 = arith.constant dense<0.000000e+00> : vector<128xf32>
    %121 = vector.multi_reduction <add>, %117, %cst_87 [0] : vector<64x128xf32> to vector<128xf32>
    %122 = vector.shape_cast %121 : vector<128xf32> to vector<1x128xf32>
    %123 = arith.truncf %111 : vector<64x128xf32> to vector<64x128xbf16>
    %124 = arith.truncf %120 : vector<128x128xf32> to vector<128x128xbf16>
    %cst_88 = arith.constant dense<0.000000e+00> : vector<64x128xf32>
    %125 = tpu.matmul %123, %124, %cst_88 {dimension_numbers = #tpu.dot_dimension_numbers<[1], [0], [0], [1], [0, 0, 1, 1], [], []>} : vector<64x128xbf16>, vector<128x128xbf16>, vector<64x128xf32> -> vector<64x128xf32>
    %126 = vector.broadcast %122 : vector<1x128xf32> to vector<64x128xf32>
    %127 = arith.mulf %111, %126 : vector<64x128xf32>
    %cst_89 = arith.constant dense<0.000000e+00> : vector<64xf32>
    %128 = vector.multi_reduction <add>, %127, %cst_89 [1] : vector<64x128xf32> to vector<64xf32>
    %129 = vector.shape_cast %128 : vector<64xf32> to vector<64x1xf32>
    %cst_90 = arith.constant 9.99999997E-7 : f32
    %130 = vector.broadcast %cst_90 : f32 to vector<64x1xf32>
    %131 = arith.addf %129, %130 : vector<64x1xf32>
    %132 = tpu.reciprocal %131 {approx = true} : vector<64x1xf32> -> vector<64x1xf32>
    %133 = vector.broadcast %132 : vector<64x1xf32> to vector<64x128xf32>
    %134 = arith.mulf %125, %133 : vector<64x128xf32>
    %135 = arith.truncf %134 : vector<64x128xf32> to vector<64x128xbf16>
    %c0_91 = arith.constant 0 : index
    %c0_92 = arith.constant 0 : index
    %136 = vector.load %arg8[%c0_91, %c0_92] : memref<128x128xbf16, #tpu.memory_space<vmem>>, vector<128x128xbf16>
    %cst_93 = arith.constant dense<0.000000e+00> : vector<64x128xf32>
    %137 = tpu.matmul %135, %136, %cst_93 {dimension_numbers = #tpu.dot_dimension_numbers<[1], [0], [0], [1], [0, 0, 1, 1], [], []>} : vector<64x128xbf16>, vector<128x128xbf16>, vector<64x128xf32> -> vector<64x128xf32>
    %138 = arith.addf %78, %137 : vector<64x128xf32>
    %c0_94 = arith.constant 0 : index
    %c0_95 = arith.constant 0 : index
    %139 = vector.load %arg11[%c0_94, %c0_95] : memref<3x128xf32, #tpu.memory_space<vmem>>, vector<1x128xf32>
    %140 = vector.broadcast %139 : vector<1x128xf32> to vector<64x128xf32>
    %141 = arith.addf %138, %140 : vector<64x128xf32>
    %cst_96 = arith.constant dense<0.000000e+00> : vector<64xf32>
    %142 = vector.multi_reduction <add>, %141, %cst_96 [1] : vector<64x128xf32> to vector<64xf32>
    %143 = vector.shape_cast %142 : vector<64xf32> to vector<64x1xf32>
    %cst_97 = arith.constant 1.280000e+02 : f32
    %144 = vector.broadcast %cst_97 : f32 to vector<64x1xf32>
    %145 = arith.divf %143, %144 : vector<64x1xf32>
    %146 = vector.broadcast %145 : vector<64x1xf32> to vector<64x128xf32>
    %147 = arith.subf %141, %146 : vector<64x128xf32>
    %148 = arith.mulf %147, %147 : vector<64x128xf32>
    %cst_98 = arith.constant dense<0.000000e+00> : vector<64xf32>
    %149 = vector.multi_reduction <add>, %148, %cst_98 [1] : vector<64x128xf32> to vector<64xf32>
    %150 = vector.shape_cast %149 : vector<64xf32> to vector<64x1xf32>
    %cst_99 = arith.constant 1.280000e+02 : f32
    %151 = vector.broadcast %cst_99 : f32 to vector<64x1xf32>
    %152 = arith.divf %150, %151 : vector<64x1xf32>
    %153 = vector.broadcast %145 : vector<64x1xf32> to vector<64x128xf32>
    %154 = arith.subf %141, %153 : vector<64x128xf32>
    %cst_100 = arith.constant 9.99999974E-6 : f32
    %155 = vector.broadcast %cst_100 : f32 to vector<64x1xf32>
    %156 = arith.addf %152, %155 : vector<64x1xf32>
    %157 = math.rsqrt %156 : vector<64x1xf32>
    %158 = vector.broadcast %157 : vector<64x1xf32> to vector<64x128xf32>
    %159 = arith.mulf %154, %158 : vector<64x128xf32>
    %160 = arith.truncf %159 : vector<64x128xf32> to vector<64x128xbf16>
    %c0_101 = arith.constant 0 : index
    %c0_102 = arith.constant 0 : index
    %161 = vector.load %arg9[%c0_101, %c0_102] : memref<128x128xbf16, #tpu.memory_space<vmem>>, vector<128x128xbf16>
    %cst_103 = arith.constant dense<0.000000e+00> : vector<64x128xf32>
    %162 = tpu.matmul %160, %161, %cst_103 {dimension_numbers = #tpu.dot_dimension_numbers<[1], [0], [0], [1], [0, 0, 1, 1], [], []>} : vector<64x128xbf16>, vector<128x128xbf16>, vector<64x128xf32> -> vector<64x128xf32>
    %c1_104 = arith.constant 1 : index
    %c0_105 = arith.constant 0 : index
    %163 = vector.load %arg11[%c1_104, %c0_105] : memref<3x128xf32, #tpu.memory_space<vmem>>, vector<1x128xf32>
    %164 = vector.broadcast %163 : vector<1x128xf32> to vector<64x128xf32>
    %165 = arith.addf %162, %164 : vector<64x128xf32>
    %166 = arith.mulf %165, %165 : vector<64x128xf32>
    %167 = arith.mulf %165, %166 : vector<64x128xf32>
    %cst_106 = arith.constant 4.471500e-02 : f32
    %168 = vector.broadcast %cst_106 : f32 to vector<64x128xf32>
    %169 = arith.mulf %168, %167 : vector<64x128xf32>
    %170 = arith.addf %165, %169 : vector<64x128xf32>
    %cst_107 = arith.constant 0.797884583 : f32
    %171 = vector.broadcast %cst_107 : f32 to vector<64x128xf32>
    %172 = arith.mulf %171, %170 : vector<64x128xf32>
    %173 = math.tanh %172 : vector<64x128xf32>
    %cst_108 = arith.constant 1.000000e+00 : f32
    %174 = vector.broadcast %cst_108 : f32 to vector<64x128xf32>
    %175 = arith.addf %174, %173 : vector<64x128xf32>
    %cst_109 = arith.constant 5.000000e-01 : f32
    %176 = vector.broadcast %cst_109 : f32 to vector<64x128xf32>
    %177 = arith.mulf %176, %175 : vector<64x128xf32>
    %178 = arith.mulf %165, %177 : vector<64x128xf32>
    %179 = arith.truncf %178 : vector<64x128xf32> to vector<64x128xbf16>
    %c0_110 = arith.constant 0 : index
    %c0_111 = arith.constant 0 : index
    %180 = vector.load %arg10[%c0_110, %c0_111] : memref<128x128xbf16, #tpu.memory_space<vmem>>, vector<128x128xbf16>
    %cst_112 = arith.constant dense<0.000000e+00> : vector<64x128xf32>
    %181 = tpu.matmul %179, %180, %cst_112 {dimension_numbers = #tpu.dot_dimension_numbers<[1], [0], [0], [1], [0, 0, 1, 1], [], []>} : vector<64x128xbf16>, vector<128x128xbf16>, vector<64x128xf32> -> vector<64x128xf32>
    %c2_113 = arith.constant 2 : index
    %c0_114 = arith.constant 0 : index
    %182 = vector.load %arg11[%c2_113, %c0_114] : memref<3x128xf32, #tpu.memory_space<vmem>>, vector<1x128xf32>
    %183 = vector.broadcast %182 : vector<1x128xf32> to vector<64x128xf32>
    %184 = arith.addf %181, %183 : vector<64x128xf32>
    %185 = arith.addf %141, %184 : vector<64x128xf32>
    %c0_115 = arith.constant 0 : index
    %c0_116 = arith.constant 0 : index
    %c0_117 = arith.constant 0 : index
    %186 = vector.load %arg12[%c0_115, %c0_116, %c0_117] : memref<1x64x128xf32, #tpu.memory_space<vmem>>, vector<1x64x128xf32>
    %187 = vector.shape_cast %186 : vector<1x64x128xf32> to vector<64x128xf32>
    %188 = vector.shape_cast %185 : vector<64x128xf32> to vector<1x64x128xf32>
    tpu.vector_store %arg12[%c0_115, %c0_116, %c0_117], %188 {strides = array<i32>} : memref<1x64x128xf32, #tpu.memory_space<vmem>>, vector<1x64x128xf32>,
    return
  }
  func.func @transform_0(%arg0: i32) -> (i32, i32, i32, i32) {
    %c0_i32 = arith.constant 0 : i32
    %c0_i32_0 = arith.constant 0 : i32
    %c0_i32_1 = arith.constant 0 : i32
    %c0_i32_2 = arith.constant 0 : i32
    return %arg0, %c0_i32, %c0_i32_0, %c0_i32_1 : i32, i32, i32, i32
  }
  func.func @transform_1(%arg0: i32) -> (i32, i32, i32) {
    %c0_i32 = arith.constant 0 : i32
    %c0_i32_0 = arith.constant 0 : i32
    %c0_i32_1 = arith.constant 0 : i32
    %c0_i32_2 = arith.constant 0 : i32
    return %c0_i32, %c0_i32_0, %c0_i32_1 : i32, i32, i32
  }
  func.func @transform_2(%arg0: i32) -> (i32, i32) {
    %c0_i32 = arith.constant 0 : i32
    %c0_i32_0 = arith.constant 0 : i32
    %c0_i32_1 = arith.constant 0 : i32
    return %c0_i32, %c0_i32_0 : i32, i32
  }
  func.func @transform_3(%arg0: i32) -> (i32, i32) {
    %c0_i32 = arith.constant 0 : i32
    %c0_i32_0 = arith.constant 0 : i32
    %c0_i32_1 = arith.constant 0 : i32
    return %c0_i32, %c0_i32_0 : i32, i32
  }
  func.func @transform_4(%arg0: i32) -> (i32, i32) {
    %c0_i32 = arith.constant 0 : i32
    %c0_i32_0 = arith.constant 0 : i32
    %c0_i32_1 = arith.constant 0 : i32
    return %c0_i32, %c0_i32_0 : i32, i32
  }
  func.func @transform_5(%arg0: i32) -> (i32, i32) {
    %c0_i32 = arith.constant 0 : i32
    %c0_i32_0 = arith.constant 0 : i32
    %c0_i32_1 = arith.constant 0 : i32
    return %c0_i32, %c0_i32_0 : i32, i32
  }
  func.func @transform_6(%arg0: i32) -> (i32, i32) {
    %c0_i32 = arith.constant 0 : i32
    %c0_i32_0 = arith.constant 0 : i32
    %c0_i32_1 = arith.constant 0 : i32
    return %c0_i32, %c0_i32_0 : i32, i32
  }
  func.func @transform_7(%arg0: i32) -> (i32, i32) {
    %c0_i32 = arith.constant 0 : i32
    %c0_i32_0 = arith.constant 0 : i32
    %c0_i32_1 = arith.constant 0 : i32
    return %c0_i32, %c0_i32_0 : i32, i32
  }
  func.func @transform_8(%arg0: i32) -> (i32, i32) {
    %c0_i32 = arith.constant 0 : i32
    %c0_i32_0 = arith.constant 0 : i32
    %c0_i32_1 = arith.constant 0 : i32
    return %c0_i32, %c0_i32_0 : i32, i32
  }
  func.func @transform_9(%arg0: i32) -> (i32, i32) {
    %c0_i32 = arith.constant 0 : i32
    %c0_i32_0 = arith.constant 0 : i32
    %c0_i32_1 = arith.constant 0 : i32
    return %c0_i32, %c0_i32_0 : i32, i32
  }
  func.func @transform_10(%arg0: i32) -> (i32, i32) {
    %c0_i32 = arith.constant 0 : i32
    %c0_i32_0 = arith.constant 0 : i32
    %c0_i32_1 = arith.constant 0 : i32
    return %c0_i32, %c0_i32_0 : i32, i32
  }
  func.func @transform_11(%arg0: i32) -> (i32, i32, i32) {
    %c0_i32 = arith.constant 0 : i32
    %c0_i32_0 = arith.constant 0 : i32
    %c0_i32_1 = arith.constant 0 : i32
    return %arg0, %c0_i32, %c0_i32_0 : i32, i32, i32
  }
}

</mosaic_0001>

<bundles_post_ra>
// kernel: struct_branch_forward.1
= control target key start
LH: loop header
LB: loop body
LE: loop exit
PB: predicated region body
PF: predicated region fallthrough
CT: control target
= control target key end

     0   :  { %s5971_s0 = inlined_call_operand.hbm [shape: f32[2,8,8,128], index: 0, kind: input, shape index: {}]   ;;  %s5972_s1 = inlined_call_operand.hbm [shape: bf16[9,128,128], index: 1, kind: input, shape index: {}]   ;;  %s5973_s2 = inlined_call_operand.vmem [shape: f32[1,128], index: 2, kind: input, shape index: {}]   ;;  %s5974_s3 = inlined_call_operand.hbm [shape: f32[64,128], index: 3, kind: input, shape index: {}]   ;;  %s5975_s4 = inlined_call_operand.hbm [shape: bf16[128,128], index: 4, kind: input, shape index: {}]   ;;  %s5976_s5 = inlined_call_operand.hbm [shape: bf16[128,384], index: 5, kind: input, shape index: {}]   ;;  %s5977_s6 = inlined_call_operand.vmem [shape: f32[1,384], index: 6, kind: input, shape index: {}]   ;;  %s5978_s7 = inlined_call_operand.hbm [shape: bf16[128,128], index: 7, kind: input, shape index: {}]   ;;  %s5979_s8 = inlined_call_operand.hbm [shape: bf16[128,128], index: 8, kind: input, shape index: {}]   ;;  %s5980_s9 = inlined_call_operand.hbm [shape: bf16[128,128], index: 9, kind: input, shape index: {}]   ;;  %s5981_s10 = inlined_call_operand.vmem [shape: f32[3,128], index: 10, kind: input, shape index: {}]   ;;  %s5982_s11 = inlined_call_operand.hbm [shape: f32[2,64,128], index: 11, kind: output, shape index: {}]  }
   0x1   :  { %5994 = sst [smem:[#allocation24_spill]] %s5972_s1 }
   0x2   :  { %5995 = sst [smem:[#allocation25_spill]] %s5974_s3 }
   0x3   :  { %5996 = sst [smem:[#allocation26_spill]] %s5977_s6 }
   0x4   :  { %5997 = sst [smem:[#allocation27_spill]] %s5981_s10 }
   0x5   :  { %5998 = sst [smem:[#allocation28_spill]] %s5982_s11 }
   0x6   :  { %16 = vsyncpa [#allocation4], 0 }
   0x7   :  { %18 = vsyncpa [#allocation4 + $0x1], 0 }
   0x8   :  { %19 = vsyncpa [#allocation7], 0 }
   0x9   :  { %20 = vsyncpa [#allocation10], 0 }
   0xa   :  { %21 = vsyncpa [#allocation13], 0 }
   0xb   :  { %22 = vsyncpa [#allocation16], 0 }
   0xc   :  { %23 = vsyncpa [#allocation5], 0 }
   0xd   :  { %25 = vsyncpa [#allocation5 + $0x1], 0  ;;  %s5174_s17 = smov 0   ;;  %s5176_s18 = smov 0  }
   0xe   :  { %s5178_s19 = smov 0   ;;  %s5180_s20 = smov 0  }
   0xf LB: > { %s5094_s21 = smov [#allocation6]   ;;  %s5195_s23 = sadd.s32 4294967295, %s5092_s20   ;;  %s5092_s20 = sphi %s5180_s20, %s6031_s20   ;;  %s5088_s19 = sphi %s5178_s19, %s6030_s19   ;;  %s5084_s18 = sphi %s5176_s18, %s6029_s18   ;;  %s5080_s17 = sphi %s5174_s17, %s6028_s17  }
  0x10   : > { %s310_s22 = sshll.u32 %s5094_s21, 4  ;;  %p3616_p0 = scmp.ge.s32.totalorder %s5092_s20, 1  ;;  %s5200_s22 = int_to_ptr.vmem [resolvable:$true] %s310_s22 }
  0x11   : > { %p5985_p1 = scmp.eq.s32.totalorder %s5195_s23, 0  ;;  %p298_p2 = scmp.lt.s32.totalorder %s5092_s20, 3 }
  0x12   : > { %s5095_s25 = smov [#allocation9]   ;;  %s5096_s28 = smov [#allocation12]  }
  0x13   : > { %p5202_p3 = pnand %p3616_p0, %p298_p2  ;;  %s339_s26 = sshll.u32 %s5095_s25, 4  ;;  %s5215_s26 = int_to_ptr.vmem [resolvable:$true] %s339_s26 }
  0x14   : > { %s368_s29 = sshll.u32 %s5096_s28, 4  ;;  %s6001_s1 = sld [smem:[#allocation24_spill]]  ;;  %s5217_s29 = int_to_ptr.vmem [resolvable:$true] %s368_s29 }
  0x15   : > { %s5999_s24 = scalar_select %p5202_p3, 1, 0 }
  0x16   : > { %p4457_p5 = pneg %p5202_p3 }
  0x18   : > { %p5211_p6 = pnand %p4457_p5, %p5985_p1 }
  0x1a   : > { %s4784_s13 = scalar_lea.hbm %s6001_s1, 9216  ;;  %p5227_p8 = pneg %p5211_p6 }
  0x1b   : > { %p4785_p7 = scmp.ne.s32.totalorder %s6001_s1, %s4784_s13  ;;  %p4791_p11 = scmp.lt.u32.totalorder %s4784_s13, %s6001_s1 }
  0x1d   : > { %p4787_p9 = pnand %p5227_p8, %p4785_p7 }
  0x1f   : > { %p4788_p10 = pneg %p4787_p9 }
  0x21   : > { %p4793_p12 = pnand %p4791_p11, %p4788_p10 }
  0x23   : > { %4796 = shalt.err (!%p4793_p12)
}
  0x24   : > { %s4797_s28 = scalar_lea.vmem %s5200_s22, 9216  ;;  %p4805_p5 = scmp.lt.s32.totalorder %s5200_s22, %s5200_s22 }
  0x25   : > { %p4798_p13 = scmp.ne.s32.totalorder %s5200_s22, %s4797_s28  ;;  %p4806_p4 = scmp.lt.s32.totalorder %s4797_s28, %s4797_s28 }
  0x27   : > { %p4800_p0 = pnand %p4798_p13, %p5227_p8  ;;  %p4807_p7 = por %p4806_p4, %p4805_p5 }
  0x29   : > { %p4801_p2 = pneg %p4800_p0 }
  0x2b   : > { %p4808_p9 = pnand %p4807_p7, %p4801_p2 }
  0x2d   : > { %4811 = shalt.err (!%p4808_p9)
}
  0x2e   : > { %s5987_s30 = smov 64   ;;  %s5989_s12 = smov 4  }
  0x2f   : > { %4460 = dma.hbm_to_vmem [thread:$0]  (!%p5211_p6), %s6001_s1, 9216, %s5200_s22, [#allocation7], %s5987_s30, %s5987_s30, %s5989_s12  }
  0x30   : > { %s4812_s25 = scalar_lea.hbm %s5975_s4, 1024 }
  0x31   : > { %p4813_p4 = scmp.ne.s32.totalorder %s5975_s4, %s4812_s25  ;;  %p4819_p12 = scmp.lt.u32.totalorder %s4812_s25, %s5975_s4 }
  0x33   : > { %p4815_p10 = pnand %p4813_p4, %p5227_p8 }
  0x35   : > { %p4816_p11 = pneg %p4815_p10 }
  0x37   : > { %p4821_p13 = pnand %p4819_p12, %p4816_p11 }
  0x39   : > { %4824 = shalt.err (!%p4821_p13)
}
  0x3a   : > { %s4825_s22 = scalar_lea.vmem %s5215_s26, 1024  ;;  %p4833_p7 = scmp.lt.s32.totalorder %s5215_s26, %s5215_s26 }
  0x3b   : > { %p4826_p0 = scmp.ne.s32.totalorder %s5215_s26, %s4825_s22  ;;  %p4834_p9 = scmp.lt.s32.totalorder %s4825_s22, %s4825_s22 }
  0x3d   : > { %p4828_p2 = pnand %p4826_p0, %p5227_p8  ;;  %p4835_p4 = por %p4834_p9, %p4833_p7 }
  0x3f   : > { %p4829_p5 = pneg %p4828_p2 }
  0x41   : > { %p4836_p10 = pnand %p4835_p4, %p4829_p5 }
  0x43   : > { %4839 = shalt.err (!%p4836_p10)
}
  0x44   : > { %4466 = dma.hbm_to_vmem [thread:$0]  (!%p5211_p6), %s5975_s4, 1024, %s5215_s26, [#allocation10], %s5987_s30, %s5987_s30, %s5989_s12  }
  0x45   : > { %s4840_s14 = scalar_lea.hbm %s5978_s7, 1024 }
  0x46   : > { %p4841_p11 = scmp.ne.s32.totalorder %s5978_s7, %s4840_s14  ;;  %p4847_p0 = scmp.lt.u32.totalorder %s4840_s14, %s5978_s7 }
  0x48   : > { %p4843_p12 = pnand %p4841_p11, %p5227_p8 }
  0x4a   : > { %p4844_p13 = pneg %p4843_p12 }
  0x4c   : > { %p4849_p2 = pnand %p4847_p0, %p4844_p13 }
  0x4e   : > { %4852 = shalt.err (!%p4849_p2)
}
  0x4f   : > { %s4853_s26 = scalar_lea.vmem %s5217_s29, 1024  ;;  %p4861_p4 = scmp.lt.s32.totalorder %s5217_s29, %s5217_s29 }
  0x50   : > { %p4854_p5 = scmp.ne.s32.totalorder %s5217_s29, %s4853_s26  ;;  %p4862_p10 = scmp.lt.s32.totalorder %s4853_s26, %s4853_s26 }
  0x52   : > { %p4856_p7 = pnand %p4854_p5, %p5227_p8  ;;  %p4863_p11 = por %p4862_p10, %p4861_p4 }
  0x54   : > { %p4857_p9 = pneg %p4856_p7 }
  0x56   : > { %p4864_p12 = pnand %p4863_p11, %p4857_p9 }
  0x58   : > { %4867 = shalt.err (!%p4864_p12)
}
  0x59   : > { %4472 = dma.hbm_to_vmem [thread:$0]  (!%p5211_p6), %s5978_s7, 1024, %s5217_s29, [#allocation13], %s5987_s30, %s5987_s30, %s5989_s12  }
  0x5a   : > { %s5099_s10 = smov [#allocation8]   ;;  %s6003_s3 = sld [smem:[#allocation25_spill]] }
  0x5b   : > { %s326_s11 = sshll.u32 %s5099_s10, 4  ;;  %s327_s11 = int_to_ptr.vmem [resolvable:$true] %s326_s11 }
  0x60   : > { %s4868_s15 = scalar_lea.hbm %s6003_s3, 1024 }
  0x61   : > { %p4869_p13 = scmp.ne.s32.totalorder %s6003_s3, %s4868_s15  ;;  %p4875_p5 = scmp.lt.u32.totalorder %s4868_s15, %s6003_s3 }
  0x63   : > { %p4871_p0 = pnand %p4869_p13, %p5227_p8 }
  0x65   : > { %p4872_p2 = pneg %p4871_p0 }
  0x67   : > { %p4877_p7 = pnand %p4875_p5, %p4872_p2 }
  0x69   : > { %4880 = shalt.err (!%p4877_p7)
}
  0x6a   : > { %s4881_s29 = scalar_lea.vmem %s327_s11, 1024  ;;  %p4889_p11 = scmp.lt.s32.totalorder %s327_s11, %s327_s11 }
  0x6b   : > { %p4882_p9 = scmp.ne.s32.totalorder %s327_s11, %s4881_s29  ;;  %p4890_p12 = scmp.lt.s32.totalorder %s4881_s29, %s4881_s29 }
  0x6d   : > { %p4884_p4 = pnand %p4882_p9, %p5227_p8  ;;  %p4891_p1 = por %p4890_p12, %p4889_p11 }
  0x6f   : > { %p4885_p10 = pneg %p4884_p4 }
  0x71   : > { %p4892_p3 = pnand %p4891_p1, %p4885_p10 }
  0x73   : > { %4895 = shalt.err (!%p4892_p3)
}
  0x74   : > { %s5991_s22 = smov 128   ;;  %s5992_s6 = smov 8  }
  0x75   : > { %4463 = dma.hbm_to_vmem [thread:$0]  (!%p5211_p6), %s6003_s3, 1024, %s327_s11, [#allocation7], %s5991_s22, %s5991_s22, %s5992_s6  }
  0x76   : > { %s5102_s14 = smov [#allocation11]   ;;  %s4896_s28 = scalar_lea.hbm %s5976_s5, 3072 }
  0x77   : > { %s352_s15 = sshll.u32 %s5102_s14, 4  ;;  %p4897_p1 = scmp.ne.s32.totalorder %s5976_s5, %s4896_s28  ;;  %s353_s15 = int_to_ptr.vmem [resolvable:$true] %s352_s15 }
  0x78   : > { %p4903_p0 = scmp.lt.u32.totalorder %s4896_s28, %s5976_s5 }
  0x79   : > { %p4899_p3 = pnand %p4897_p1, %p5227_p8 }
  0x7b   : > { %p4900_p13 = pneg %p4899_p3 }
  0x7d   : > { %p4905_p2 = pnand %p4903_p0, %p4900_p13 }
  0x7f   : > { %4908 = shalt.err (!%p4905_p2)
}
  0x80   : > { %s4909_s11 = scalar_lea.vmem %s353_s15, 3072  ;;  %p4917_p4 = scmp.lt.s32.totalorder %s353_s15, %s353_s15 }
  0x81   : > { %p4910_p5 = scmp.ne.s32.totalorder %s353_s15, %s4909_s11  ;;  %p4918_p10 = scmp.lt.s32.totalorder %s4909_s11, %s4909_s11 }
  0x83   : > { %p4912_p7 = pnand %p4910_p5, %p5227_p8  ;;  %p4919_p11 = por %p4918_p10, %p4917_p4 }
  0x85   : > { %p4913_p9 = pneg %p4912_p7 }
  0x87   : > { %p4920_p12 = pnand %p4919_p11, %p4913_p9 }
  0x89   : > { %4923 = shalt.err (!%p4920_p12)
}
  0x8a   : > { %s5103_s10 = smov 192   ;;  %s5104_s13 = smov 12  }
  0x8b   : > { %4469 = dma.hbm_to_vmem [thread:$0]  (!%p5211_p6), %s5976_s5, 3072, %s353_s15, [#allocation10], %s5103_s10, %s5103_s10, %s5104_s13  }
  0x8c   : > { %s5105_s14 = smov [#allocation14]   ;;  %s5106_s25 = smov [#allocation15]  }
  0x8d   : > { %s381_s21 = sshll.u32 %s5105_s14, 4  ;;  %s394_s28 = sshll.u32 %s5106_s25, 4  ;;  %s382_s21 = int_to_ptr.vmem [resolvable:$true] %s381_s21  ;;  %s395_s28 = int_to_ptr.vmem [resolvable:$true] %s394_s28 }
  0x8e   : > { %s4924_s11 = scalar_lea.hbm %s5979_s8, 1024 }
  0x8f   : > { %p4925_p1 = scmp.ne.s32.totalorder %s5979_s8, %s4924_s11  ;;  %p4931_p0 = scmp.lt.u32.totalorder %s4924_s11, %s5979_s8 }
  0x91   : > { %p4927_p3 = pnand %p4925_p1, %p5227_p8 }
  0x93   : > { %p4928_p13 = pneg %p4927_p3 }
  0x95   : > { %p4933_p2 = pnand %p4931_p0, %p4928_p13 }
  0x97   : > { %4936 = shalt.err (!%p4933_p2)
}
  0x98   : > { %s4937_s15 = scalar_lea.vmem %s382_s21, 1024  ;;  %p4945_p4 = scmp.lt.s32.totalorder %s382_s21, %s382_s21 }
  0x99   : > { %p4938_p5 = scmp.ne.s32.totalorder %s382_s21, %s4937_s15  ;;  %p4946_p10 = scmp.lt.s32.totalorder %s4937_s15, %s4937_s15 }
  0x9b   : > { %p4940_p7 = pnand %p4938_p5, %p5227_p8  ;;  %p4947_p11 = por %p4946_p10, %p4945_p4 }
  0x9d   : > { %p4941_p9 = pneg %p4940_p7 }
  0x9f   : > { %p4948_p12 = pnand %p4947_p11, %p4941_p9 }
  0xa1   : > { %4951 = shalt.err (!%p4948_p12)
}
  0xa2   : > { %s6004_s22 = smov 4   ;;  %s6005_s6 = smov 64  }
  0xa3   : > { %4475 = dma.hbm_to_vmem [thread:$0]  (!%p5211_p6), %s5979_s8, 1024, %s382_s21, [#allocation13], %s6005_s6, %s6005_s6, %s6004_s22  }
  0xa4   : > { %s4952_s30 = scalar_lea.hbm %s5980_s9, 1024 }
  0xa5   : > { %p4953_p1 = scmp.ne.s32.totalorder %s5980_s9, %s4952_s30  ;;  %p4959_p0 = scmp.lt.u32.totalorder %s4952_s30, %s5980_s9 }
  0xa7   : > { %p4955_p3 = pnand %p4953_p1, %p5227_p8 }
  0xa9   : > { %p4956_p13 = pneg %p4955_p3 }
  0xab   : > { %p4961_p2 = pnand %p4959_p0, %p4956_p13 }
  0xad   : > { %4964 = shalt.err (!%p4961_p2)
}
  0xae   : > { %s4965_s29 = scalar_lea.vmem %s395_s28, 1024  ;;  %p4973_p4 = scmp.lt.s32.totalorder %s395_s28, %s395_s28 }
  0xaf   : > { %p4966_p5 = scmp.ne.s32.totalorder %s395_s28, %s4965_s29  ;;  %p4974_p10 = scmp.lt.s32.totalorder %s4965_s29, %s4965_s29 }
  0xb1   : > { %p4968_p7 = pnand %p4966_p5, %p5227_p8  ;;  %p4975_p11 = por %p4974_p10, %p4973_p4 }
  0xb3   : > { %p4969_p9 = pneg %p4968_p7 }
  0xb5   : > { %p4976_p12 = pnand %p4975_p11, %p4969_p9 }
  0xb7   : > { %4979 = shalt.err (!%p4976_p12)
}
  0xb8   : > { %4478 = dma.hbm_to_vmem [thread:$0]  (!%p5211_p6), %s5980_s9, 1024, %s395_s28, [#allocation16], %s6005_s6, %s6005_s6, %s6004_s22  }
  0xb9   : > { %s3615_s27 = sadd.s32 4294967294, %s5092_s20   ;;  %s5386_s16 = sadd.s32 1, %s5092_s20  }
  0xba   : > { %s38_s15 = sadd.s32 1, %s5088_s19  ;;  %s35_s1 = ssub.s32 %s5092_s20, %s5386_s16 }
  0xbb   : > { %p45_p8 = scmp.ne.s32.totalorder %s5088_s19, %s5084_s18  ;;  %p36_p1 = scmp.eq.s32.totalorder %s35_s1, 0 }
  0xbc   : > { %p46_p3 = scmp.eq.s32.totalorder %s5092_s20, 0  ;;  %p51_p13 = scmp.ne.s32.totalorder %s5084_s18, %s5080_s17 }
  0xbd   : > { %p285_p0 = scmp.eq.s32.totalorder %s5195_s23, 1  ;;  %p6006_p5 = scmp.eq.s32.totalorder %s5195_s23, 0 }
  0xbe   : > { %s5398_s3 = scalar_select %p36_p1, %s5088_s19, %s38_s15  }
  0xbf   : > { %p47_p2 = por %p46_p3, %p45_p8  ;;  %p5402_p7 = por %p6006_p5, %p51_p13 }
  0xc0   : > { %p5406_p6 = por %p285_p0, %p45_p8  ;;  %p291_p9 = scmp.eq.s32.totalorder %s3615_s27, 1 }
  0xc1   : > { %p4494_p4 = scmp.lt.s32.totalorder %s5092_s20, 2  ;;  %s411_s22 = sand.u32 1, %s5088_s19  }
  0xc2   : > { %s6008_s28 = scalar_select %p5406_p6, 1, 0 }
  0xc3   : > { %p5412_p10 = por %p291_p9, %p51_p13  ;;  %s3625_s13 = sshll.u32 %s411_s22, 6 }
  0xc4   : > { %s3783_s30 = sshll.u32 %s5092_s20, 10  ;;  %s415_s26 = scalar_lea.vmem [#allocation3], %s3625_s13 }
  0xc5   : > { %s6009_s6 = scalar_select %p5412_p10, 1, 0 }
  0xc6   : > { %s5420_s25 = scalar_lea.hbm %s5971_s0, %s3783_s30  ;;  %s422_s29 = sshll.u32 %s415_s26, 4  ;;  %s5426_s29 = int_to_ptr.vmem [resolvable:$true] %s422_s29 }
  0xc7   : > { %p5422_p11 = pnand %p4494_p4, %p47_p2  ;;  %s5428_s11 = scalar_lea.sflag [#allocation4], %s411_s22 }
  0xc8   : > { %s4980_s27 = scalar_lea.hbm %s5420_s25, 1024  ;;  %s4985_s13 = scalar_lea.hbm %s5971_s0, 2048 }
  0xc9   : > { %p4981_p12 = scmp.ne.s32.totalorder %s5420_s25, %s4980_s27  ;;  %p4982_p8 = pneg %p5422_p11 }
  0xca   : > { %p4986_p13 = scmp.lt.u32.totalorder %s5420_s25, %s5971_s0  ;;  %p4987_p0 = scmp.lt.u32.totalorder %s4985_s13, %s4980_s27 }
  0xcb   : > { %p4983_p1 = pnand %p4982_p8, %p4981_p12  ;;  %p4989_p5 = scmp.lt.u32.totalorder %s4980_s27, %s5420_s25 }
  0xcc   : > { %p4988_p2 = por %p4987_p0, %p4986_p13 }
  0xcd   : > { %p4984_p3 = pneg %p4983_p1 }
  0xce   : > { %p4990_p9 = por %p4989_p5, %p4988_p2 }
  0xd0   : > { %p4991_p4 = pnand %p4990_p9, %p4984_p3 }
  0xd2   : > { %4994 = shalt.err (!%p4991_p4)
}
  0xd3   : > { %s4995_s22 = scalar_lea.vmem %s5426_s29, 1024  ;;  %s5107_s14 = smov [#allocation3]  }
  0xd4   : > { %p4996_p12 = scmp.ne.s32.totalorder %s5426_s29, %s4995_s22  ;;  %s5000_s26 = sshll.u32 %s5107_s14, 4  ;;  %s5001_s26 = int_to_ptr.vmem [resolvable:$false] %s5000_s26 }
  0xd5   : > { %s5002_s15 = scalar_lea.vmem %s5001_s26, 2048  ;;  %p5003_p6 = scmp.lt.s32.totalorder %s5426_s29, %s5001_s26 }
  0xd6   : > { %p4998_p1 = pnand %p4996_p12, %p4982_p8  ;;  %p5004_p13 = scmp.lt.s32.totalorder %s5002_s15, %s4995_s22 }
  0xd8   : > { %p4999_p10 = pneg %p4998_p1  ;;  %p5005_p0 = por %p5004_p13, %p5003_p6 }
  0xda   : > { %p5006_p2 = pnand %p5005_p0, %p4999_p10 }
  0xdc   : > { %5009 = shalt.err (!%p5006_p2)
}
  0xdd   : > { %s6011_s27 = smov 8   ;;  %s6012_s1 = smov 128  }
  0xde   : > { %4482 = dma.hbm_to_vmem [thread:$0]  (!%p5422_p11), %s5420_s25, 1024, %s5426_s29, %s5428_s11, %s6012_s1, %s6012_s1, %s6011_s27  }
  0xdf   : > { %p6013_p8 = scmp.ne.s32.totalorder %s5999_s24, 0 }
  0xe0   : > { %s5462_s13 = sand.u32 (!%p6013_p8), 1, %s5084_s18  }
  0xe1   : > { %434 = sbr.rel (%p6013_p8) target bundleno = 3106 (0xc22), region = 64  ;;  %s3629_s30 = sshll.u32 (!%p6013_p8), %s5462_s13, 6 }
  0xe2   : > { %s437_s12 = scalar_lea.sflag (!%p6013_p8), [#allocation4], %s5462_s13  ;;  %s5468_s21 = scalar_lea.vmem (!%p6013_p8), [#allocation3], %s3629_s30 }
  0xe8   : > { %5055 = dma.done.wait (%p5402_p7), %s437_s12, 1024  }
  0xe9   : > { %5057 = vsyncadd (%p5402_p7), %s437_s12, 4294966272  ;;  %p6014_p6 = scmp.eq.s32.totalorder %s5195_s23, 0 }
  0xeb   : > { %5059 = dma.done.wait (%p6014_p6), [#allocation7], 10240   ;;  %p6015_p10 = pmov %p6014_p6 }
  0xec   : > { %p6016_p11 = pmov %p6014_p6 }
  0xed   : > { %5061 = vsyncadd (%p6015_p10), [#allocation7], 4294957056 }
  0xee   : > { %5063 = dma.done.wait (%p6016_p11), [#allocation10], 4096   ;;  %p6017_p3 = pmov %p6014_p6 }
  0xf0   : > { %5065 = vsyncadd (%p6017_p3), [#allocation10], 4294963200  ;;  %p6018_p5 = pmov %p6017_p3 }
  0xf1   : > { %p6019_p9 = pmov %p6017_p3 }
  0xf2   : > { %5067 = dma.done.wait (%p6018_p5), [#allocation13], 2048  }
  0xf3   : > { %5069 = vsyncadd (%p6019_p9), [#allocation13], 4294965248  ;;  %p6020_p7 = pmov %p6017_p3 }
  0xf4   : > { %p6021_p4 = pmov %p6017_p3 }
  0xf5   : > { %5071 = dma.done.wait (%p6020_p7), [#allocation16], 1024  }
  0xf6   : > { %5073 = vsyncadd (%p6021_p4), [#allocation16], 4294966272  ;;  %v5108_v0 = vmov 0.0   ;;  %v5109_v1 = vmov 0.0|0.0   ;;  %v4552_v2 = vld [vmem:[#allocation6] sm:$0xff]   ;;  %v4553_v3 = vld [vmem:[#allocation6 + $0x8] sm:$0xff]  }
  0xf7   : > { %508 = vst [vmem:[#allocation2] sm:$0xff] %v5108_v0  ;;  %511 = vst [vmem:[#allocation2 + $0x18] sm:$0xff] %v5108_v0  ;;  %4017 = vmatprep.mubr.bf16.mxu0 %v5109_v1  ;;  %4001 = vmatprep.subr.bf16.mxu0 %v4552_v2  ;;  %v4554_v4 = vld [vmem:[#allocation6 + $0x10] sm:$0xff]   ;;  %v4555_v5 = vld [vmem:[#allocation6 + $0x18] sm:$0xff]   ;;  %s6022_s11 = sld [smem:[#allocation26_spill]]  ;;  %s6023_s26 = sld [smem:[#allocation27_spill]] }
  0xf8   : > { %509 = vst [vmem:[#allocation2 + $0x8] sm:$0xff] %v5108_v0  ;;  %510 = vst [vmem:[#allocation2 + $0x10] sm:$0xf] %v5108_v0  ;;  %4002 = vmatpush3.bf16.msra.mxu0 %v4552_v2  ;;  %v4556_v6 = vld [vmem:[#allocation6 + $0x20] sm:$0xff]   ;;  %v569_v8 = vld [vmem:[%s5468_s21 + $0x8] sm:$0xff]  ;;  %s3784_s10 = sshll.u32 %s5195_s23, 10 }
  0xf9   : > { %512 = vst [vmem:[#allocation2 + $0x20] sm:$0xff] %v5108_v0  ;;  %513 = vst [vmem:[#allocation2 + $0x28] sm:$0xf] %v5108_v0  ;;  %4003 = vmatprep.subr.bf16.mxu0 %v4553_v3  ;;  %v568_v7 = vld [vmem:[%s5468_s21] sm:$0xff]  ;;  %v4557_v9 = vld [vmem:[#allocation6 + $0x28] sm:$0xff]   ;;  %s6024_s29 = sld [smem:[#allocation28_spill]] }
  0xfa   : > { %514 = vst [vmem:[#allocation2 + $0x30] sm:$0xff] %v5108_v0  ;;  %515 = vst [vmem:[#allocation2 + $0x38] sm:$0xff] %v5108_v0  ;;  %v5493_v10 = vpack.c.bf16 %v569_v8, %v568_v7  ;;  %v4558_v11 = vld [vmem:[#allocation6 + $0x30] sm:$0xff]   ;;  %v4559_v12 = vld [vmem:[#allocation6 + $0x38] sm:$0xff]   ;;  %p6025_p1 = scmp.ne.s32.totalorder %s6008_s28, 0  ;;  %s5111_s14 = smov [#allocation17]  }
  0xfb   : > { %516 = vst [vmem:[#allocation2 + $0x40] sm:$0xf] %v5108_v0  ;;  %517 = vst [vmem:[#allocation2 + $0x48] sm:$0xff] %v5108_v0  ;;  %v4560_v13 = vld [vmem:[#allocation6 + $0x80] sm:$0xff]   ;;  %v5496_v14 = vld [vmem:[%s5468_s21 + $0x10] sm:$0xff]  ;;  %s5014_s15 = sshll.u32 %s5111_s14, 4  ;;  %s5015_s15 = int_to_ptr.vmem [resolvable:$false] %s5014_s15 }
  0xfc   : > { %518 = vst [vmem:[#allocation2 + $0x50] sm:$0xff] %v5108_v0  ;;  %519 = vst [vmem:[#allocation2 + $0x58] sm:$0xf] %v5108_v0  ;;  %4004 = vmatpush3.bf16.msra.mxu0 %v4553_v3  ;;  %v5499_v15 = vld [vmem:[%s5468_s21 + $0x18] sm:$0xff]  ;;  %v4561_v17 = vld [vmem:[#allocation6 + $0x88] sm:$0xff]   ;;  %s5016_s27 = scalar_lea.vmem %s5015_s15, 2048 }
  0xfd   : > { %520 = vst [vmem:[#allocation2 + $0x60] sm:$0xff] %v5108_v0  ;;  %521 = vst [vmem:[#allocation2 + $0x68] sm:$0xff] %v5108_v0  ;;  %4005 = vmatprep.subr.bf16.mxu0 %v4554_v4  ;;  %v1177_v16 = vpack.c.bf16 %v5499_v15, %v5496_v14  ;;  %v4562_v19 = vld [vmem:[#allocation6 + $0x90] sm:$0xff]   ;;  %v5507_v22 = vld [vmem:[%s5468_s21 + $0x20] sm:$0xff] }
  0xfe   : > { %522 = vst [vmem:[#allocation2 + $0x70] sm:$0xf] %v5108_v0  ;;  %523 = vst [vmem:[#allocation2 + $0x78] sm:$0xff] %v5108_v0  ;;  %v5511_v23 = vld [vmem:[%s5468_s21 + $0x28] sm:$0xff]  ;;  %v574_v25 = vld [vmem:[%s5468_s21 + $0x30] sm:$0xff] }
  0xff   : > { %524 = vst [vmem:[#allocation2 + $0x80] sm:$0xff] %v5108_v0  ;;  %525 = vst [vmem:[#allocation2 + $0x88] sm:$0xf] %v5108_v0  ;;  %v868_v21 = vld [vmem:[#allocation2 + $0xc] sm:$0xff]  ;;  %v575_v26 = vld [vmem:[%s5468_s21 + $0x38] sm:$0xff]  ;;  %v1178_v27 = vpack.c.bf16 %v5511_v23, %v5507_v22  ;;  %s506_s21 = scalar_lea.vmem [#allocation17], %s3629_s30  ;;  %s5926_s23 = scalar_lea.hbm %s6024_s29, %s3784_s10 }
 0x100   : > { %526 = vst [vmem:[#allocation2 + $0x90] sm:$0xff] %v5108_v0  ;;  %527 = vst [vmem:[#allocation2 + $0x98] sm:$0xff] %v5108_v0  ;;  %4006 = vmatpush3.bf16.msra.mxu0 %v4554_v4  ;;  %v869_v24 = vld [vmem:[#allocation2 + $0x24] sm:$0xff]  ;;  %v5519_v28 = vpack.c.bf16 %v575_v26, %v574_v25  ;;  %v4563_v31 = vld [vmem:[#allocation6 + $0x98] sm:$0xff]   ;;  %s3475_s24 = sshll.u32 %s506_s21, 4  ;;  %s5919_s24 = int_to_ptr.vmem [resolvable:$true] %s3475_s24 }
 0x101   : > { %528 = vst [vmem:[#allocation2 + $0xa0] sm:$0xf] %v5108_v0  ;;  %529 = vst [vmem:[#allocation2 + $0xa8] sm:$0xff] %v5108_v0  ;;  %4007 = vmatprep.subr.bf16.mxu0 %v4555_v5  ;;  %v876_v30 = vpack.c.bf16 %v869_v24, %v868_v21  ;;  %v4564_v32 = vld [vmem:[#allocation6 + $0xa0] sm:$0xff]   ;;  %v4565_v33 = vld [vmem:[#allocation6 + $0xa8] sm:$0xff]   ;;  %s5010_s22 = scalar_lea.vmem %s5919_s24, 1024  ;;  %p5017_p2 = scmp.lt.s32.totalorder %s5919_s24, %s5015_s15 }
 0x102   : > { %530 = vst [vmem:[#allocation2 + $0xb0] sm:$0xff] %v5108_v0  ;;  %531 = vst [vmem:[#allocation2 + $0xb8] sm:$0xf] %v5108_v0  ;;  %v4566_v34 = vld [vmem:[#allocation6 + $0xb0] sm:$0xff]   ;;  %v4567_v35 = vld [vmem:[#allocation6 + $0xb8] sm:$0xff]   ;;  %p5011_p12 = scmp.ne.s32.totalorder %s5919_s24, %s5010_s22  ;;  %p5018_p8 = scmp.lt.s32.totalorder %s5016_s27, %s5010_s22 }
 0x103   : > { %532 = vst [vmem:[#allocation2 + $0xc0] sm:$0xff] %v5108_v0  ;;  %533 = vst [vmem:[#allocation2 + $0xc8] sm:$0xff] %v5108_v0  ;;  %v870_v36 = vld [vmem:[#allocation2 + $0x3c] sm:$0xff]  ;;  %v871_v37 = vld [vmem:[#allocation2 + $0x54] sm:$0xff] }
 0x104   : > { %534 = vst [vmem:[#allocation2 + $0xd0] sm:$0xf] %v5108_v0  ;;  %535 = vst [vmem:[#allocation2 + $0xd8] sm:$0xff] %v5108_v0  ;;  %4008 = vmatpush3.bf16.msra.mxu0 %v4555_v5  ;;  %v4568_v38 = vld [vmem:[#allocation6 + $0xc0] sm:$0xff]   ;;  %v877_v41 = vpack.c.bf16 %v871_v37, %v870_v36  ;;  %v4569_v42 = vld [vmem:[#allocation6 + $0xc8] sm:$0xff]   ;;  %p5012_p13 = pnand %p5011_p12, %p6025_p1  ;;  %p5019_p6 = por %p5018_p8, %p5017_p2 }
 0x105   : > { %536 = vst [vmem:[#allocation2 + $0xe0] sm:$0xff] %v5108_v0  ;;  %537 = vst [vmem:[#allocation2 + $0xe8] sm:$0xf] %v5108_v0  ;;  %4009 = vmatprep.subr.bf16.mxu0 %v4556_v6  ;;  %v872_v39 = vld [vmem:[#allocation2 + $0x6c] sm:$0xff]  ;;  %v4571_v48 = vld [vmem:[#allocation6 + $0xd8] sm:$0xff]  }
 0x106   : > { %538 = vst [vmem:[#allocation2 + $0xf0] sm:$0xff] %v5108_v0  ;;  %539 = vst [vmem:[#allocation2 + $0xf8] sm:$0xff] %v5108_v0  ;;  %v873_v40 = vld [vmem:[#allocation2 + $0x84] sm:$0xff]  ;;  %v4570_v45 = vld [vmem:[#allocation6 + $0xd0] sm:$0xff]   ;;  %p5013_p0 = pneg %p5012_p13 }
 0x107   : > { %540 = vst [vmem:[#allocation2 + $0x100] sm:$0xf] %v5108_v0  ;;  %541 = vst [vmem:[#allocation2 + $0x108] sm:$0xff] %v5108_v0  ;;  %v878_v43 = vpack.c.bf16 %v873_v40, %v872_v39  ;;  %v4572_v49 = vld [vmem:[#allocation6 + $0xe0] sm:$0xff]   ;;  %v4573_v50 = vld [vmem:[#allocation6 + $0xe8] sm:$0xff]  }
 0x108   : > { %542 = vst [vmem:[#allocation2 + $0x110] sm:$0xff] %v5108_v0  ;;  %543 = vst [vmem:[#allocation2 + $0x118] sm:$0xf] %v5108_v0  ;;  %4010 = vmatpush3.bf16.msra.mxu0 %v4556_v6  ;;  %v4574_v51 = vld [vmem:[#allocation6 + $0xf0] sm:$0xff]   ;;  %v4575_v52 = vld [vmem:[#allocation6 + $0xf8] sm:$0xff]   ;;  %p5020_p10 = pnand %p5019_p6, %p5013_p0 }
 0x109   : > { %544 = vst [vmem:[#allocation2 + $0x120] sm:$0xff] %v5108_v0  ;;  %545 = vst [vmem:[#allocation2 + $0x128] sm:$0xff] %v5108_v0  ;;  %4011 = vmatprep.subr.bf16.mxu0 %v4557_v9  ;;  %v4576_v55 = vld [vmem:[#allocation6 + $0x100] sm:$0xff]   ;;  %v4577_v61 = vld [vmem:[#allocation6 + $0x108] sm:$0xff]  }
 0x10a   : > { %546 = vst [vmem:[#allocation2 + $0x130] sm:$0xf] %v5108_v0  ;;  %547 = vst [vmem:[#allocation2 + $0x138] sm:$0xff] %v5108_v0  ;;  %v4608_v58 = vld [vmem:[#allocation6 + $0x40] sm:$0xff]   ;;  %v4610_v62 = vld [vmem:[#allocation6 + $0x48] sm:$0xff]  }
 0x10b   : > { %548 = vst [vmem:[#allocation2 + $0x140] sm:$0xff] %v5108_v0  ;;  %549 = vst [vmem:[#allocation2 + $0x148] sm:$0xf] %v5108_v0  ;;  %3977 = vmatprep.subr.bf16.mxu1 %v4608_v58  ;;  %v4612_v3 = vld [vmem:[#allocation6 + $0x50] sm:$0xff]   ;;  %v4579_v5 = vld [vmem:[#allocation6 + $0x118] sm:$0xff]  }
 0x10c   : > { %550 = vst [vmem:[#allocation2 + $0x150] sm:$0xff] %v5108_v0  ;;  %551 = vst [vmem:[#allocation2 + $0x158] sm:$0xff] %v5108_v0  ;;  %4012 = vmatpush3.bf16.msra.mxu0 %v4557_v9  ;;  %3978 = vmatpush3.bf16.msra.mxu1 %v4608_v58  ;;  %v4614_v6 = vld [vmem:[#allocation6 + $0x58] sm:$0xff]   ;;  %v4581_v9 = vld [vmem:[#allocation6 + $0x128] sm:$0xff]  }
 0x10d   : > { %552 = vst [vmem:[#allocation2 + $0x160] sm:$0xf] %v5108_v0  ;;  %553 = vst [vmem:[#allocation2 + $0x168] sm:$0xff] %v5108_v0  ;;  %4013 = vmatprep.subr.bf16.mxu0 %v4558_v11  ;;  %3979 = vmatprep.subr.bf16.mxu1 %v4610_v62  ;;  %v4584_v21 = vld [vmem:[#allocation6 + $0x140] sm:$0xff]   ;;  %v4591_v36 = vld [vmem:[#allocation6 + $0x178] sm:$0xff]  }
 0x10e   : > { %554 = vst [vmem:[#allocation2 + $0x170] sm:$0xff] %v5108_v0  ;;  %555 = vst [vmem:[#allocation2 + $0x178] sm:$0xf] %v5108_v0  ;;  %v4592_v39 = vld [vmem:[#allocation6 + $0x180] sm:$0xff]  }
 0x10f   : > { %556 = vst [vmem:[#allocation2 + $0x180] sm:$0xff] %v5108_v0  ;;  %557 = vst [vmem:[#allocation2 + $0x188] sm:$0xff] %v5108_v0  ;;  %v4604_v58 = vld [vmem:[#allocation6 + $0x1e0] sm:$0xff]  }
 0x110   : > { %558 = vst [vmem:[#allocation2 + $0x190] sm:$0xf] %v5108_v0  ;;  %559 = vst [vmem:[#allocation2 + $0x198] sm:$0xff] %v5108_v0  ;;  %4014 = vmatpush3.bf16.msra.mxu0 %v4558_v11  ;;  %3980 = vmatpush3.bf16.msra.mxu1 %v4610_v62  ;;  %v4618_v11 = vld [vmem:[#allocation6 + $0x68] sm:$0xff]   ;;  %v4607_v62 = vld [vmem:[#allocation6 + $0x1f8] sm:$0xff]  }
 0x111   : > { %560 = vst [vmem:[#allocation2 + $0x1a0] sm:$0xff] %v5108_v0  ;;  %561 = vst [vmem:[#allocation2 + $0x1a8] sm:$0xf] %v5108_v0  ;;  %4015 = vmatprep.subr.bf16.mxu0 %v4559_v12  ;;  %3981 = vmatprep.subr.bf16.mxu1 %v4612_v3 }
 0x112   : > { %562 = vst [vmem:[#allocation2 + $0x1b0] sm:$0xff] %v5108_v0  ;;  %563 = vst [vmem:[#allocation2 + $0x1b8] sm:$0xff] %v5108_v0 }
 0x113   : > { %564 = vst [vmem:[#allocation2 + $0x1c0] sm:$0xf] %v5108_v0  ;;  %565 = vst [vmem:[#allocation2 + $0x1c8] sm:$0xff] %v5108_v0 }
 0x114   : > { %566 = vst [vmem:[#allocation2 + $0x1d0] sm:$0xff] %v5108_v0  ;;  %567 = vst [vmem:[#allocation2 + $0x1d8] sm:$0xf] %v5108_v0  ;;  %4016 = vmatpush3.bf16.msra.mxu0 %v4559_v12  ;;  %v4578_v0 = vld [vmem:[#allocation6 + $0x110] sm:$0xff]   ;;  %3982 = vmatpush3.bf16.msra.mxu1 %v4612_v3 }
 0x115   : > { %577 = vst [vmem:[#allocation2 + $0x96] sm:$0xff] %v568_v7  ;;  %578 = vst [vmem:[#allocation2 + $0xae] sm:$0xff] %v569_v8  ;;  %4025 = vmatprep.subr.bf16.mxu0 %v4560_v13  ;;  %3983 = vmatprep.subr.bf16.mxu1 %v4614_v6  ;;  %v4580_v7 = vld [vmem:[#allocation6 + $0x120] sm:$0xff]   ;;  %v4582_v12 = vld [vmem:[#allocation6 + $0x130] sm:$0xff]  }
 0x116   : > { %579 = vst [vmem:[#allocation2 + $0xc6] sm:$0xff] %v5496_v14  ;;  %580 = vst [vmem:[#allocation2 + $0xde] sm:$0xff] %v5499_v15  ;;  %v4616_v8 = vld [vmem:[#allocation6 + $0x60] sm:$0xff]   ;;  %v4625_v15 = vld [vmem:[#allocation9 + $0x8] sm:$0xff]  }
 0x117   : > { %4018 = vmatmul.mubr.bf16.vlgmr.msra.gmra.mrb[0].mxu0 %v5109_v1  ;;  %581 = vst [vmem:[#allocation2 + $0xf6] sm:$0xff] %v5507_v22  ;;  %582 = vst [vmem:[#allocation2 + $0x10e] sm:$0xff] %v5511_v23  ;;  %v4624_v14 = vld [vmem:[#allocation9] sm:$0xff]   ;;  %v4626_v22 = vld [vmem:[#allocation9 + $0x10] sm:$0xff]  }
 0x118   : > { %4026 = vmatpush3.bf16.msra.mxu0 %v4560_v13  ;;  %4021 = vmatprep.mubr.bf16.mxu0 %v5109_v1  ;;  %583 = vst [vmem:[#allocation2 + $0x126] sm:$0xff] %v574_v25  ;;  %584 = vst [vmem:[#allocation2 + $0x13e] sm:$0xff] %v575_v26  ;;  %v4620_v13 = vld [vmem:[#allocation6 + $0x70] sm:$0xff]   ;;  %v4589_v23 = vld [vmem:[#allocation6 + $0x168] sm:$0xff]  }
 0x119   : > { %4027 = vmatprep.subr.bf16.mxu0 %v4561_v17  ;;  %3984 = vmatpush3.bf16.msra.mxu1 %v4614_v6  ;;  %v615_v25 = vld [vmem:[#allocation2 + $0x36] sm:$0xff]  ;;  %v616_v26 = vld [vmem:[#allocation2 + $0x4e] sm:$0xff] }
 0x11a   : > { %3985 = vmatprep.subr.bf16.mxu1 %v4616_v8  ;;  %v1625_v6 = vld [vmem:[#allocation2 + $0x1b6] sm:$0xff] }
 0x11c   : > { %v591_v18 = vld [vmem:[#allocation2 + $0x90] sm:$0xff]  ;;  %v592_v20 = vld [vmem:[#allocation2 + $0xa8] sm:$0xff]  ;;  %4028 = vmatpush3.bf16.msra.mxu0 %v4561_v17  ;;  %v874_v44 = vld [vmem:[#allocation2 + $0x9c] sm:$0xff] }
 0x11d   : > { %v596_v29 = vpack.c.bf16 %v592_v20, %v591_v18  ;;  %4029 = vmatprep.subr.bf16.mxu0 %v4562_v19  ;;  %v875_v46 = vld [vmem:[#allocation2 + $0xb4] sm:$0xff]  ;;  %v1020_v53 = vld [vmem:[#allocation2 + $0xc0] sm:$0xff]  ;;  %3986 = vmatpush3.bf16.msra.mxu1 %v4616_v8  ;;  %v1320_v37 = vld [vmem:[#allocation2 + $0xcc] sm:$0xff] }
 0x11e   : > { %v5521_v47 = vpack.c.bf16 %v875_v46, %v874_v44  ;;  %v1021_v54 = vld [vmem:[#allocation2 + $0xd8] sm:$0xff]  ;;  %v1022_v56 = vld [vmem:[#allocation2 + $0xf0] sm:$0xff]  ;;  %v1023_v57 = vld [vmem:[#allocation2 + $0x108] sm:$0xff]  ;;  %3987 = vmatprep.subr.bf16.mxu1 %v4618_v11 }
 0x11f   : > { %4022 = vmatmul.mubr.bf16.gmra.mrb[4].mxu0 %v596_v29  ;;  %v1027_v59 = vpack.c.bf16 %v1021_v54, %v1020_v53  ;;  %v1028_v60 = vpack.c.bf16 %v1023_v57, %v1022_v56  ;;  %v1024_v63 = vld [vmem:[#allocation2 + $0x120] sm:$0xff]  ;;  %v1025_v2 = vld [vmem:[#allocation2 + $0x138] sm:$0xff]  ;;  %v4593_v44 = vld [vmem:[#allocation6 + $0x188] sm:$0xff]  }
 0x120   : > { %4030 = vmatpush3.bf16.msra.mxu0 %v4562_v19  ;;  %4041 = vmatprep.mubr.bf16.mxu0 %v876_v30  ;;  %v5524_v4 = vpack.c.bf16 %v1025_v2, %v1024_v63  ;;  %v4583_v17 = vld [vmem:[#allocation6 + $0x138] sm:$0xff]   ;;  %v613_v19 = vld [vmem:[#allocation2 + $0x6] sm:$0xff]  ;;  %v4602_v56 = vld [vmem:[#allocation6 + $0x1d0] sm:$0xff]  }
 0x121   : > { %4031 = vmatprep.subr.bf16.mxu0 %v4563_v31  ;;  %3988 = vmatpush3.bf16.msra.mxu1 %v4618_v11  ;;  %v4622_v18 = vld [vmem:[#allocation6 + $0x78] sm:$0xff]   ;;  %v4585_v30 = vld [vmem:[#allocation6 + $0x148] sm:$0xff]   ;;  %v4600_v54 = vld [vmem:[#allocation6 + $0x1c0] sm:$0xff]  }
 0x122   : > { %3989 = vmatprep.subr.bf16.mxu1 %v4620_v13  ;;  %v614_v20 = vld [vmem:[#allocation2 + $0x1e] sm:$0xff]  ;;  %v1621_v63 = vld [vmem:[#allocation2 + $0x156] sm:$0xff] }
 0x123   : > { %v621_v24 = vpack.c.bf16 %v614_v20, %v613_v19  ;;  %v1322_v40 = vld [vmem:[#allocation2 + $0xfc] sm:$0xff]  ;;  %v1325_v46 = vld [vmem:[#allocation2 + $0x144] sm:$0xff]  ;;  %v4613_v8 = vld [vmem:[#allocation6 + $0x210] sm:$0xff]  }
 0x124   : > { %4032 = vmatpush3.bf16.msra.mxu0 %v4563_v31  ;;  %v617_v31 = vld [vmem:[#allocation2 + $0x66] sm:$0xff]  ;;  %v4599_v53 = vld [vmem:[#allocation6 + $0x1b8] sm:$0xff]  }
 0x125   : > { %4033 = vmatprep.subr.bf16.mxu0 %v4564_v32  ;;  %3990 = vmatpush3.bf16.msra.mxu1 %v4620_v13  ;;  %v4603_v57 = vld [vmem:[#allocation6 + $0x1d8] sm:$0xff]   ;;  %v4619_v13 = vld [vmem:[#allocation6 + $0x228] sm:$0xff]  }
 0x126   : > { %3991 = vmatprep.subr.bf16.mxu1 %v4622_v18  ;;  %3993 = vmatprep.mubr.bf16.mxu1 %v621_v24  ;;  %v1624_v2 = vld [vmem:[#allocation2 + $0x19e] sm:$0xff]  ;;  %v1772_v20 = vld [vmem:[#allocation2 + $0x174] sm:$0xff] }
 0x127   : > { %v4615_v11 = vld [vmem:[#allocation6 + $0x218] sm:$0xff]   ;;  %v1774_v24 = vld [vmem:[#allocation2 + $0x1a4] sm:$0xff] }
 0x128   : > { %4034 = vmatpush3.bf16.msra.mxu0 %v4564_v32  ;;  %v618_v32 = vld [vmem:[#allocation2 + $0x7e] sm:$0xff] }
 0x129   : > { %4035 = vmatprep.subr.bf16.mxu0 %v4565_v33  ;;  %3992 = vmatpush3.bf16.msra.mxu1 %v4622_v18  ;;  %v4623_v18 = vld [vmem:[#allocation6 + $0x238] sm:$0xff]  }
 0x12a   : > { %4193 = vmatprep.subr.bf16.mxu1 %v4624_v14  ;;  %v1771_v19 = vld [vmem:[#allocation2 + $0x15c] sm:$0xff] }
 0x12c   : > { %4036 = vmatpush3.bf16.msra.mxu0 %v4565_v33  ;;  %v623_v33 = vpack.c.bf16 %v618_v32, %v617_v31 }
 0x12d   : > { %4037 = vmatprep.subr.bf16.mxu0 %v4566_v34 }
 0x130   : > { %4038 = vmatpush3.bf16.msra.mxu0 %v4566_v34  ;;  %v4586_v34 = vld [vmem:[#allocation6 + $0x150] sm:$0xff]  }
 0x131   : > { %4039 = vmatprep.subr.bf16.mxu0 %v4567_v35 }
 0x134   : > { %4040 = vmatpush3.bf16.msra.mxu0 %v4567_v35  ;;  %v4587_v35 = vld [vmem:[#allocation6 + $0x158] sm:$0xff]  }
 0x135   : > { %4049 = vmatprep.subr.bf16.mxu0 %v4568_v38 }
 0x137   : > { %4042 = vmatmul.mubr.bf16.vlgmr.msra.gmra.mrb[0].mxu0 %v877_v41  ;;  %v1323_v41 = vld [vmem:[#allocation2 + $0x114] sm:$0xff] }
 0x138   : > { %4050 = vmatpush3.bf16.msra.mxu0 %v4568_v38  ;;  %4045 = vmatprep.mubr.bf16.mxu0 %v878_v43  ;;  %v1321_v38 = vld [vmem:[#allocation2 + $0xe4] sm:$0xff]  ;;  %v1328_v43 = vpack.c.bf16 %v1323_v41, %v1322_v40 }
 0x139   : > { %4051 = vmatprep.subr.bf16.mxu0 %v4569_v42 }
 0x13c   : > { %4052 = vmatpush3.bf16.msra.mxu0 %v4569_v42  ;;  %v1327_v42 = vpack.c.bf16 %v1321_v38, %v1320_v37  ;;  %v3710_v37 = vld [vmem:[%s5973_s2] ss:$0 sm:$0xff] }
 0x13d   : > { %4053 = vmatprep.subr.bf16.mxu0 %v4570_v45 }
 0x13f   : > { %4046 = vmatmul.mubr.bf16.gmra.mrb[4].mxu0 %v5521_v47 }
 0x140   : > { %4054 = vmatpush3.bf16.msra.mxu0 %v4570_v45  ;;  %4065 = vmatprep.mubr.bf16.mxu0 %v596_v29  ;;  %v622_v29 = vpack.c.bf16 %v616_v26, %v615_v25  ;;  %v1324_v45 = vld [vmem:[#allocation2 + $0x12c] sm:$0xff]  ;;  %v1778_v25 = vpack.c.bf16 %v1772_v20, %v1771_v19 }
 0x141   : > { %4055 = vmatprep.subr.bf16.mxu0 %v4571_v48 }
 0x142   : > { %3994 = vmatmul.mubr.bf16.vlgmr.msra.gmra.mrb[0].mxu1 %v622_v29  ;;  %v1775_v29 = vld [vmem:[#allocation2 + $0x1bc] sm:$0xff] }
 0x143   : > { %3997 = vmatprep.mubr.bf16.mxu1 %v623_v33  ;;  %4194 = vmatpush3.bf16.msra.mxu1 %v4624_v14 }
 0x144   : > { %4056 = vmatpush3.bf16.msra.mxu0 %v4571_v48  ;;  %4195 = vmatprep.subr.bf16.mxu1 %v4625_v15  ;;  %v5537_v48 = vpack.c.bf16 %v1325_v46, %v1324_v45 }
 0x145   : > { %4057 = vmatprep.subr.bf16.mxu0 %v4572_v49 }
 0x147   : > { %4196 = vmatpush3.bf16.msra.mxu1 %v4625_v15  ;;  %v4630_v15 = vld [vmem:[#allocation9 + $0x30] sm:$0xff]  }
 0x148   : > { %4058 = vmatpush3.bf16.msra.mxu0 %v4572_v49  ;;  %4197 = vmatprep.subr.bf16.mxu1 %v4626_v22  ;;  %v4595_v49 = vld [vmem:[#allocation6 + $0x198] sm:$0xff]  }
 0x149   : > { %4059 = vmatprep.subr.bf16.mxu0 %v4573_v50 }
 0x14a   : > { %3998 = vmatmul.mubr.bf16.gmra.mrb[4].mxu1 %v5493_v10 }
 0x14b   : > { %4198 = vmatpush3.bf16.msra.mxu1 %v4626_v22 }
 0x14c   : > { %4060 = vmatpush3.bf16.msra.mxu0 %v4573_v50  ;;  %v4596_v50 = vld [vmem:[#allocation6 + $0x1a0] sm:$0xff]  }
 0x14d   : > { %4061 = vmatprep.subr.bf16.mxu0 %v4574_v51 }
 0x150   : > { %4062 = vmatpush3.bf16.msra.mxu0 %v4574_v51  ;;  %v4597_v51 = vld [vmem:[#allocation6 + $0x1a8] sm:$0xff]  }
 0x151   : > { %4063 = vmatprep.subr.bf16.mxu0 %v4575_v52 }
 0x154   : > { %4064 = vmatpush3.bf16.msra.mxu0 %v4575_v52  ;;  %v4598_v52 = vld [vmem:[#allocation6 + $0x1b0] sm:$0xff]  }
 0x155   : > { %4073 = vmatprep.subr.bf16.mxu0 %v4576_v55 }
 0x157   : > { %4066 = vmatmul.mubr.bf16.vlgmr.msra.gmra.mrb[0].mxu0 %v1027_v59  ;;  %v4605_v59 = vld [vmem:[#allocation6 + $0x1e8] sm:$0xff]  }
 0x158   : > { %4074 = vmatpush3.bf16.msra.mxu0 %v4576_v55  ;;  %4069 = vmatprep.mubr.bf16.mxu0 %v1028_v60  ;;  %v4601_v55 = vld [vmem:[#allocation6 + $0x1c8] sm:$0xff]   ;;  %v4628_v60 = vld [vmem:[#allocation9 + $0x20] sm:$0xff]  }
 0x159   : > { %4075 = vmatprep.subr.bf16.mxu0 %v4577_v61 }
 0x15c   : > { %4076 = vmatpush3.bf16.msra.mxu0 %v4577_v61  ;;  %v4606_v61 = vld [vmem:[#allocation6 + $0x1f0] sm:$0xff]  }
 0x15d   : > { %4077 = vmatprep.subr.bf16.mxu0 %v4578_v0 }
 0x15f   : > { %4070 = vmatmul.mubr.bf16.gmra.mrb[4].mxu0 %v5524_v4 }
 0x160   : > { %4078 = vmatpush3.bf16.msra.mxu0 %v4578_v0  ;;  %4089 = vmatprep.mubr.bf16.mxu0 %v5493_v10  ;;  %v4627_v10 = vld [vmem:[#allocation9 + $0x18] sm:$0xff]   ;;  %v4609_v0 = vld [vmem:[#allocation6 + $0x200] sm:$0xff]  }
 0x161   : > { %4079 = vmatprep.subr.bf16.mxu0 %v4579_v5  ;;  %4199 = vmatprep.subr.bf16.mxu1 %v4627_v10 }
 0x162   : > { %4200 = vmatpush3.bf16.msra.mxu1 %v4627_v10 }
 0x163   : > { %4201 = vmatprep.subr.bf16.mxu1 %v4628_v60 }
 0x164   : > { %4080 = vmatpush3.bf16.msra.mxu0 %v4579_v5  ;;  %v4611_v5 = vld [vmem:[#allocation6 + $0x208] sm:$0xff]  }
 0x165   : > { %4081 = vmatprep.subr.bf16.mxu0 %v4580_v7 }
 0x166   : > { %4202 = vmatpush3.bf16.msra.mxu1 %v4628_v60 }
 0x168   : > { %4082 = vmatpush3.bf16.msra.mxu0 %v4580_v7  ;;  %v1626_v7 = vld [vmem:[#allocation2 + $0x1ce] sm:$0xff] }
 0x169   : > { %4083 = vmatprep.subr.bf16.mxu0 %v4581_v9 }
 0x16c   : > { %4084 = vmatpush3.bf16.msra.mxu0 %v4581_v9  ;;  %v1630_v9 = vpack.c.bf16 %v1626_v7, %v1625_v6 }
 0x16d   : > { %4085 = vmatprep.subr.bf16.mxu0 %v4582_v12 }
 0x170   : > { %4086 = vmatpush3.bf16.msra.mxu0 %v4582_v12  ;;  %v4617_v12 = vld [vmem:[#allocation6 + $0x220] sm:$0xff]  }
 0x171   : > { %4087 = vmatprep.subr.bf16.mxu0 %v4583_v17 }
 0x174   : > { %4088 = vmatpush3.bf16.msra.mxu0 %v4583_v17  ;;  %v4621_v17 = vld [vmem:[#allocation6 + $0x230] sm:$0xff]  }
 0x175   : > { %4097 = vmatprep.subr.bf16.mxu0 %v4584_v21 }
 0x177   : > { %4090 = vmatmul.mubr.bf16.vlgmr.msra.gmra.mrb[0].mxu0 %v1177_v16  ;;  %v4588_v16 = vld [vmem:[#allocation6 + $0x160] sm:$0xff]  }
 0x178   : > { %4098 = vmatpush3.bf16.msra.mxu0 %v4584_v21  ;;  %4093 = vmatprep.mubr.bf16.mxu0 %v1178_v27  ;;  %v4590_v27 = vld [vmem:[#allocation6 + $0x170] sm:$0xff]  }
 0x179   : > { %4099 = vmatprep.subr.bf16.mxu0 %v4585_v30  ;;  %v1773_v21 = vld [vmem:[#allocation2 + $0x18c] sm:$0xff] }
 0x17a   : > { %v1779_v26 = vpack.c.bf16 %v1774_v24, %v1773_v21  ;;  %v1963_v21 = vld [vmem:[#allocation8 + $0x8] sm:$0xff] }
 0x17c   : > { %4100 = vmatpush3.bf16.msra.mxu0 %v4585_v30  ;;  %v1776_v30 = vld [vmem:[#allocation2 + $0x1d4] sm:$0xff] }
 0x17d   : > { %4101 = vmatprep.subr.bf16.mxu0 %v4586_v34  ;;  %v1780_v31 = vpack.c.bf16 %v1776_v30, %v1775_v29 }
 0x17f   : > { %4094 = vmatmul.mubr.bf16.gmra.mrb[4].mxu0 %v5519_v28 }
 0x180   : > { %4102 = vmatpush3.bf16.msra.mxu0 %v4586_v34  ;;  %4113 = vmatprep.mubr.bf16.mxu0 %v5521_v47  ;;  %v4594_v47 = vld [vmem:[#allocation6 + $0x190] sm:$0xff]  }
 0x181   : > { %4103 = vmatprep.subr.bf16.mxu0 %v4587_v35 }
 0x184   : > { %4104 = vmatpush3.bf16.msra.mxu0 %v4587_v35  ;;  %v4629_v35 = vld [vmem:[#allocation9 + $0x28] sm:$0xff]  }
 0x185   : > { %4105 = vmatprep.subr.bf16.mxu0 %v4588_v16  ;;  %4203 = vmatprep.subr.bf16.mxu1 %v4629_v35 }
 0x186   : > { %4204 = vmatpush3.bf16.msra.mxu1 %v4629_v35 }
 0x187   : > { %4205 = vmatprep.subr.bf16.mxu1 %v4630_v15 }
 0x188   : > { %4106 = vmatpush3.bf16.msra.mxu0 %v4588_v16  ;;  %v4631_v16 = vld [vmem:[#allocation9 + $0x38] sm:$0xff]  }
 0x189   : > { %4107 = vmatprep.subr.bf16.mxu0 %v4589_v23 }
 0x18a   : > { %4206 = vmatpush3.bf16.msra.mxu1 %v4630_v15  ;;  %v1969_v15 = vld [vmem:[#allocation8 + $0x38] sm:$0xff] }
 0x18b   : > { %4207 = vmatprep.subr.bf16.mxu1 %v4631_v16 }
 0x18c   : > { %4108 = vmatpush3.bf16.msra.mxu0 %v4589_v23 }
 0x18d   : > { %4109 = vmatprep.subr.bf16.mxu0 %v4590_v27 }
 0x18e   : > { %4208 = vmatpush3.bf16.msra.mxu1 %v4631_v16 }
 0x190   : > { %4110 = vmatpush3.bf16.msra.mxu0 %v4590_v27 }
 0x191   : > { %4111 = vmatprep.subr.bf16.mxu0 %v4591_v36 }
 0x194   : > { %4112 = vmatpush3.bf16.msra.mxu0 %v4591_v36 }
 0x195   : > { %4121 = vmatprep.subr.bf16.mxu0 %v4592_v39 }
 0x197   : > { %4114 = vmatmul.mubr.bf16.vlgmr.msra.gmra.mrb[0].mxu0 %v1327_v42 }
 0x198   : > { %4122 = vmatpush3.bf16.msra.mxu0 %v4592_v39  ;;  %4117 = vmatprep.mubr.bf16.mxu0 %v1328_v43 }
 0x199   : > { %4123 = vmatprep.subr.bf16.mxu0 %v4593_v44 }
 0x19c   : > { %4124 = vmatpush3.bf16.msra.mxu0 %v4593_v44 }
 0x19d   : > { %4125 = vmatprep.subr.bf16.mxu0 %v4594_v47 }
 0x19f   : > { %4118 = vmatmul.mubr.bf16.gmra.mrb[4].mxu0 %v5537_v48 }
 0x1a0   : > { %4126 = vmatpush3.bf16.msra.mxu0 %v4594_v47  ;;  %4137 = vmatprep.mubr.bf16.mxu0 %v5524_v4 }
 0x1a1   : > { %4127 = vmatprep.subr.bf16.mxu0 %v4595_v49 }
 0x1a4   : > { %4128 = vmatpush3.bf16.msra.mxu0 %v4595_v49 }
 0x1a5   : > { %4129 = vmatprep.subr.bf16.mxu0 %v4596_v50 }
 0x1a8   : > { %4130 = vmatpush3.bf16.msra.mxu0 %v4596_v50 }
 0x1a9   : > { %4131 = vmatprep.subr.bf16.mxu0 %v4597_v51 }
 0x1ac   : > { %4132 = vmatpush3.bf16.msra.mxu0 %v4597_v51 }
 0x1ad   : > { %4133 = vmatprep.subr.bf16.mxu0 %v4598_v52 }
 0x1b0   : > { %4134 = vmatpush3.bf16.msra.mxu0 %v4598_v52 }
 0x1b1   : > { %4135 = vmatprep.subr.bf16.mxu0 %v4599_v53 }
 0x1b4   : > { %4136 = vmatpush3.bf16.msra.mxu0 %v4599_v53 }
 0x1b5   : > { %4145 = vmatprep.subr.bf16.mxu0 %v4600_v54 }
 0x1b7   : > { %4138 = vmatmul.mubr.bf16.vlgmr.msra.gmra.mrb[0].mxu0 %v5109_v1 }
 0x1b8   : > { %4146 = vmatpush3.bf16.msra.mxu0 %v4600_v54  ;;  %4141 = vmatprep.mubr.bf16.mxu0 %v5109_v1 }
 0x1b9   : > { %4147 = vmatprep.subr.bf16.mxu0 %v4601_v55 }
 0x1bc   : > { %4148 = vmatpush3.bf16.msra.mxu0 %v4601_v55 }
 0x1bd   : > { %4149 = vmatprep.subr.bf16.mxu0 %v4602_v56 }
 0x1bf   : > { %4142 = vmatmul.mubr.bf16.gmra.mrb[4].mxu0 %v5109_v1  ;;  %v1622_v1 = vld [vmem:[#allocation2 + $0x16e] sm:$0xff] }
 0x1c0   : > { %4150 = vmatpush3.bf16.msra.mxu0 %v4602_v56  ;;  %4161 = vmatprep.mubr.bf16.mxu0 %v5519_v28  ;;  %v1623_v28 = vld [vmem:[#allocation2 + $0x186] sm:$0xff]  ;;  %v1628_v3 = vpack.c.bf16 %v1622_v1, %v1621_v63 }
 0x1c1   : > { %4151 = vmatprep.subr.bf16.mxu0 %v4603_v57  ;;  %v1629_v4 = vpack.c.bf16 %v1624_v2, %v1623_v28 }
 0x1c4   : > { %4152 = vmatpush3.bf16.msra.mxu0 %v4603_v57 }
 0x1c5   : > { %4153 = vmatprep.subr.bf16.mxu0 %v4604_v58 }
 0x1c8   : > { %4154 = vmatpush3.bf16.msra.mxu0 %v4604_v58 }
 0x1c9   : > { %4155 = vmatprep.subr.bf16.mxu0 %v4605_v59 }
 0x1cc   : > { %4156 = vmatpush3.bf16.msra.mxu0 %v4605_v59 }
 0x1cd   : > { %4157 = vmatprep.subr.bf16.mxu0 %v4606_v61 }
 0x1d0   : > { %4158 = vmatpush3.bf16.msra.mxu0 %v4606_v61 }
 0x1d1   : > { %4159 = vmatprep.subr.bf16.mxu0 %v4607_v62 }
 0x1d4   : > { %4160 = vmatpush3.bf16.msra.mxu0 %v4607_v62 }
 0x1d5   : > { %4169 = vmatprep.subr.bf16.mxu0 %v4609_v0 }
 0x1d7   : > { %4162 = vmatmul.mubr.bf16.vlgmr.msra.gmra.mrb[0].mxu0 %v1628_v3 }
 0x1d8   : > { %4170 = vmatpush3.bf16.msra.mxu0 %v4609_v0  ;;  %4165 = vmatprep.mubr.bf16.mxu0 %v1629_v4 }
 0x1d9   : > { %4171 = vmatprep.subr.bf16.mxu0 %v4611_v5 }
 0x1dc   : > { %4172 = vmatpush3.bf16.msra.mxu0 %v4611_v5 }
 0x1dd   : > { %4173 = vmatprep.subr.bf16.mxu0 %v4613_v8 }
 0x1df   : > { %4166 = vmatmul.mubr.bf16.gmra.mrb[4].mxu0 %v1630_v9  ;;  %v1962_v9 = vld [vmem:[#allocation8] sm:$0xff] }
 0x1e0   : > { %4174 = vmatpush3.bf16.msra.mxu0 %v4613_v8  ;;  %4185 = vmatprep.mubr.bf16.mxu0 %v5537_v48  ;;  %v1964_v8 = vld [vmem:[#allocation8 + $0x10] sm:$0xff] }
 0x1e1   : > { %4175 = vmatprep.subr.bf16.mxu0 %v4615_v11 }
 0x1e4   : > { %4176 = vmatpush3.bf16.msra.mxu0 %v4615_v11 }
 0x1e5   : > { %4177 = vmatprep.subr.bf16.mxu0 %v4617_v12 }
 0x1e8   : > { %4178 = vmatpush3.bf16.msra.mxu0 %v4617_v12 }
 0x1e9   : > { %4179 = vmatprep.subr.bf16.mxu0 %v4619_v13 }
 0x1ec   : > { %4180 = vmatpush3.bf16.msra.mxu0 %v4619_v13 }
 0x1ed   : > { %4181 = vmatprep.subr.bf16.mxu0 %v4621_v17 }
 0x1f0   : > { %4182 = vmatpush3.bf16.msra.mxu0 %v4621_v17 }
 0x1f1   : > { %4183 = vmatprep.subr.bf16.mxu0 %v4623_v18 }
 0x1f4   : > { %4184 = vmatpush3.bf16.msra.mxu0 %v4623_v18  ;;  %v1965_v18 = vld [vmem:[#allocation8 + $0x18] sm:$0xff] }
 0x1f7   : > { %4186 = vmatmul.mubr.bf16.vlgmr.msra.gmra.mrb[0].mxu0 %v1778_v25 }
 0x1f8   : > { %4189 = vmatprep.mubr.bf16.mxu0 %v1779_v26  ;;  %v1966_v26 = vld [vmem:[#allocation8 + $0x20] sm:$0xff] }
 0x1ff   : > { %4190 = vmatmul.mubr.bf16.gmra.mrb[4].mxu0 %v1780_v31  ;;  %v1967_v31 = vld [vmem:[#allocation8 + $0x28] sm:$0xff] }
 0x215   : > { %v3995_v32 = vpop.f32.mrb[0].mxu1 }
 0x216   : > { %v724_v33 = vpop.f32.mrb[1].mxu1 }
 0x217   : > { %v3996_v34 = vpop.f32.mrb[2].mxu1 }
 0x218   : > { %v727_v14 = vpop.f32.mrb[3].mxu1 }
 0x21d   : > { %v3999_v22 = vpop.f32.mrb[4].mxu1 }
 0x21e   : > { %v740_v23 = vpop.f32.mrb[5].mxu1 }
 0x21f   : > { %v4000_v10 = vpop.f32.mrb[6].mxu1 }
 0x220   : > { %v743_v27 = vpop.f32.mrb[7].mxu1 }
 0x2ca   : > { %v4187_v36 = vpop.f32.mrb[0].mxu0 }
 0x2cb   : > { %v4361_v38 = vadd.f32 %v4187_v36, %v3995_v32  ;;  %v1880_v39 = vpop.f32.mrb[1].mxu0  ;;  %v4635_v36 = vld [vmem:[#allocation11 + $0x18] ss:$12 sps:$4 sm:$0xff]  }
 0x2cc   : > { %v4362_v40 = vadd.f32 %v1880_v39, %v724_v33  ;;  %v4188_v41 = vpop.f32.mrb[2].mxu0 }
 0x2cd   : > { %v1928_v42 = vadd.f32 %v4361_v38, %v3710_v37  ;;  %v4363_v43 = vadd.f32 %v4188_v41, %v3996_v34  ;;  %v1883_v44 = vpop.f32.mrb[3].mxu0  ;;  %v1968_v34 = vld [vmem:[#allocation8 + $0x30] sm:$0xff] }
 0x2ce   : > { %v1926_v45 = vadd.f32 %v4362_v40, %v3710_v37  ;;  %v4364_v46 = vadd.f32 %v1883_v44, %v727_v14  ;;  %v4638_v38 = vld [vmem:[#allocation11 + $0x30] ss:$12 sps:$4 sm:$0xff]  }
 0x2cf   : > { %v1929_v47 = vadd.f32 %v4363_v43, %v3710_v37  ;;  %v1936_v49 = vmax.f32 %v1928_v42, 0.0 }
 0x2d0   : > { %v1927_v48 = vadd.f32 %v4364_v46, %v3710_v37  ;;  %v1934_v51 = vmax.f32 %v1926_v45, 0.0 }
 0x2d1   : > { %v1937_v50 = vmax.f32 %v1929_v47, 0.0 }
 0x2d2   : > { %v1935_v52 = vmax.f32 %v1927_v48, 0.0  ;;  %v4191_v53 = vpop.f32.mrb[4].mxu0 }
 0x2d3   : > { %v1943_v54 = vpack.c.bf16 %v1937_v50, %v1936_v49  ;;  %v4365_v55 = vadd.f32 %v4191_v53, %v3999_v22  ;;  %v1896_v56 = vpop.f32.mrb[5].mxu0 }
 0x2d4   : > { %v4366_v57 = vadd.f32 %v1896_v56, %v740_v23  ;;  %v4192_v58 = vpop.f32.mrb[6].mxu0  ;;  %v1942_v59 = vpack.c.bf16 %v1935_v52, %v1934_v51  ;;  %v4632_v23 = vld [vmem:[#allocation11] ss:$12 sps:$4 sm:$0xff]  }
 0x2d5   : > { %v1932_v60 = vadd.f32 %v4365_v55, %v3710_v37  ;;  %v4367_v61 = vadd.f32 %v4192_v58, %v4000_v10  ;;  %v1899_v62 = vpop.f32.mrb[7].mxu0  ;;  %v4634_v10 = vld [vmem:[#allocation11 + $0x4] ss:$12 sps:$4 sm:$0xff]  }
 0x2d6   : > { %v1930_v63 = vadd.f32 %v4366_v57, %v3710_v37  ;;  %v4368_v1 = vadd.f32 %v1899_v62, %v743_v27  ;;  %4209 = vmatprep.mubr.bf16.mxu1 %v1942_v59  ;;  %v4637_v27 = vld [vmem:[#allocation11 + $0x1c] ss:$12 sps:$4 sm:$0xff]   ;;  %2353 = vmatprep.subr.bf16.mxu1 %v4634_v10 }
 0x2d7   : > { %v1933_v0 = vadd.f32 %v4367_v61, %v3710_v37  ;;  %4210 = vmatmul.mubr.bf16.vlgmr.msra.gmra.mrb[8].mxu1 %v1943_v54  ;;  %v1940_v2 = vmax.f32 %v1932_v60, 0.0 }
 0x2d8   : > { %v1931_v28 = vadd.f32 %v4368_v1, %v3710_v37  ;;  %v1938_v4 = vmax.f32 %v1930_v63, 0.0  ;;  %2354 = vmatpush1.bf16.msra.mxu1 %v4632_v23  ;;  %v4640_v37 = vld [vmem:[#allocation11 + $0x34] ss:$12 sps:$4 sm:$0xff]  }
 0x2d9   : > { %v1941_v3 = vmax.f32 %v1933_v0, 0.0  ;;  %2355 = vmatprep.subr.bf16.mxu1 %v4637_v27 }
 0x2da   : > { %v1939_v5 = vmax.f32 %v1931_v28, 0.0 }
 0x2db   : > { %v1945_v6 = vpack.c.bf16 %v1941_v3, %v1940_v2 }
 0x2dc   : > { %v1944_v7 = vpack.c.bf16 %v1939_v5, %v1938_v4  ;;  %2356 = vmatpush1.bf16.msra.mxu1 %v4635_v36 }
 0x2dd   : > { %2357 = vmatprep.subr.bf16.mxu1 %v4640_v37 }
 0x2de   : > { %4213 = vmatprep.mubr.bf16.mxu1 %v1944_v7  ;;  %v4641_v7 = vld [vmem:[#allocation11 + $0x48] ss:$12 sps:$4 sm:$0xff]  }
 0x2df   : > { %4214 = vmatmul.mubr.bf16.gmra.mrb[12].mxu1 %v1945_v6  ;;  %v4643_v6 = vld [vmem:[#allocation11 + $0x4c] ss:$12 sps:$4 sm:$0xff]  }
 0x2e0   : > { %2358 = vmatpush1.bf16.msra.mxu1 %v4638_v38 }
 0x2e1   : > { %2359 = vmatprep.subr.bf16.mxu1 %v4643_v6 }
 0x2e4   : > { %2360 = vmatpush1.bf16.msra.mxu1 %v4641_v7 }
 0x3aa   : > { %v4211_v11 = vpop.f32.mrb[8].mxu1 }
 0x3ab   : > { %v5549_v12 = vadd.f32 %v4211_v11, %v1964_v8  ;;  %v2052_v13 = vpop.f32.mrb[9].mxu1  ;;  %v4646_v8 = vld [vmem:[#allocation11 + $0x64] ss:$12 sps:$4 sm:$0xff]   ;;  %v4649_v11 = vld [vmem:[#allocation11 + $0x7c] ss:$12 sps:$4 sm:$0xff]  }
 0x3ac   : > { %v5551_v17 = vadd.f32 %v2052_v13, %v1962_v9  ;;  %v4212_v19 = vpop.f32.mrb[10].mxu1  ;;  %v4644_v9 = vld [vmem:[#allocation11 + $0x60] ss:$12 sps:$4 sm:$0xff]   ;;  %2361 = vmatprep.subr.bf16.mxu1 %v4646_v8  ;;  %v4647_v13 = vld [vmem:[#allocation11 + $0x78] ss:$12 sps:$4 sm:$0xff]  }
 0x3ad   : > { %2087 = vadd.xlane.f32.xlu1 %v5549_v12  ;;  %v2055_v20 = vpop.f32.mrb[11].mxu1  ;;  %v5555_v24 = vadd.f32 %v4212_v19, %v1965_v18  ;;  %2362 = vmatpush1.bf16.msra.mxu1 %v4644_v9  ;;  %v4652_v18 = vld [vmem:[#allocation11 + $0x94] ss:$12 sps:$4 sm:$0xff]   ;;  %v4650_v19 = vld [vmem:[#allocation11 + $0x90] ss:$12 sps:$4 sm:$0xff]  }
 0x3ae   : > { %2083 = vadd.xlane.f32.xlu0 %v5551_v17  ;;  %v5557_v25 = vadd.f32 %v2055_v20, %v1963_v21  ;;  %2363 = vmatprep.subr.bf16.mxu1 %v4649_v11  ;;  %v4655_v20 = vld [vmem:[#allocation11 + $0xac] ss:$12 sps:$4 sm:$0xff]   ;;  %v4653_v21 = vld [vmem:[#allocation11 + $0xa8] ss:$12 sps:$4 sm:$0xff]  }
 0x3af   : > { %v4661_v9 = vld [vmem:[#allocation11 + $0x80] ss:$12 sps:$4 sm:$0xff]  }
 0x3b1   : > { %2089 = vadd.xlane.f32.xlu1 %v5555_v24  ;;  %2364 = vmatpush1.bf16.msra.mxu1 %v4647_v13 }
 0x3b2   : > { %2085 = vadd.xlane.f32.xlu0 %v5557_v25  ;;  %v4215_v29 = vpop.f32.mrb[12].mxu1  ;;  %2365 = vmatprep.subr.bf16.mxu1 %v4652_v18 }
 0x3b3   : > { %v2068_v30 = vpop.f32.mrb[13].mxu1  ;;  %v5566_v16 = vadd.f32 %v4215_v29, %v1968_v34  ;;  %v4656_v29 = vld [vmem:[#allocation11 + $0x8] ss:$12 sps:$4 sm:$0xff]  }
 0x3b4   : > { %v5561_v32 = vadd.f32 %v2068_v30, %v1966_v26  ;;  %v4216_v33 = vpop.f32.mrb[14].mxu1  ;;  %v5110_v26 = vmov 0  }
 0x3b5   : > { %v2071_v35 = vpop.f32.mrb[15].mxu1  ;;  %v5569_v22 = vadd.f32 %v4216_v33, %v1969_v15  ;;  %2366 = vmatpush1.bf16.msra.mxu1 %v4650_v19  ;;  %2385 = vmatprep.mubr.bf16.mxu1 %v5110_v26  ;;  %v4662_v19 = vld [vmem:[#allocation11 + $0x98] ss:$12 sps:$4 sm:$0xff]  }
 0x3b6   : > { %v5563_v14 = vadd.f32 %v2071_v35, %v1967_v31  ;;  %2091 = vadd.xlane.f32.xlu0 %v5561_v32  ;;  %2367 = vmatprep.subr.bf16.mxu1 %v4655_v20 }
 0x3b8   : > { %2093 = vadd.xlane.f32.xlu1 %v5563_v14 }
 0x3b9   : > { %2368 = vmatpush1.bf16.msra.mxu1 %v4653_v21  ;;  %v2210_v21 = vlaneseq }
 0x3ba   : > { %2095 = vadd.xlane.f32.xlu0 %v5566_v16  ;;  %4217 = vmatprep.subr.bf16.mxu1 %v4656_v29 }
 0x3bc   : > { %2097 = vadd.xlane.f32.xlu1 %v5569_v22 }
 0x43a   : > { %v2088_v39 = vpop.xlane.xlu1 %2087 }
 0x43b   : > { %v2084_v40 = vpop.xlane.xlu0 %2083  ;;  %v2102_v41 = vmul.f32 0.0078125, %v2088_v39 }
 0x43c   : > { %v2100_v42 = vmul.f32 0.0078125, %v2084_v40 }
 0x43d   : > { %v5577_v46 = vsub.f32 %v5549_v12, %v2102_v41 }
 0x43e   : > { %v5574_v43 = vsub.f32 %v5551_v17, %v2100_v42  ;;  %v2090_v44 = vpop.xlane.xlu1 %2089 }
 0x43f   : > { %v2086_v45 = vpop.xlane.xlu0 %2085  ;;  %v2103_v47 = vmul.f32 0.0078125, %v2090_v44  ;;  %v2118_v55 = vmul.f32 %v5577_v46, %v5577_v46 }
 0x440   : > { %v2101_v48 = vmul.f32 0.0078125, %v2086_v45  ;;  %v2116_v49 = vmul.f32 %v5574_v43, %v5574_v43 }
 0x441   : > { %v5585_v52 = vsub.f32 %v5555_v24, %v2103_v47 }
 0x442   : > { %v5582_v50 = vsub.f32 %v5557_v25, %v2101_v48  ;;  %2124 = vadd.xlane.f32.xlu0 %v2116_v49 }
 0x443   : > { %v2092_v51 = vpop.xlane.xlu0 %2091  ;;  %v2119_v62 = vmul.f32 %v5585_v52, %v5585_v52 }
 0x444   : > { %v2104_v53 = vmul.f32 0.0078125, %v2092_v51  ;;  %v2117_v54 = vmul.f32 %v5582_v50, %v5582_v50 }
 0x445   : > { %v2094_v56 = vpop.xlane.xlu1 %2093 }
 0x446   : > { %v5592_v57 = vsub.f32 %v5561_v32, %v2104_v53  ;;  %v2105_v58 = vmul.f32 0.0078125, %v2094_v56  ;;  %2126 = vadd.xlane.f32.xlu1 %v2117_v54  ;;  %2128 = vadd.xlane.f32.xlu0 %v2118_v55 }
 0x447   : > { %v2096_v59 = vpop.xlane.xlu0 %2095 }
 0x448   : > { %v5595_v60 = vsub.f32 %v5563_v14, %v2105_v58  ;;  %v2106_v61 = vmul.f32 0.0078125, %v2096_v59  ;;  %v2120_v63 = vmul.f32 %v5592_v57, %v5592_v57  ;;  %v4657_v58 = vld [vmem:[#allocation11 + $0x20] ss:$12 sps:$4 sm:$0xff]  }
 0x449   : > { %v2098_v1 = vpop.xlane.xlu1 %2097 }
 0x44a   : > { %v5602_v0 = vsub.f32 %v5566_v16, %v2106_v61  ;;  %v2107_v28 = vmul.f32 0.0078125, %v2098_v1  ;;  %2130 = vadd.xlane.f32.xlu1 %v2119_v62  ;;  %2132 = vadd.xlane.f32.xlu0 %v2120_v63  ;;  %v2121_v3 = vmul.f32 %v5595_v60, %v5595_v60 }
 0x44c   : > { %v5605_v2 = vsub.f32 %v5569_v22, %v2107_v28  ;;  %v2122_v4 = vmul.f32 %v5602_v0, %v5602_v0 }
 0x44e   : > { %2134 = vadd.xlane.f32.xlu1 %v2121_v3  ;;  %2136 = vadd.xlane.f32.xlu0 %v2122_v4  ;;  %v2123_v5 = vmul.f32 %v5605_v2, %v5605_v2  ;;  %v4659_v4 = vld [vmem:[#allocation11 + $0x50] ss:$12 sps:$4 sm:$0xff]  }
 0x452   : > { %2138 = vadd.xlane.f32.xlu1 %v2123_v5 }
 0x4cf   : > { %v2125_v30 = vpop.xlane.xlu0 %2124 }
 0x4d0   : > { %v2140_v31 = vmul.f32 0.0078125, %v2125_v30 }
 0x4d2   : > { %v2148_v33 = vadd.f32 1e-05, %v2140_v31 }
 0x4d3   : > { %v2127_v34 = vpop.xlane.xlu1 %2126  ;;  %v2129_v35 = vpop.xlane.xlu0 %2128 }
 0x4d4   : > { %v2141_v15 = vmul.f32 0.0078125, %v2127_v34  ;;  %4688 = vrsqrt.f32 %v2148_v33  ;;  %v2142_v10 = vmul.f32 0.0078125, %v2129_v35 }
 0x4d6   : > { %v2149_v23 = vadd.f32 1e-05, %v2141_v15  ;;  %v2150_v37 = vadd.f32 1e-05, %v2142_v10 }
 0x4d7   : > { %v2131_v27 = vpop.xlane.xlu1 %2130  ;;  %v2133_v39 = vpop.xlane.xlu0 %2132 }
 0x4d8   : > { %4690 = vrsqrt.f32 %v2149_v23  ;;  %v2143_v36 = vmul.f32 0.0078125, %v2131_v27  ;;  %v2144_v42 = vmul.f32 0.0078125, %v2133_v39 }
 0x4da   : > { %v2151_v38 = vadd.f32 1e-05, %v2143_v36  ;;  %v2152_v49 = vadd.f32 1e-05, %v2144_v42 }
 0x4db   : > { %v2135_v40 = vpop.xlane.xlu1 %2134  ;;  %v2137_v54 = vpop.xlane.xlu0 %2136 }
 0x4dc   : > { %4692 = vrsqrt.f32 %v2151_v38  ;;  %v2145_v41 = vmul.f32 0.0078125, %v2135_v40  ;;  %v2146_v61 = vmul.f32 0.0078125, %v2137_v54 }
 0x4dd   : > { %4694 = vrsqrt.f32 %v2150_v37 }
 0x4de   : > { %v4689_v44 = vpop.eup %4688  ;;  %v2153_v45 = vadd.f32 1e-05, %v2145_v41  ;;  %v2154_v28 = vadd.f32 1e-05, %v2146_v61 }
 0x4df   : > { %v2139_v47 = vpop.xlane.xlu1 %2138  ;;  %v2164_v51 = vmul.f32 %v4689_v44, %v5574_v43  ;;  %v4658_v43 = vld [vmem:[#allocation11 + $0x38] ss:$12 sps:$4 sm:$0xff]  }
 0x4e0   : > { %4696 = vrsqrt.f32 %v2153_v45  ;;  %v2147_v55 = vmul.f32 0.0078125, %v2139_v47 }
 0x4e1   : > { %4698 = vrsqrt.f32 %v2152_v49 }
 0x4e2   : > { %v4691_v48 = vpop.eup %4690  ;;  %v2155_v63 = vadd.f32 1e-05, %v2147_v55 }
 0x4e3   : > { %v2165_v53 = vmul.f32 %v4691_v48, %v5582_v50 }
 0x4e4   : > { %4700 = vrsqrt.f32 %v2155_v63 }
 0x4e5   : > { %v2172_v56 = vpack.c.bf16 %v2165_v53, %v2164_v51  ;;  %4702 = vrsqrt.f32 %v2154_v28 }
 0x4e6   : > { %v4693_v59 = vpop.eup %4692 }
 0x4e7   : > { %2386 = vmatmul.mubr.bf16.vlgmr.msra.gmra.mrb[16].mxu1 %v2172_v56  ;;  %v4695_v62 = vpop.eup %4694  ;;  %v2167_v1 = vmul.f32 %v4693_v59, %v5585_v52  ;;  %v4660_v52 = vld [vmem:[#allocation11 + $0x68] ss:$12 sps:$4 sm:$0xff]  }
 0x4e8   : > { %4218 = vmatpush3.bf16.msra.mxu1 %v4656_v29  ;;  %2395 = vmatprep.mubr.bf16.mxu1 %v5110_v26  ;;  %v2166_v50 = vmul.f32 %v4695_v62, %v5577_v46 }
 0x4e9   : > { %4219 = vmatprep.subr.bf16.mxu1 %v4657_v58 }
 0x4ea   : > { %v2173_v3 = vpack.c.bf16 %v2167_v1, %v2166_v50  ;;  %v4697_v5 = vpop.eup %4696 }
 0x4eb   : > { %v4699_v6 = vpop.eup %4698  ;;  %v2169_v7 = vmul.f32 %v4697_v5, %v5595_v60 }
 0x4ec   : > { %4220 = vmatpush3.bf16.msra.mxu1 %v4657_v58  ;;  %v2168_v8 = vmul.f32 %v4699_v6, %v5592_v57  ;;  %v4663_v57 = vld [vmem:[#allocation11 + $0xb0] ss:$12 sps:$4 sm:$0xff]  }
 0x4ed   : > { %4221 = vmatprep.subr.bf16.mxu1 %v4658_v43 }
 0x4ee   : > { %v2174_v46 = vpack.c.bf16 %v2169_v7, %v2168_v8  ;;  %v4701_v11 = vpop.eup %4700 }
 0x4ef   : > { %2396 = vmatmul.mubr.bf16.gmra.mrb[20].mxu1 %v2173_v3  ;;  %v4703_v13 = vpop.eup %4702  ;;  %v2171_v18 = vmul.f32 %v4701_v11, %v5605_v2 }
 0x4f0   : > { %4222 = vmatpush3.bf16.msra.mxu1 %v4658_v43  ;;  %2405 = vmatprep.mubr.bf16.mxu1 %v5110_v26  ;;  %v2170_v20 = vmul.f32 %v4703_v13, %v5602_v0  ;;  %v5631_v0 = vld [vmem:[%s6022_s11] sm:$0x7]  ;;  %s3462_s11 = scalar_lea.sflag [#allocation5], %s5462_s13 }
 0x4f1   : > { %4223 = vmatprep.subr.bf16.mxu1 %v4659_v4 }
 0x4f2   : > { %v2175_v60 = vpack.c.bf16 %v2171_v18, %v2170_v20 }
 0x4f4   : > { %4224 = vmatpush3.bf16.msra.mxu1 %v4659_v4 }
 0x4f5   : > { %4225 = vmatprep.subr.bf16.mxu1 %v4660_v52 }
 0x4f7   : > { %2406 = vmatmul.mubr.bf16.gmra.mrb[24].mxu1 %v2174_v46 }
 0x4f8   : > { %4226 = vmatpush3.bf16.msra.mxu1 %v4660_v52  ;;  %2415 = vmatprep.mubr.bf16.mxu1 %v5110_v26  ;;  %v5625_v26 = vshrl.u32 %v2210_v21, 7 }
 0x4f9   : > { %4227 = vmatprep.subr.bf16.mxu1 %v4661_v9 }
 0x4fa   : > { %v2212_v2 = vsub.s32 0, %v5625_v26  ;;  %v2216_v29 = vsub.s32 1, %v5625_v26 }
 0x4fc   : > { %4228 = vmatpush3.bf16.msra.mxu1 %v4661_v9  ;;  %v5635_v30 = vrot.slane %v5631_v0, %v2212_v2  ;;  %v5638_v31 = vrot.slane %v5631_v0, %v2216_v29 }
 0x4fd   : > { %4229 = vmatprep.subr.bf16.mxu1 %v4662_v19 }
 0x4ff   : > { %2416 = vmatmul.mubr.bf16.gmra.mrb[28].mxu1 %v2175_v60 }
 0x500   : > { %4230 = vmatpush3.bf16.msra.mxu1 %v4662_v19  ;;  %4233 = vmatprep.mubr.bf16.mxu1 %v2172_v56 }
 0x501   : > { %4231 = vmatprep.subr.bf16.mxu1 %v4663_v57 }
 0x504   : > { %4232 = vmatpush3.bf16.msra.mxu1 %v4663_v57 }
 0x507   : > { %4234 = vmatmul.mubr.bf16.vlgmr.msra.gmra.mrb[32].mxu1 %v2173_v3 }
 0x508   : > { %4237 = vmatprep.mubr.bf16.mxu1 %v2174_v46 }
 0x50f   : > { %4238 = vmatmul.mubr.bf16.gmra.mrb[36].mxu1 %v2175_v60 }
 0x5ba   : > { %v2387_v33 = vpop.f32.mrb[16].mxu1 }
 0x5bb   : > { %v5641_v34 = vadd.f32 %v2387_v33, %v5635_v30  ;;  %v2389_v35 = vpop.f32.mrb[17].mxu1 }
 0x5bc   : > { %v2390_v15 = vadd.f32 %v2389_v35, %v5638_v31  ;;  %v2391_v23 = vpop.f32.mrb[18].mxu1 }
 0x5bd   : > { %v2392_v10 = vadd.f32 %v2391_v23, %v5635_v30  ;;  %v2393_v27 = vpop.f32.mrb[19].mxu1  ;;  %v2507_v38 = vmul.f32 1.442695, %v5641_v34  ;;  %v2499_v59 = vadd.f32 1.0, %v5641_v34  ;;  %vm2491_vm3 = vcmp.gt.f32.partialorder %v5641_v34, 0.0 }
 0x5be   : > { %v2547_v36 = vmul.f32 1.442695, %v2390_v15  ;;  %v2394_v37 = vadd.f32 %v2393_v27, %v5638_v31  ;;  %v2539_v63 = vadd.f32 1.0, %v2390_v15  ;;  %vm2531_vm0 = vcmp.gt.f32.partialorder %v2390_v15, 0.0 }
 0x5bf   : > { %v2509_v39 = vmul.f32 1.442695, %v2392_v10  ;;  %v2500_v3 = vadd.f32 1.0, %v2392_v10  ;;  %vm2492_vm2 = vcmp.gt.f32.partialorder %v2392_v10, 0.0 }
 0x5c0   : > { %4704 = vpow2.f32 %v2547_v36  ;;  %v2549_v40 = vmul.f32 1.442695, %v2394_v37  ;;  %v2540_v1 = vadd.f32 1.0, %v2394_v37  ;;  %vm2532_vm1 = vcmp.gt.f32.partialorder %v2394_v37, 0.0 }
 0x5c1   : > { %4706 = vpow2.f32 %v2509_v39  ;;  %v2220_v36 = vsub.s32 2, %v5625_v26 }
 0x5c2   : > { %4708 = vpow2.f32 %v2549_v40  ;;  %v2397_v41 = vpop.f32.mrb[20].mxu1 }
 0x5c3   : > { %4710 = vpow2.f32 %v2507_v38  ;;  %v5648_v42 = vadd.f32 %v2397_v41, %v5635_v30  ;;  %v2399_v44 = vpop.f32.mrb[21].mxu1 }
 0x5c4   : > { %v2400_v45 = vadd.f32 %v2399_v44, %v5638_v31  ;;  %v2401_v47 = vpop.f32.mrb[22].mxu1 }
 0x5c5   : > { %v5652_v48 = vadd.f32 %v2401_v47, %v5635_v30  ;;  %v2403_v49 = vpop.f32.mrb[23].mxu1  ;;  %v2511_v54 = vmul.f32 1.442695, %v5648_v42  ;;  %v2501_v26 = vadd.f32 1.0, %v5648_v42  ;;  %vm2493_vm7 = vcmp.gt.f32.partialorder %v5648_v42, 0.0 }
 0x5c6   : > { %v2551_v51 = vmul.f32 1.442695, %v2400_v45  ;;  %v5655_v53 = vadd.f32 %v2403_v49, %v5638_v31  ;;  %v2541_v21 = vadd.f32 1.0, %v2400_v45  ;;  %vm2533_vm4 = vcmp.gt.f32.partialorder %v2400_v45, 0.0 }
 0x5c7   : > { %v2513_v55 = vmul.f32 1.442695, %v5652_v48  ;;  %v2502_v38 = vadd.f32 1.0, %v5652_v48  ;;  %vm2494_vm6 = vcmp.gt.f32.partialorder %v5652_v48, 0.0  ;;  %v5710_v48 = vrot.slane %v5631_v0, %v2220_v36 }
 0x5c8   : > { %4712 = vpow2.f32 %v2551_v51  ;;  %v2553_v56 = vmul.f32 1.442695, %v5655_v53  ;;  %v2542_v23 = vadd.f32 1.0, %v5655_v53  ;;  %vm2534_vm5 = vcmp.gt.f32.partialorder %v5655_v53, 0.0 }
 0x5c9   : > { %4714 = vpow2.f32 %v2513_v55 }
 0x5ca   : > { %v4705_v58 = vpop.eup %4704  ;;  %4716 = vpow2.f32 %v2553_v56  ;;  %v2407_v61 = vpop.f32.mrb[24].mxu1 }
 0x5cb   : > { %v4707_v62 = vpop.eup %4706  ;;  %4718 = vpow2.f32 %v2511_v54  ;;  %v5662_v43 = vadd.f32 %v2407_v61, %v5635_v30  ;;  %v2409_v28 = vpop.f32.mrb[25].mxu1  ;;  %v2563_v13 = vsel %vm2531_vm0, %v2539_v63, %v4705_v58  ;;  %vm2595_vm0 = vcmask 523264  }
 0x5cc   : > { %v4709_v50 = vpop.eup %4708  ;;  %v5665_v4 = vadd.f32 %v2409_v28, %v5638_v31  ;;  %v2411_v5 = vpop.f32.mrb[26].mxu1  ;;  %v5675_v18 = vsel %vm2492_vm2, %v2500_v3, %v4707_v62 }
 0x5cd   : > { %v4711_v6 = vpop.eup %4710  ;;  %v2515_v7 = vmul.f32 1.442695, %v5662_v43  ;;  %v5669_v52 = vadd.f32 %v2411_v5, %v5635_v30  ;;  %v2413_v8 = vpop.f32.mrb[27].mxu1  ;;  %v2564_v46 = vsel %vm2532_vm1, %v2540_v1, %v4709_v50  ;;  %v2503_v42 = vadd.f32 1.0, %v5662_v43 }
 0x5ce   : > { %v2555_v9 = vmul.f32 1.442695, %v5665_v4  ;;  %v5673_v11 = vadd.f32 %v2413_v8, %v5638_v31  ;;  %v2571_v20 = vpack.c.bf16 %v2564_v46, %v2563_v13  ;;  %v5680_v57 = vsel %vm2491_vm3, %v2499_v59, %v4711_v6 }
 0x5cf   : > { %4720 = vpow2.f32 %v2515_v7  ;;  %v2517_v19 = vmul.f32 1.442695, %v5669_v52  ;;  %v2717_v2 = vadd.f32 %v2564_v46, %v2563_v13  ;;  %v2730_v29 = vpack.c.bf16 %v5675_v18, %v5680_v57 }
 0x5d0   : > { %4722 = vpow2.f32 %v2555_v9  ;;  %v2557_v60 = vmul.f32 1.442695, %v5673_v11  ;;  %2579 = vxpose.xlu0.c.b16.start [1/4] (short) %v2571_v20, 128  ;;  %vm2535_vm8 = vcmp.gt.f32.partialorder %v5665_v4, 0.0  ;;  %v2504_v28 = vadd.f32 1.0, %v5669_v52 }
 0x5d1   : > { %4724 = vpow2.f32 %v2517_v19  ;;  %v2544_v3 = vadd.f32 1.0, %v5673_v11  ;;  %vm2495_vm9 = vcmp.gt.f32.partialorder %v5662_v43, 0.0  ;;  %vm2496_vm10 = vcmp.gt.f32.partialorder %v5669_v52, 0.0 }
 0x5d2   : > { %v4713_v33 = vpop.eup %4712  ;;  %4726 = vpow2.f32 %v2557_v60  ;;  %v2417_v35 = vpop.f32.mrb[28].mxu1  ;;  %vm2536_vm11 = vcmp.gt.f32.partialorder %v5673_v11, 0.0 }
 0x5d3   : > { %v4715_v15 = vpop.eup %4714  ;;  %v5686_v34 = vadd.f32 %v2417_v35, %v5635_v30  ;;  %v2419_v10 = vpop.f32.mrb[29].mxu1  ;;  %v2565_v27 = vsel %vm2533_vm4, %v2541_v21, %v4713_v33 }
 0x5d4   : > { %v4717_v37 = vpop.eup %4716  ;;  %v5692_v39 = vadd.f32 %v2419_v10, %v5638_v31  ;;  %v2421_v40 = vpop.f32.mrb[30].mxu1  ;;  %v2718_v41 = vadd.f32 %v2717_v2, %v2565_v27  ;;  %v5704_v55 = vsel %vm2494_vm6, %v2502_v38, %v4715_v15 }
 0x5d5   : > { %v4719_v44 = vpop.eup %4718  ;;  %v2519_v45 = vmul.f32 1.442695, %v5686_v34  ;;  %v5696_v47 = vadd.f32 %v2421_v40, %v5635_v30  ;;  %v2423_v49 = vpop.f32.mrb[31].mxu1  ;;  %v2566_v51 = vsel %vm2534_vm5, %v2542_v23, %v4717_v37  ;;  %vm2497_vm13 = vcmp.gt.f32.partialorder %v5686_v34, 0.0 }
 0x5d6   : > { %v2559_v54 = vmul.f32 1.442695, %v5692_v39  ;;  %v5702_v53 = vadd.f32 %v2423_v49, %v5638_v31  ;;  %v2572_v58 = vpack.c.bf16 %v2566_v51, %v2565_v27  ;;  %v5712_v59 = vsel %vm2493_vm7, %v2501_v26, %v4719_v44 }
 0x5d7   : > { %4728 = vpow2.f32 %v2519_v45  ;;  %v2521_v56 = vmul.f32 1.442695, %v5696_v47  ;;  %v2543_v31 = vadd.f32 1.0, %v5665_v4  ;;  %v2719_v62 = vadd.f32 %v2718_v41, %v2566_v51 }
 0x5d8   : > { %4730 = vpow2.f32 %v2559_v54  ;;  %v2561_v30 = vmul.f32 1.442695, %v5702_v53  ;;  %2580 = vxpose.xlu0.c.b16.cont [2/4] (short) %v2572_v58, 128  ;;  %v2731_v63 = vpack.c.bf16 %v5704_v55, %v5712_v59  ;;  %v2545_v23 = vadd.f32 1.0, %v5692_v39 }
 0x5d9   : > { %v4721_v61 = vpop.eup %4720  ;;  %4732 = vpow2.f32 %v2521_v56  ;;  %v2505_v27 = vadd.f32 1.0, %v5686_v34  ;;  %vm2537_vm12 = vcmp.gt.f32.partialorder %v5692_v39, 0.0  ;;  %v2506_v36 = vadd.f32 1.0, %v5696_v47 }
 0x5da   : > { %v4723_v1 = vpop.eup %4722  ;;  %4734 = vpow2.f32 %v2561_v30  ;;  %v4235_v0 = vpop.f32.mrb[32].mxu1  ;;  %v5724_v9 = vsel %vm2495_vm9, %v2503_v42, %v4721_v61  ;;  %v2546_v40 = vadd.f32 1.0, %v5702_v53  ;;  %vm2498_vm14 = vcmp.gt.f32.partialorder %v5696_v47, 0.0 }
 0x5db   : > { %v4725_v50 = vpop.eup %4724  ;;  %v2460_v5 = vpop.f32.mrb[33].mxu1  ;;  %v2567_v6 = vsel %vm2535_vm8, %v2543_v31, %v4723_v1  ;;  %v2469_v13 = vadd.f32 %v4235_v0, %v5710_v48  ;;  %vm2538_vm15 = vcmp.gt.f32.partialorder %v5702_v53, 0.0 }
 0x5dc   : > { %v4727_v7 = vpop.eup %4726  ;;  %v4236_v8 = vpop.f32.mrb[34].mxu1  ;;  %v2720_v46 = vadd.f32 %v2719_v62, %v2567_v6  ;;  %v5726_v4 = vsel %vm2496_vm10, %v2504_v28, %v4725_v50  ;;  %v2461_v52 = vadd.f32 %v2460_v5, %v5710_v48 }
 0x5dd   : > { %v2472_v19 = vadd.f32 %v4236_v8, %v5710_v48  ;;  %v2463_v20 = vpop.f32.mrb[35].mxu1  ;;  %v2568_v60 = vsel %vm2536_vm11, %v2544_v3, %v4727_v7  ;;  %v2732_v43 = vpack.c.bf16 %v5726_v4, %v5724_v9 }
 0x5de   : > { %v2464_v21 = vadd.f32 %v2463_v20, %v5710_v48  ;;  %v2573_v11 = vpack.c.bf16 %v2568_v60, %v2567_v6  ;;  %v2721_v2 = vadd.f32 %v2720_v46, %v2568_v60 }
 0x5df   : > { %v2576_v33 = vpack.c.bf16 %v2472_v19, %v2469_v13 }
 0x5e0   : > { %v2575_v35 = vpack.c.bf16 %v2464_v21, %v2461_v52  ;;  %2581 = vxpose.xlu0.c.b16.cont [3/4] (short) %v2573_v11, 128 }
 0x5e1   : > { %v4729_v15 = vpop.eup %4728 }
 0x5e2   : > { %v4731_v10 = vpop.eup %4730  ;;  %v4239_v37 = vpop.f32.mrb[36].mxu1  ;;  %4241 = vmatprep.subr.bf16.mxu1 %v2575_v35  ;;  %v5742_v51 = vsel %vm2497_vm13, %v2505_v27, %v4729_v15 }
 0x5e3   : > { %v4733_v38 = vpop.eup %4732  ;;  %v2476_v41 = vpop.f32.mrb[37].mxu1  ;;  %4242 = vmatpush3.bf16.msra.mxu1 %v2575_v35  ;;  %v2569_v44 = vsel %vm2537_vm12, %v2545_v23, %v4731_v10  ;;  %v2485_v54 = vadd.f32 %v4239_v37, %v5710_v48 }
 0x5e4   : > { %v4735_v45 = vpop.eup %4734  ;;  %v4240_v49 = vpop.f32.mrb[38].mxu1  ;;  %4243 = vmatprep.subr.bf16.mxu1 %v2576_v33  ;;  %v2722_v39 = vadd.f32 %v2721_v2, %v2569_v44  ;;  %v5744_v26 = vsel %vm2498_vm14, %v2506_v36, %v4733_v38  ;;  %v2477_v47 = vadd.f32 %v2476_v41, %v5710_v48 }
 0x5e5   : > { %v2488_v56 = vadd.f32 %v4240_v49, %v5710_v48  ;;  %v2479_v58 = vpop.f32.mrb[39].mxu1  ;;  %v2570_v30 = vsel %vm2538_vm15, %v2546_v40, %v4735_v45  ;;  %v2733_v34 = vpack.c.bf16 %v5744_v26, %v5742_v51 }
 0x5e6   : > { %v2480_v53 = vadd.f32 %v2479_v58, %v5710_v48  ;;  %v2574_v61 = vpack.c.bf16 %v2570_v30, %v2569_v44  ;;  %v2723_v31 = vadd.f32 %v2722_v39, %v2570_v30 }
 0x5e7   : > { %v2578_v62 = vpack.c.bf16 %v2488_v56, %v2485_v54  ;;  %4244 = vmatpush3.bf16.msra.mxu1 %v2576_v33 }
 0x5e8   : > { %v2577_v1 = vpack.c.bf16 %v2480_v53, %v2477_v47  ;;  %v2724_v42 = vrot.slane %v2723_v31, 4  ;;  %2582 = vxpose.xlu0.c.b16.end [4/4] (short) %v2574_v61, 128 }
 0x5ea   : > { %v2725_v28 = vadd.f32 %v2724_v42, %v2723_v31  ;;  %4245 = vmatprep.subr.bf16.mxu1 %v2577_v1  ;;  %v4665_v42 = vld [vmem:[#allocation12 + $0x8] sm:$0xff]  }
 0x5eb   : > { %4246 = vmatpush3.bf16.msra.mxu1 %v2577_v1  ;;  %v4664_v1 = vld [vmem:[#allocation12] sm:$0xff]  }
 0x5ec   : > { %v2726_v0 = vrot.slane %v2725_v28, 2  ;;  %4247 = vmatprep.subr.bf16.mxu1 %v2578_v62 }
 0x5ee   : > { %v2727_v50 = vadd.f32 %v2726_v0, %v2725_v28  ;;  %v4666_v28 = vld [vmem:[#allocation12 + $0x10] sm:$0xff]   ;;  %v4667_v0 = vld [vmem:[#allocation12 + $0x18] sm:$0xff]  }
 0x5ef   : > { %4248 = vmatpush3.bf16.msra.mxu1 %v2578_v62 }
 0x5f0   : > { %v2728_v3 = vrot.slane %v2727_v50, 1 }
 0x5f2   : > { %v2729_v5 = vadd.f32 %v2728_v3, %v2727_v50  ;;  %v4668_v50 = vld [vmem:[#allocation12 + $0x20] sm:$0xff]  }
 0x5f4   : > { %v2807_v6 = vmul.f32 %v2729_v5, %v5680_v57  ;;  %v2808_v48 = vmul.f32 %v2729_v5, %v5675_v18  ;;  %v2809_v7 = vmul.f32 %v2729_v5, %v5712_v59  ;;  %v2810_v8 = vmul.f32 %v2729_v5, %v5704_v55  ;;  %v4669_v55 = vld [vmem:[#allocation12 + $0x28] sm:$0xff]   ;;  %v4670_v59 = vld [vmem:[#allocation12 + $0x30] sm:$0xff]  }
 0x5f5   : > { %v2811_v46 = vmul.f32 %v2729_v5, %v5724_v9  ;;  %v2812_v13 = vmul.f32 %v2729_v5, %v5726_v4  ;;  %v2813_v19 = vmul.f32 %v2729_v5, %v5742_v51  ;;  %v2814_v20 = vmul.f32 %v2729_v5, %v5744_v26 }
 0x5f6   : > { %2815 = vadd.xlane.f32.xlu1 %v2807_v6 }
 0x5fa   : > { %2817 = vadd.xlane.f32.xlu1 %v2808_v48 }
 0x5fe   : > { %2819 = vadd.xlane.f32.xlu1 %v2809_v7 }
 0x602   : > { %2821 = vadd.xlane.f32.xlu1 %v2810_v8 }
 0x606   : > { %2823 = vadd.xlane.f32.xlu1 %v2811_v46 }
 0x60a   : > { %2825 = vadd.xlane.f32.xlu1 %v2812_v13 }
 0x60e   : > { %2827 = vadd.xlane.f32.xlu1 %v2813_v19 }
 0x612   : > { %2829 = vadd.xlane.f32.xlu1 %v2814_v20 }
 0x642   : > { %v2587_v60 = vpop.trf.xlu0 }
 0x643   : > { %4249 = vmatprep.mubr.msk.bf16.mxu1 %vm2595_vm0, %v2587_v60 }
 0x646   : > { %v2588_v52 = vpop.trf.xlu0 }
 0x647   : > { %4250 = vmatmul.mubr.msk.bf16.vlgmr.msra.gmra.mrb[40].mxu1 %vm2595_vm0, %v2588_v52 }
 0x64a   : > { %v2589_v21 = vpop.trf.xlu0 }
 0x64b   : > { %4253 = vmatprep.mubr.msk.bf16.mxu1 %vm2595_vm0, %v2589_v21 }
 0x64e   : > { %v2590_v11 = vpop.trf.xlu0 }
 0x64f   : > { %4254 = vmatmul.mubr.msk.bf16.gmra.mrb[44].mxu1 %vm2595_vm0, %v2590_v11 }
 0x652   : > { %v2591_v2 = vpop.trf.xlu0 }
 0x653   : > { %4257 = vmatprep.mubr.msk.bf16.mxu1 %vm2595_vm0, %v2591_v2 }
 0x656   : > { %v2592_v33 = vpop.trf.xlu0 }
 0x657   : > { %4258 = vmatmul.mubr.msk.bf16.gmra.mrb[48].mxu1 %vm2595_vm0, %v2592_v33 }
 0x65a   : > { %v2593_v35 = vpop.trf.xlu0 }
 0x65b   : > { %4261 = vmatprep.mubr.msk.bf16.mxu1 %vm2595_vm0, %v2593_v35 }
 0x65e   : > { %v2594_v15 = vpop.trf.xlu0 }
 0x65f   : > { %4262 = vmatmul.mubr.msk.bf16.gmra.mrb[52].mxu1 %vm2595_vm0, %v2594_v15 }
 0x660   : > { %4281 = vmatprep.mubr.bf16.mxu1 %v2730_v29 }
 0x683   : > { %v2816_v9 = vpop.xlane.xlu1 %2815 }
 0x684   : > { %v2831_v3 = vadd.f32 1e-06, %v2816_v9 }
 0x686   : > { %4736 = vrcp.f32 %v2831_v3 }
 0x687   : > { %v2818_v4 = vpop.xlane.xlu1 %2817 }
 0x688   : > { %v2832_v7 = vadd.f32 1e-06, %v2818_v4 }
 0x690   : > { %v4737_v60 = vpop.eup %4736 }
 0x71a   : > { %v4251_v23 = vpop.f32.mrb[40].mxu1 }
 0x71b   : > { %v2654_v10 = vpop.f32.mrb[41].mxu1 }
 0x71c   : > { %v4252_v27 = vpop.f32.mrb[42].mxu1 }
 0x71d   : > { %v2735_v36 = vpack.c.bf16 %v4252_v27, %v4251_v23  ;;  %v2657_v37 = vpop.f32.mrb[43].mxu1 }
 0x71e   : > { %v2734_v38 = vpack.c.bf16 %v2657_v37, %v2654_v10 }
 0x720   : > { %4265 = vmatprep.subr.bf16.mxu1 %v2734_v38 }
 0x721   : > { %4266 = vmatpush3.bf16.msra.mxu1 %v2734_v38 }
 0x722   : > { %v4255_v40 = vpop.f32.mrb[44].mxu1  ;;  %4267 = vmatprep.subr.bf16.mxu1 %v2735_v36 }
 0x723   : > { %v2670_v41 = vpop.f32.mrb[45].mxu1 }
 0x724   : > { %v4256_v44 = vpop.f32.mrb[46].mxu1 }
 0x725   : > { %v2737_v45 = vpack.c.bf16 %v4256_v44, %v4255_v40  ;;  %v2673_v49 = vpop.f32.mrb[47].mxu1  ;;  %4268 = vmatpush3.bf16.msra.mxu1 %v2735_v36 }
 0x726   : > { %v2736_v39 = vpack.c.bf16 %v2673_v49, %v2670_v41 }
 0x728   : > { %4269 = vmatprep.subr.bf16.mxu1 %v2736_v39 }
 0x729   : > { %4270 = vmatpush3.bf16.msra.mxu1 %v2736_v39 }
 0x72a   : > { %v4259_v18 = vpop.f32.mrb[48].mxu1  ;;  %4271 = vmatprep.subr.bf16.mxu1 %v2737_v45 }
 0x72b   : > { %v2686_v57 = vpop.f32.mrb[49].mxu1 }
 0x72c   : > { %v4260_v29 = vpop.f32.mrb[50].mxu1 }
 0x72d   : > { %v2739_v54 = vpack.c.bf16 %v4260_v29, %v4259_v18  ;;  %v2689_v56 = vpop.f32.mrb[51].mxu1  ;;  %4272 = vmatpush3.bf16.msra.mxu1 %v2737_v45 }
 0x72e   : > { %v2738_v58 = vpack.c.bf16 %v2689_v56, %v2686_v57 }
 0x730   : > { %4273 = vmatprep.subr.bf16.mxu1 %v2738_v58 }
 0x731   : > { %4274 = vmatpush3.bf16.msra.mxu1 %v2738_v58 }
 0x732   : > { %v4263_v30 = vpop.f32.mrb[52].mxu1  ;;  %4275 = vmatprep.subr.bf16.mxu1 %v2739_v54 }
 0x733   : > { %v2702_v47 = vpop.f32.mrb[53].mxu1 }
 0x734   : > { %v4264_v53 = vpop.f32.mrb[54].mxu1 }
 0x735   : > { %v2741_v61 = vpack.c.bf16 %v4264_v53, %v4263_v30  ;;  %v2705_v31 = vpop.f32.mrb[55].mxu1  ;;  %4276 = vmatpush3.bf16.msra.mxu1 %v2739_v54 }
 0x736   : > { %v2740_v62 = vpack.c.bf16 %v2705_v31, %v2702_v47 }
 0x738   : > { %4277 = vmatprep.subr.bf16.mxu1 %v2740_v62 }
 0x739   : > { %4278 = vmatpush3.bf16.msra.mxu1 %v2740_v62 }
 0x73a   : > { %4279 = vmatprep.subr.bf16.mxu1 %v2741_v61 }
 0x73d   : > { %4280 = vmatpush3.bf16.msra.mxu1 %v2741_v61  ;;  %v3759_v61 = vld [vmem:[%s6023_s26] ss:$0 sm:$0xff] }
 0x73e   : > { %4289 = vmatprep.subr.bf16.mxu1 %v4664_v1 }
 0x740   : > { %4282 = vmatmul.mubr.bf16.vlgmr.msra.gmra.mrb[56].mxu1 %v2731_v63  ;;  %v4671_v63 = vld [vmem:[#allocation12 + $0x38] sm:$0xff]  }
 0x741   : > { %4285 = vmatprep.mubr.bf16.mxu1 %v2732_v43  ;;  %4290 = vmatpush3.bf16.msra.mxu1 %v4664_v1  ;;  %v2820_v43 = vpop.xlane.xlu1 %2819 }
 0x742   : > { %4291 = vmatprep.subr.bf16.mxu1 %v4665_v42  ;;  %v2833_v5 = vadd.f32 1e-06, %v2820_v43 }
 0x744   : > { %4738 = vrcp.f32 %v2833_v5 }
 0x745   : > { %4292 = vmatpush3.bf16.msra.mxu1 %v4665_v42  ;;  %v2822_v51 = vpop.xlane.xlu1 %2821 }
 0x746   : > { %4293 = vmatprep.subr.bf16.mxu1 %v4666_v28  ;;  %v2834_v48 = vadd.f32 1e-06, %v2822_v51 }
 0x748   : > { %4286 = vmatmul.mubr.bf16.gmra.mrb[60].mxu1 %v2733_v34  ;;  %4740 = vrcp.f32 %v2834_v48 }
 0x749   : > { %4294 = vmatpush3.bf16.msra.mxu1 %v4666_v28  ;;  %v2824_v26 = vpop.xlane.xlu1 %2823  ;;  %4742 = vrcp.f32 %v2832_v7 }
 0x74a   : > { %4295 = vmatprep.subr.bf16.mxu1 %v4667_v0  ;;  %v2835_v46 = vadd.f32 1e-06, %v2824_v26 }
 0x74c   : > { %4744 = vrcp.f32 %v2835_v46 }
 0x74d   : > { %4296 = vmatpush3.bf16.msra.mxu1 %v4667_v0  ;;  %v2826_v34 = vpop.xlane.xlu1 %2825 }
 0x74e   : > { %4297 = vmatprep.subr.bf16.mxu1 %v4668_v50  ;;  %v2836_v20 = vadd.f32 1e-06, %v2826_v34  ;;  %v4739_v21 = vpop.eup %4738 }
 0x751   : > { %4298 = vmatpush3.bf16.msra.mxu1 %v4668_v50  ;;  %v2828_v6 = vpop.xlane.xlu1 %2827 }
 0x752   : > { %4299 = vmatprep.subr.bf16.mxu1 %v4669_v55  ;;  %v2837_v13 = vadd.f32 1e-06, %v2828_v6  ;;  %v4741_v2 = vpop.eup %4740 }
 0x753   : > { %v4743_v35 = vpop.eup %4742 }
 0x754   : > { %4746 = vrcp.f32 %v2837_v13 }
 0x755   : > { %4300 = vmatpush3.bf16.msra.mxu1 %v4669_v55  ;;  %v2830_v8 = vpop.xlane.xlu1 %2829 }
 0x756   : > { %4301 = vmatprep.subr.bf16.mxu1 %v4670_v59  ;;  %v2838_v19 = vadd.f32 1e-06, %v2830_v8  ;;  %v4745_v40 = vpop.eup %4744 }
 0x758   : > { %4748 = vrcp.f32 %v2838_v19 }
 0x759   : > { %4302 = vmatpush3.bf16.msra.mxu1 %v4670_v59  ;;  %4750 = vrcp.f32 %v2836_v20 }
 0x75a   : > { %4303 = vmatprep.subr.bf16.mxu1 %v4671_v63 }
 0x75d   : > { %4304 = vmatpush3.bf16.msra.mxu1 %v4671_v63 }
 0x75e   : > { %v4747_v44 = vpop.eup %4746 }
 0x762   : > { %v4749_v49 = vpop.eup %4748 }
 0x763   : > { %v4751_v18 = vpop.eup %4750 }
 0x813   : > { %v4283_v52 = vpop.f32.mrb[56].mxu1 }
 0x814   : > { %v2776_v11 = vpop.f32.mrb[57].mxu1  ;;  %v2849_v15 = vmul.f32 %v4739_v21, %v4283_v52 }
 0x815   : > { %v4284_v33 = vpop.f32.mrb[58].mxu1  ;;  %v2847_v27 = vmul.f32 %v4737_v60, %v2776_v11 }
 0x816   : > { %v2850_v23 = vmul.f32 %v4741_v2, %v4284_v33  ;;  %v2779_v10 = vpop.f32.mrb[59].mxu1 }
 0x817   : > { %v2848_v36 = vmul.f32 %v4743_v35, %v2779_v10 }
 0x818   : > { %v2856_v37 = vpack.c.bf16 %v2850_v23, %v2849_v15 }
 0x819   : > { %v2855_v38 = vpack.c.bf16 %v2848_v36, %v2847_v27 }
 0x81b   : > { %v4287_v41 = vpop.f32.mrb[60].mxu1  ;;  %4305 = vmatprep.mubr.bf16.mxu1 %v2855_v38 }
 0x81c   : > { %v2792_v45 = vpop.f32.mrb[61].mxu1  ;;  %4306 = vmatmul.mubr.bf16.vlgmr.msra.gmra.mrb[64].mxu1 %v2856_v37  ;;  %v2853_v57 = vmul.f32 %v4747_v44, %v4287_v41  ;;  %v4672_v44 = vld [vmem:[#allocation14] sm:$0xff]  }
 0x81d   : > { %v4288_v39 = vpop.f32.mrb[62].mxu1  ;;  %v2851_v56 = vmul.f32 %v4745_v40, %v2792_v45  ;;  %4313 = vmatprep.subr.bf16.mxu1 %v4672_v44 }
 0x81e   : > { %v2854_v29 = vmul.f32 %v4749_v49, %v4288_v39  ;;  %v2795_v54 = vpop.f32.mrb[63].mxu1  ;;  %4314 = vmatpush3.bf16.msra.mxu1 %v4672_v44 }
 0x81f   : > { %v2852_v58 = vmul.f32 %v4751_v18, %v2795_v54  ;;  %v4674_v54 = vld [vmem:[#allocation14 + $0x10] sm:$0xff]  }
 0x820   : > { %v2858_v30 = vpack.c.bf16 %v2854_v29, %v2853_v57  ;;  %v4673_v57 = vld [vmem:[#allocation14 + $0x8] sm:$0xff]  }
 0x821   : > { %v2857_v47 = vpack.c.bf16 %v2852_v58, %v2851_v56  ;;  %4315 = vmatprep.subr.bf16.mxu1 %v4673_v57  ;;  %v4675_v56 = vld [vmem:[#allocation14 + $0x18] sm:$0xff]   ;;  %v4676_v58 = vld [vmem:[#allocation14 + $0x20] sm:$0xff]  }
 0x822   : > { %4316 = vmatpush3.bf16.msra.mxu1 %v4673_v57  ;;  %v4680_v57 = vld [vmem:[#allocation15] sm:$0xff]  }
 0x823   : > { %4309 = vmatprep.mubr.bf16.mxu1 %v2857_v47  ;;  %4317 = vmatprep.subr.bf16.mxu1 %v4674_v54  ;;  %v4678_v47 = vld [vmem:[#allocation14 + $0x30] sm:$0xff]  }
 0x824   : > { %4310 = vmatmul.mubr.bf16.gmra.mrb[68].mxu1 %v2858_v30  ;;  %v4677_v30 = vld [vmem:[#allocation14 + $0x28] sm:$0xff]  }
 0x826   : > { %4318 = vmatpush3.bf16.msra.mxu1 %v4674_v54  ;;  %v4682_v54 = vld [vmem:[#allocation15 + $0x10] sm:$0xff]  }
 0x827   : > { %4319 = vmatprep.subr.bf16.mxu1 %v4675_v56 }
 0x82a   : > { %4320 = vmatpush3.bf16.msra.mxu1 %v4675_v56  ;;  %v4687_v56 = vld [vmem:[#allocation15 + $0x38] sm:$0xff]  }
 0x82b   : > { %4321 = vmatprep.subr.bf16.mxu1 %v4676_v58 }
 0x82e   : > { %4322 = vmatpush3.bf16.msra.mxu1 %v4676_v58  ;;  %v3760_v58 = vld [vmem:[%s6023_s26 + $0x1] ss:$0 sm:$0xff] }
 0x82f   : > { %4323 = vmatprep.subr.bf16.mxu1 %v4677_v30 }
 0x832   : > { %4324 = vmatpush3.bf16.msra.mxu1 %v4677_v30 }
 0x833   : > { %4325 = vmatprep.subr.bf16.mxu1 %v4678_v47 }
 0x836   : > { %4326 = vmatpush3.bf16.msra.mxu1 %v4678_v47 }
 0x8ef   : > { %v4307_v53 = vpop.f32.mrb[64].mxu1 }
 0x8f0   : > { %v2990_v31 = vadd.f32 %v4307_v53, %v5549_v12  ;;  %v2957_v62 = vpop.f32.mrb[65].mxu1  ;;  %v4679_v53 = vld [vmem:[#allocation14 + $0x38] sm:$0xff]  }
 0x8f1   : > { %v4308_v1 = vpop.f32.mrb[66].mxu1  ;;  %v2988_v28 = vadd.f32 %v2957_v62, %v5551_v17  ;;  %4327 = vmatprep.subr.bf16.mxu1 %v4679_v53 }
 0x8f2   : > { %v5784_v42 = vadd.f32 %v3759_v61, %v2990_v31  ;;  %v2960_v0 = vpop.f32.mrb[67].mxu1  ;;  %v2991_v55 = vadd.f32 %v4308_v1, %v5555_v24  ;;  %4328 = vmatpush3.bf16.msra.mxu1 %v4679_v53 }
 0x8f3   : > { %v5788_v50 = vadd.f32 %v3759_v61, %v2988_v28  ;;  %v2989_v12 = vadd.f32 %v2960_v0, %v5557_v25  ;;  %4337 = vmatprep.subr.bf16.mxu1 %v4680_v57 }
 0x8f4   : > { %3013 = vadd.xlane.f32.xlu1 %v5784_v42  ;;  %v5792_v4 = vadd.f32 %v3759_v61, %v2991_v55 }
 0x8f5   : > { %v5799_v26 = vadd.f32 %v3759_v61, %v2989_v12 }
 0x8f7   : > { %v4311_v59 = vpop.f32.mrb[68].mxu1 }
 0x8f8   : > { %3009 = vadd.xlane.f32.xlu1 %v5788_v50  ;;  %v2973_v63 = vpop.f32.mrb[69].mxu1  ;;  %v2994_v25 = vadd.f32 %v4311_v59, %v5566_v16 }
 0x8f9   : > { %v4312_v9 = vpop.f32.mrb[70].mxu1  ;;  %v2992_v24 = vadd.f32 %v2973_v63, %v5561_v32 }
 0x8fa   : > { %v2995_v43 = vadd.f32 %v4312_v9, %v5569_v22  ;;  %v2976_v51 = vpop.f32.mrb[71].mxu1  ;;  %v5812_v5 = vadd.f32 %v3759_v61, %v2994_v25 }
 0x8fb   : > { %v5804_v34 = vadd.f32 %v3759_v61, %v2992_v24  ;;  %v2993_v3 = vadd.f32 %v2976_v51, %v5563_v14 }
 0x8fc   : > { %v5796_v17 = vadd.f32 %v3759_v61, %v2995_v43  ;;  %3015 = vadd.xlane.f32.xlu1 %v5792_v4 }
 0x8fd   : > { %v5809_v22 = vadd.f32 %v3759_v61, %v2993_v3 }
 0x8fe   : > { %3023 = vadd.xlane.f32.xlu0 %v5796_v17 }
 0x900   : > { %3011 = vadd.xlane.f32.xlu1 %v5799_v26 }
 0x904   : > { %3017 = vadd.xlane.f32.xlu1 %v5804_v34 }
 0x908   : > { %3019 = vadd.xlane.f32.xlu1 %v5809_v22 }
 0x90c   : > { %3021 = vadd.xlane.f32.xlu1 %v5812_v5 }
 0x981   : > { %v3014_v32 = vpop.xlane.xlu1 %3013 }
 0x982   : > { %v3027_v6 = vmul.f32 0.0078125, %v3014_v32 }
 0x984   : > { %v5816_v48 = vsub.f32 %v5784_v42, %v3027_v6 }
 0x985   : > { %v3010_v7 = vpop.xlane.xlu1 %3009 }
 0x986   : > { %v3025_v8 = vmul.f32 0.0078125, %v3010_v7  ;;  %v3043_v14 = vmul.f32 %v5816_v48, %v5816_v48 }
 0x988   : > { %v5821_v16 = vsub.f32 %v5788_v50, %v3025_v8  ;;  %3053 = vadd.xlane.f32.xlu1 %v3043_v14 }
 0x989   : > { %v3016_v46 = vpop.xlane.xlu1 %3015 }
 0x98a   : > { %v3028_v13 = vmul.f32 0.0078125, %v3016_v46  ;;  %v3041_v19 = vmul.f32 %v5821_v16, %v5821_v16 }
 0x98b   : > { %v3024_v20 = vpop.xlane.xlu0 %3023 }
 0x98c   : > { %v5826_v60 = vsub.f32 %v5792_v4, %v3028_v13  ;;  %v3032_v52 = vmul.f32 0.0078125, %v3024_v20  ;;  %3049 = vadd.xlane.f32.xlu1 %v3041_v19 }
 0x98d   : > { %v3012_v21 = vpop.xlane.xlu1 %3011 }
 0x98e   : > { %v5829_v11 = vsub.f32 %v5796_v17, %v3032_v52  ;;  %v3026_v2 = vmul.f32 0.0078125, %v3012_v21  ;;  %v3044_v33 = vmul.f32 %v5826_v60, %v5826_v60 }
 0x990   : > { %v5834_v35 = vsub.f32 %v5799_v26, %v3026_v2  ;;  %3055 = vadd.xlane.f32.xlu1 %v3044_v33  ;;  %v3048_v15 = vmul.f32 %v5829_v11, %v5829_v11 }
 0x991   : > { %v3018_v23 = vpop.xlane.xlu1 %3017 }
 0x992   : > { %v3029_v10 = vmul.f32 0.0078125, %v3018_v23  ;;  %3063 = vadd.xlane.f32.xlu0 %v3048_v15  ;;  %v3042_v27 = vmul.f32 %v5834_v35, %v5834_v35 }
 0x994   : > { %v5841_v36 = vsub.f32 %v5804_v34, %v3029_v10  ;;  %3051 = vadd.xlane.f32.xlu1 %v3042_v27 }
 0x995   : > { %v3020_v37 = vpop.xlane.xlu1 %3019 }
 0x996   : > { %v3030_v38 = vmul.f32 0.0078125, %v3020_v37  ;;  %v3045_v40 = vmul.f32 %v5841_v36, %v5841_v36 }
 0x998   : > { %v5846_v41 = vsub.f32 %v5809_v22, %v3030_v38  ;;  %3057 = vadd.xlane.f32.xlu1 %v3045_v40 }
 0x999   : > { %v3022_v45 = vpop.xlane.xlu1 %3021 }
 0x99a   : > { %v3031_v49 = vmul.f32 0.0078125, %v3022_v45  ;;  %v3046_v39 = vmul.f32 %v5846_v41, %v5846_v41 }
 0x99c   : > { %v5851_v18 = vsub.f32 %v5812_v5, %v3031_v49  ;;  %3059 = vadd.xlane.f32.xlu1 %v3046_v39 }
 0x99e   : > { %v3047_v29 = vmul.f32 %v5851_v18, %v5851_v18 }
 0x9a0   : > { %3061 = vadd.xlane.f32.xlu1 %v3047_v29  ;;  %v4681_v29 = vld [vmem:[#allocation15 + $0x8] sm:$0xff]  }
 0xa15   : > { %v3054_v61 = vpop.xlane.xlu1 %3053 }
 0xa16   : > { %v3067_v1 = vmul.f32 0.0078125, %v3054_v61 }
 0xa18   : > { %v3075_v63 = vadd.f32 1e-05, %v3067_v1 }
 0xa19   : > { %v3050_v31 = vpop.xlane.xlu1 %3049 }
 0xa1a   : > { %v3065_v62 = vmul.f32 0.0078125, %v3050_v31 }
 0xa1c   : > { %v3073_v55 = vadd.f32 1e-05, %v3065_v62 }
 0xa1d   : > { %v3056_v28 = vpop.xlane.xlu1 %3055 }
 0xa1e   : > { %v3068_v0 = vmul.f32 0.0078125, %v3056_v28 }
 0xa1f   : > { %v3064_v51 = vpop.xlane.xlu0 %3063 }
 0xa20   : > { %v3076_v59 = vadd.f32 1e-05, %v3068_v0  ;;  %v3072_v25 = vmul.f32 0.0078125, %v3064_v51 }
 0xa21   : > { %v3052_v9 = vpop.xlane.xlu1 %3051 }
 0xa22   : > { %v3066_v12 = vmul.f32 0.0078125, %v3052_v9  ;;  %4752 = vrsqrt.f32 %v3076_v59  ;;  %v3080_v8 = vadd.f32 1e-05, %v3072_v25 }
 0xa23   : > { %4754 = vrsqrt.f32 %v3073_v55 }
 0xa24   : > { %v3074_v43 = vadd.f32 1e-05, %v3066_v12  ;;  %4756 = vrsqrt.f32 %v3075_v63 }
 0xa25   : > { %v3058_v24 = vpop.xlane.xlu1 %3057 }
 0xa26   : > { %4758 = vrsqrt.f32 %v3074_v43  ;;  %v3069_v3 = vmul.f32 0.0078125, %v3058_v24 }
 0xa28   : > { %v3077_v32 = vadd.f32 1e-05, %v3069_v3 }
 0xa29   : > { %v3060_v6 = vpop.xlane.xlu1 %3059 }
 0xa2a   : > { %v3070_v7 = vmul.f32 0.0078125, %v3060_v6  ;;  %4760 = vrsqrt.f32 %v3077_v32 }
 0xa2c   : > { %v3078_v14 = vadd.f32 1e-05, %v3070_v7  ;;  %v4753_v46 = vpop.eup %4752 }
 0xa2d   : > { %v3062_v13 = vpop.xlane.xlu1 %3061  ;;  %v4755_v19 = vpop.eup %4754  ;;  %v3092_v2 = vmul.f32 %v4753_v46, %v5826_v60 }
 0xa2e   : > { %4762 = vrsqrt.f32 %v3078_v14  ;;  %v3071_v20 = vmul.f32 0.0078125, %v3062_v13  ;;  %v4757_v52 = vpop.eup %4756  ;;  %v3089_v15 = vmul.f32 %v4755_v19, %v5821_v16 }
 0xa2f   : > { %4764 = vrsqrt.f32 %v3080_v8  ;;  %v3091_v10 = vmul.f32 %v4757_v52, %v5816_v48 }
 0xa30   : > { %v4759_v21 = vpop.eup %4758  ;;  %v3079_v33 = vadd.f32 1e-05, %v3071_v20 }
 0xa31   : > { %v3090_v23 = vmul.f32 %v4759_v21, %v5834_v35  ;;  %v3098_v37 = vpack.c.bf16 %v3092_v2, %v3091_v10 }
 0xa32   : > { %4766 = vrsqrt.f32 %v3079_v33 }
 0xa33   : > { %v3097_v27 = vpack.c.bf16 %v3090_v23, %v3089_v15 }
 0xa34   : > { %v4761_v38 = vpop.eup %4760 }
 0xa35   : > { %4329 = vmatprep.mubr.bf16.mxu1 %v3097_v27  ;;  %v3093_v44 = vmul.f32 %v4761_v38, %v5841_v36  ;;  %v4683_v36 = vld [vmem:[#allocation15 + $0x18] sm:$0xff]  }
 0xa36   : > { %4330 = vmatmul.mubr.bf16.vlgmr.msra.gmra.mrb[72].mxu1 %v3098_v37 }
 0xa37   : > { %4338 = vmatpush3.bf16.msra.mxu1 %v4680_v57 }
 0xa38   : > { %v4763_v40 = vpop.eup %4762  ;;  %4339 = vmatprep.subr.bf16.mxu1 %v4681_v29 }
 0xa39   : > { %v3094_v45 = vmul.f32 %v4763_v40, %v5846_v41  ;;  %v4765_v60 = vpop.eup %4764  ;;  %v4684_v41 = vld [vmem:[#allocation15 + $0x20] sm:$0xff]  }
 0xa3a   : > { %v3096_v35 = vmul.f32 %v4765_v60, %v5829_v11  ;;  %v4686_v11 = vld [vmem:[#allocation15 + $0x30] sm:$0xff]  }
 0xa3b   : > { %v3099_v49 = vpack.c.bf16 %v3094_v45, %v3093_v44  ;;  %4340 = vmatpush3.bf16.msra.mxu1 %v4681_v29 }
 0xa3c   : > { %v4767_v39 = vpop.eup %4766  ;;  %4341 = vmatprep.subr.bf16.mxu1 %v4682_v54 }
 0xa3d   : > { %4333 = vmatprep.mubr.bf16.mxu1 %v3099_v49  ;;  %v3095_v16 = vmul.f32 %v4767_v39, %v5851_v18  ;;  %v4685_v18 = vld [vmem:[#allocation15 + $0x28] sm:$0xff]  }
 0xa3f   : > { %v3100_v48 = vpack.c.bf16 %v3096_v35, %v3095_v16  ;;  %4342 = vmatpush3.bf16.msra.mxu1 %v4682_v54 }
 0xa40   : > { %4343 = vmatprep.subr.bf16.mxu1 %v4683_v36 }
 0xa41   : > { %4334 = vmatmul.mubr.bf16.gmra.mrb[76].mxu1 %v3100_v48 }
 0xa43   : > { %4344 = vmatpush3.bf16.msra.mxu1 %v4683_v36 }
 0xa44   : > { %4345 = vmatprep.subr.bf16.mxu1 %v4684_v41 }
 0xa47   : > { %4346 = vmatpush3.bf16.msra.mxu1 %v4684_v41 }
 0xa48   : > { %4347 = vmatprep.subr.bf16.mxu1 %v4685_v18 }
 0xa4b   : > { %4348 = vmatpush3.bf16.msra.mxu1 %v4685_v18 }
 0xa4c   : > { %4349 = vmatprep.subr.bf16.mxu1 %v4686_v11 }
 0xa4f   : > { %4350 = vmatpush3.bf16.msra.mxu1 %v4686_v11 }
 0xa50   : > { %4351 = vmatprep.subr.bf16.mxu1 %v4687_v56 }
 0xa53   : > { %4352 = vmatpush3.bf16.msra.mxu1 %v4687_v56 }
 0xb09   : > { %v4331_v30 = vpop.f32.mrb[72].mxu1 }
 0xb0a   : > { %v5866_v47 = vadd.f32 %v4331_v30, %v3760_v58  ;;  %v3204_v53 = vpop.f32.mrb[73].mxu1 }
 0xb0b   : > { %v5868_v61 = vadd.f32 %v3760_v58, %v3204_v53  ;;  %v4332_v31 = vpop.f32.mrb[74].mxu1 }
 0xb0c   : > { %v3237_v62 = vmul.f32 %v5866_v47, %v5866_v47  ;;  %v5872_v1 = vadd.f32 %v4332_v31, %v3760_v58  ;;  %v3207_v28 = vpop.f32.mrb[75].mxu1 }
 0xb0d   : > { %v3235_v0 = vmul.f32 %v5868_v61, %v5868_v61  ;;  %v5876_v55 = vadd.f32 %v3760_v58, %v3207_v28 }
 0xb0e   : > { %v3245_v59 = vmul.f32 %v3237_v62, %v5866_v47  ;;  %v3238_v63 = vmul.f32 %v5872_v1, %v5872_v1 }
 0xb0f   : > { %v3243_v9 = vmul.f32 %v3235_v0, %v5868_v61  ;;  %v3236_v12 = vmul.f32 %v5876_v55, %v5876_v55 }
 0xb10   : > { %v3253_v43 = vmul.f32 0.044715, %v3245_v59  ;;  %v3246_v51 = vmul.f32 %v3238_v63, %v5872_v1 }
 0xb11   : > { %v3251_v24 = vmul.f32 0.044715, %v3243_v9  ;;  %v3244_v3 = vmul.f32 %v3236_v12, %v5876_v55 }
 0xb12   : > { %v3261_v25 = vadd.f32 %v3253_v43, %v5866_v47  ;;  %v3254_v32 = vmul.f32 0.044715, %v3246_v51 }
 0xb13   : > { %v3259_v6 = vadd.f32 %v3251_v24, %v5868_v61  ;;  %v3252_v7 = vmul.f32 0.044715, %v3244_v3 }
 0xb14   : > { %v3269_v8 = vmul.f32 0.7978846, %v3261_v25  ;;  %v3262_v14 = vadd.f32 %v3254_v32, %v5872_v1  ;;  %v4335_v46 = vpop.f32.mrb[76].mxu1 }
 0xb15   : > { %v3267_v13 = vmul.f32 0.7978846, %v3259_v6  ;;  %v3260_v19 = vadd.f32 %v3252_v7, %v5876_v55  ;;  %v5890_v20 = vadd.f32 %v4335_v46, %v3760_v58  ;;  %v3220_v52 = vpop.f32.mrb[77].mxu1 }
 0xb16   : > { %4768 = vtanh.f32 %v3269_v8  ;;  %v3270_v21 = vmul.f32 0.7978846, %v3262_v14  ;;  %v5892_v2 = vadd.f32 %v3760_v58, %v3220_v52  ;;  %v4336_v33 = vpop.f32.mrb[78].mxu1 }
 0xb17   : > { %4770 = vtanh.f32 %v3267_v13  ;;  %v3268_v15 = vmul.f32 0.7978846, %v3260_v19  ;;  %v3241_v23 = vmul.f32 %v5890_v20, %v5890_v20  ;;  %v3232_v10 = vadd.f32 %v4336_v33, %v3760_v58  ;;  %v3223_v27 = vpop.f32.mrb[79].mxu1 }
 0xb18   : > { %4772 = vtanh.f32 %v3270_v21  ;;  %v3239_v37 = vmul.f32 %v5892_v2, %v5892_v2  ;;  %v3224_v38 = vadd.f32 %v3760_v58, %v3223_v27 }
 0xb19   : > { %4774 = vtanh.f32 %v3268_v15  ;;  %v3249_v40 = vmul.f32 %v3241_v23, %v5890_v20  ;;  %v3242_v44 = vmul.f32 %v3232_v10, %v3232_v10 }
 0xb1a   : > { %v3247_v45 = vmul.f32 %v3239_v37, %v5892_v2  ;;  %v3240_v60 = vmul.f32 %v3224_v38, %v3224_v38 }
 0xb1b   : > { %v3257_v49 = vmul.f32 0.044715, %v3249_v40  ;;  %v3250_v39 = vmul.f32 %v3242_v44, %v3232_v10 }
 0xb1c   : > { %v3255_v16 = vmul.f32 0.044715, %v3247_v45  ;;  %v3248_v35 = vmul.f32 %v3240_v60, %v3224_v38  ;;  %v3769_v45 = vld [vmem:[%s6023_s26 + $0x2] ss:$0 sm:$0xff] }
 0xb1d   : > { %v3265_v48 = vadd.f32 %v3257_v49, %v5890_v20  ;;  %v3258_v57 = vmul.f32 0.044715, %v3250_v39 }
 0xb1e   : > { %v3263_v29 = vadd.f32 %v3255_v16, %v5892_v2  ;;  %v3256_v54 = vmul.f32 0.044715, %v3248_v35 }
 0xb1f   : > { %v3273_v36 = vmul.f32 0.7978846, %v3265_v48  ;;  %v3266_v41 = vadd.f32 %v3258_v57, %v3232_v10 }
 0xb20   : > { %v4769_v18 = vpop.eup %4768  ;;  %v3271_v11 = vmul.f32 0.7978846, %v3263_v29  ;;  %v3264_v56 = vadd.f32 %v3256_v54, %v3224_v38 }
 0xb21   : > { %v4771_v58 = vpop.eup %4770  ;;  %v3285_v30 = vadd.f32 1.0, %v4769_v18  ;;  %4776 = vtanh.f32 %v3273_v36  ;;  %v3274_v53 = vmul.f32 0.7978846, %v3266_v41 }
 0xb22   : > { %v4773_v31 = vpop.eup %4772  ;;  %4778 = vtanh.f32 %v3271_v11  ;;  %v3272_v62 = vmul.f32 0.7978846, %v3264_v56  ;;  %v3283_v28 = vadd.f32 1.0, %v4771_v58 }
 0xb23   : > { %v4775_v0 = vpop.eup %4774  ;;  %v3293_v59 = vmul.f32 0.5, %v3285_v30  ;;  %v3286_v63 = vadd.f32 1.0, %v4773_v31  ;;  %4780 = vtanh.f32 %v3274_v53 }
 0xb24   : > { %4782 = vtanh.f32 %v3272_v62  ;;  %v3284_v9 = vadd.f32 1.0, %v4775_v0  ;;  %v3291_v12 = vmul.f32 0.5, %v3283_v28 }
 0xb25   : > { %v3294_v43 = vmul.f32 0.5, %v3286_v63  ;;  %v3301_v24 = vmul.f32 %v3293_v59, %v5866_v47 }
 0xb26   : > { %v3292_v51 = vmul.f32 0.5, %v3284_v9  ;;  %v3299_v25 = vmul.f32 %v3291_v12, %v5868_v61 }
 0xb27   : > { %v3302_v3 = vmul.f32 %v3294_v43, %v5872_v1 }
 0xb28   : > { %v3300_v32 = vmul.f32 %v3292_v51, %v5876_v55 }
 0xb29   : > { %v3308_v6 = vpack.c.bf16 %v3302_v3, %v3301_v24 }
 0xb2a   : > { %v3307_v7 = vpack.c.bf16 %v3300_v32, %v3299_v25 }
 0xb2b   : > { %v4777_v8 = vpop.eup %4776 }
 0xb2c   : > { %v4779_v14 = vpop.eup %4778  ;;  %4353 = vmatprep.mubr.bf16.mxu1 %v3307_v7  ;;  %v3289_v46 = vadd.f32 1.0, %v4777_v8 }
 0xb2d   : > { %v4781_v13 = vpop.eup %4780  ;;  %4354 = vmatmul.mubr.bf16.vlgmr.msra.gmra.mrb[80].mxu1 %v3308_v6  ;;  %v3287_v19 = vadd.f32 1.0, %v4779_v14 }
 0xb2e   : > { %v4783_v52 = vpop.eup %4782  ;;  %v3290_v21 = vadd.f32 1.0, %v4781_v13  ;;  %v3297_v33 = vmul.f32 0.5, %v3289_v46 }
 0xb2f   : > { %v3288_v15 = vadd.f32 1.0, %v4783_v52  ;;  %v3295_v47 = vmul.f32 0.5, %v3287_v19 }
 0xb30   : > { %v3298_v23 = vmul.f32 0.5, %v3290_v21  ;;  %v3305_v61 = vmul.f32 %v3297_v33, %v5890_v20 }
 0xb31   : > { %v3296_v1 = vmul.f32 0.5, %v3288_v15  ;;  %v3303_v55 = vmul.f32 %v3295_v47, %v5892_v2 }
 0xb32   : > { %v3306_v27 = vmul.f32 %v3298_v23, %v3232_v10 }
 0xb33   : > { %v3304_v37 = vmul.f32 %v3296_v1, %v3224_v38 }
 0xb34   : > { %v3310_v40 = vpack.c.bf16 %v3306_v27, %v3305_v61 }
 0xb35   : > { %v3309_v44 = vpack.c.bf16 %v3304_v37, %v3303_v55 }
 0xb37   : > { %4357 = vmatprep.mubr.bf16.mxu1 %v3309_v44 }
 0xb38   : > { %4358 = vmatmul.mubr.bf16.gmra.mrb[84].mxu1 %v3310_v40 }
 0xc00   : > { %v4355_v60 = vpop.f32.mrb[80].mxu1 }
 0xc01   : > { %v3423_v49 = vadd.f32 %v4355_v60, %v3769_v45  ;;  %v3414_v39 = vpop.f32.mrb[81].mxu1 }
 0xc02   : > { %v3415_v16 = vadd.f32 %v3769_v45, %v3414_v39  ;;  %v4356_v35 = vpop.f32.mrb[82].mxu1 }
 0xc03   : > { %v3447_v20 = vadd.f32 %v3423_v49, %v5784_v42  ;;  %v3426_v10 = vadd.f32 %v4356_v35, %v3769_v45  ;;  %v3417_v48 = vpop.f32.mrb[83].mxu1 }
 0xc04   : > { %v3445_v2 = vadd.f32 %v3415_v16, %v5788_v50  ;;  %v3418_v38 = vadd.f32 %v3769_v45, %v3417_v48 }
 0xc05   : > { %3455 = vst [vmem:[%s506_s21 + $0x10] sm:$0xff] %v3447_v20  ;;  %v3448_v57 = vadd.f32 %v3426_v10, %v5792_v4 }
 0xc06   : > { %3453 = vst [vmem:[%s506_s21] sm:$0xff] %v3445_v2  ;;  %v3446_v29 = vadd.f32 %v3418_v38, %v5799_v26 }
 0xc07   : > { %3456 = vst [vmem:[%s506_s21 + $0x18] sm:$0xff] %v3448_v57 }
 0xc08   : > { %3454 = vst [vmem:[%s506_s21 + $0x8] sm:$0xff] %v3446_v29 }
 0xc0b   : > { %v4359_v54 = vpop.f32.mrb[84].mxu1 }
 0xc0c   : > { %v3439_v36 = vadd.f32 %v4359_v54, %v3769_v45  ;;  %v3430_v42 = vpop.f32.mrb[85].mxu1 }
 0xc0d   : > { %v3431_v41 = vadd.f32 %v3769_v45, %v3430_v42  ;;  %v4360_v18 = vpop.f32.mrb[86].mxu1 }
 0xc0e   : > { %v3451_v50 = vadd.f32 %v3439_v36, %v5812_v5  ;;  %v3442_v11 = vadd.f32 %v4360_v18, %v3769_v45  ;;  %v3433_v56 = vpop.f32.mrb[87].mxu1 }
 0xc0f   : > { %v3449_v4 = vadd.f32 %v3431_v41, %v5804_v34  ;;  %v3434_v26 = vadd.f32 %v3769_v45, %v3433_v56 }
 0xc10   : > { %3459 = vst [vmem:[%s506_s21 + $0x30] sm:$0xff] %v3451_v50  ;;  %v3452_v58 = vadd.f32 %v3442_v11, %v5796_v17 }
 0xc11   : > { %3457 = vst [vmem:[%s506_s21 + $0x20] sm:$0xff] %v3449_v4  ;;  %v3450_v5 = vadd.f32 %v3434_v26, %v5809_v22 }
 0xc12   : > { %3460 = vst [vmem:[%s506_s21 + $0x38] sm:$0xff] %v3452_v58 }
 0xc13   : > { %3458 = vst [vmem:[%s506_s21 + $0x28] sm:$0xff] %v3450_v5 }
 0xc14   : > { %5023 = shalt.err (!%p5020_p10)
}
 0xc15   : > { %s5024_s1 = scalar_lea.hbm %s5926_s23, 1024  ;;  %s5028_s10 = scalar_lea.hbm %s6024_s29, 2048 }
 0xc16   : > { %p5025_p11 = scmp.ne.s32.totalorder %s5926_s23, %s5024_s1  ;;  %p5029_p9 = scmp.lt.u32.totalorder %s5926_s23, %s6024_s29 }
 0xc17   : > { %p5030_p7 = scmp.lt.u32.totalorder %s5028_s10, %s5024_s1  ;;  %p5032_p12 = scmp.lt.u32.totalorder %s5024_s1, %s5926_s23 }
 0xc18   : > { %p5026_p3 = pnand %p5025_p11, %p6025_p1 }
 0xc19   : > { %p5031_p4 = por %p5030_p7, %p5029_p9 }
 0xc1a   : > { %p5027_p5 = pneg %p5026_p3 }
 0xc1b   : > { %p5033_p13 = por %p5032_p12, %p5031_p4 }
 0xc1d   : > { %p5034_p0 = pnand %p5033_p13, %p5027_p5 }
 0xc1f   : > { %5037 = shalt.err (!%p5034_p0)
}
 0xc20   : > { %s5112_s22 = smov 128   ;;  %s5113_s14 = smov 8  }
 0xc21   : > { %4455 = dma.vmem_to_hbm [thread:$0]  (%p6025_p1), %s5919_s24, 1024, %s5926_s23, %s3462_s11, %s5112_s22, %s5112_s22, %s5113_s14  }
 0xc22 PF: > { %s3490_s15 = sand.u32 1, %s5080_s17   ;;  %p6026_p2 = scmp.ne.s32.totalorder %s6009_s6, 0 }
 0xc23   : > { %p6027_p8 = scmp.ge.s32.totalorder %s5092_s20, 2  ;;  %s3491_s27 = scalar_lea.sflag [#allocation5], %s3490_s15 }
 0xc25   : > { %p4484_p6 = pnand %p6027_p8, %p6026_p2 }
 0xc27   : > { %5075 = dma.done.wait (!%p4484_p6), %s3491_s27, 1024  }
 0xc28   : > { %5077 = vsyncadd (!%p4484_p6), %s3491_s27, 4294966272  ;;  %p28_p10 = scmp.ge.s32.totalorder %s5386_s16, 4   ;;  %s6028_s17 = smov %s5084_s18 }
 0xc29   : > { %s6029_s18 = smov %s5088_s19  ;;  %s6030_s19 = smov %s5398_s3 }
 0xc2a   : > { %s6031_s20 = smov %s5386_s16  ;;  %30 = sbr.rel (!%p28_p10) target bundleno = 15 (0xf), region = 147 }
 0xc31   :  { %3496 = vsyncpa [#allocation4], 1 }
 0xc32   :  { %3498 = vsyncpa [#allocation4 + $0x1], 1 }
 0xc33   :  { %3499 = vsyncpa [#allocation7], 1 }
 0xc34   :  { %3500 = vsyncpa [#allocation10], 1 }
 0xc35   :  { %3501 = vsyncpa [#allocation13], 1 }
 0xc36   :  { %3502 = vsyncpa [#allocation16], 1 }
 0xc37   :  { %3503 = vsyncpa [#allocation5], 1 }
 0xc38   :  { %3505 = vsyncpa [#allocation5 + $0x1], 1 }

</bundles_post_ra>
